<compile_context>
chip_gen: v7x
topology: tpu7x:2x2x1
jax: 0.10.0
libtpu: 0.0.40
codegen_flags: <defaults>
</compile_context>

<pallas_src>
import functools

import jax
import jax.numpy as jnp
from jax import lax
from jax.experimental import pallas as pl
from jax.experimental.pallas import tpu as pltpu


def _round_up(x, m):
    return (x + m - 1) // m * m


# ----------------------------------------------------------------------------
# Host-side weight packing (gate reorder + direction interleave + padding)
# ----------------------------------------------------------------------------
# Kernel gate-column layout (width 8*Hp):
#   [ i_f | i_b | f_f | f_b | o_f | o_b | g_f | g_b ]
# sigmoid gates (i, f, o) contiguous in [0, 6Hp); tanh gate (g) in [6Hp, 8Hp).
# Recurrent state layout: [h_f | h_b] / [c_f | c_b]  (width 2*Hp).

def _scatter_gate_cols(mat, H, Hp, direction):
    """(R, 4H) PyTorch gate order [i|f|g|o] -> (R, 8*Hp) interleaved layout.

    Only the `direction` half of each gate pair is filled; everything else 0.
    """
    R = mat.shape[0]
    gi, gf, gg, go = (mat[:, k * H:(k + 1) * H] for k in range(4))
    out = jnp.zeros((R, 8 * Hp), mat.dtype)
    for slot, blk in enumerate((gi, gf, go, gg)):          # kernel order i, f, o, g
        col0 = (2 * slot + direction) * Hp
        out = out.at[:, col0:col0 + H].set(blk)
    return out


def _pad_hidden_input_rows(w_ih, H, Hp):
    """Row-pad a (2H, 4H) input weight (input = previous layer's [h_f|h_b])
    to (2*Hp, 4H) so it matches the padded [h_f(Hp)|h_b(Hp)] layer output."""
    out = jnp.zeros((2 * Hp, w_ih.shape[1]), w_ih.dtype)
    out = out.at[0:H, :].set(w_ih[0:H])
    out = out.at[Hp:Hp + H, :].set(w_ih[H:2 * H])
    return out


def _pack_layer(fwd_p, bwd_p, H, Hp, input_is_hidden):
    """Return (w_ih_f_sc, w_ih_b_sc, w_hh_blk, b_comb) in kernel layout (f32)."""
    w_ih_f, w_ih_b = fwd_p["w_ih"], bwd_p["w_ih"]
    if input_is_hidden:
        w_ih_f = _pad_hidden_input_rows(w_ih_f, H, Hp)
        w_ih_b = _pad_hidden_input_rows(w_ih_b, H, Hp)
    # NOTE: scattering each direction's W_ih into the full 8*Hp layout doubles
    # the hoisted input-projection MACs (half the columns are zero) but keeps
    # the serial per-step body free of any lane-interleave work.
    w_ih_f_sc = _scatter_gate_cols(w_ih_f.astype(jnp.float32), H, Hp, 0)
    w_ih_b_sc = _scatter_gate_cols(w_ih_b.astype(jnp.float32), H, Hp, 1)

    # block-structured recurrent weight: rows [h_f(Hp) | h_b(Hp)], interleaved
    # gate columns.
    # TODO(synk): for 2*Hp > one MXU pass (256 on v6e/v7x, 128 on v5e) switch
    # to two back-to-back (Bp,Hp)x(Hp,4Hp) matmuls to drop the 2x zero-MACs.
    w_hh_blk = jnp.zeros((2 * Hp, 8 * Hp), jnp.float32)
    w_hh_blk = w_hh_blk.at[0:H, :].set(
        _scatter_gate_cols(fwd_p["w_hh"].astype(jnp.float32), H, Hp, 0))
    w_hh_blk = w_hh_blk.at[Hp:Hp + H, :].set(
        _scatter_gate_cols(bwd_p["w_hh"].astype(jnp.float32), H, Hp, 1))

    b_comb = (_scatter_gate_cols(fwd_p["b"].astype(jnp.float32), H, Hp, 0)
              + _scatter_gate_cols(bwd_p["b"].astype(jnp.float32), H, Hp, 1))
    return w_ih_f_sc, w_ih_b_sc, w_hh_blk, b_comb


# ----------------------------------------------------------------------------
# Pallas kernels
# ----------------------------------------------------------------------------
def _bilstm_layer_kernel(xf_ref, xb_ref, wf_ref, wb_ref, whh_ref, bc_ref,
                         of_ref, ob_ref, h_scr, c_scr, *, Tc, Bp, Hp):
    """Fused bidirectional LSTM layer, one time-chunk per grid step.

    xf_ref : (Tc*Bp, I)    chunk c of the input (forward time order)
    xb_ref : (Tc*Bp, I)    chunk nC-1-c of the SAME input (for the bwd dir)
    wf/wb  : (I, 8Hp)      direction-scattered input->gate weights (dot dtype)
    whh_ref: (2Hp, 8Hp)    f32 block-structured recurrent weight
    bc_ref : (1, 8Hp)      f32 combined (b_ih + b_hh) bias, both directions
    of_ref : (Tc*Bp, Hp)   fwd hidden states of chunk c        (natural order)
    ob_ref : (Tc*Bp, Hp)   bwd hidden states of chunk nC-1-c   (natural order)
    h_scr, c_scr : (Bp, 2Hp) f32 persistent recurrent state [fwd | bwd]
    """
    @pl.when(pl.program_id(0) == 0)
    def _():
        h_scr[...] = jnp.zeros(h_scr.shape, h_scr.dtype)
        c_scr[...] = jnp.zeros(c_scr.shape, c_scr.dtype)

    # Hoisted input->gate projection: one large MXU matmul per direction per
    # chunk (bias folded into the fwd stream only); off the serial path.
    gx_f = (jnp.dot(xf_ref[...], wf_ref[...],
                    preferred_element_type=jnp.float32) + bc_ref[...])   # (Tc*Bp, 8Hp)
    gx_b = jnp.dot(xb_ref[...], wb_ref[...],
                   preferred_element_type=jnp.float32)                   # (Tc*Bp, 8Hp)

    w_hh = whh_ref[...]            # f32, loop invariant
    h = h_scr[...]                 # (Bp, 2Hp) f32 : [h_f | h_b]
    c = c_scr[...]                 # (Bp, 2Hp) f32 : [c_f | c_b]

    # Static (unrolled) loop over the chunk: gives the scheduler visibility to
    # co-issue the MXU push, EUP sigmoid/tanh and VPU gate math across steps.
    # TODO(synk): for very large Tc switch to lax.fori_loop(..., unroll=k).
    for s in range(Tc):
        # both directions' hidden->gate projections in ONE matmul; recurrence
        # stays f32 end-to-end (no per-step bf16 recast of the carried state).
        gh = jnp.dot(h, w_hh, preferred_element_type=jnp.float32)        # (Bp, 8Hp)
        # fwd consumes local time s; bwd consumes local time Tc-1-s of its
        # (time-reversed-by-BlockSpec) chunk -> no HBM reversal copies.
        g = (gh
             + gx_f[s * Bp:(s + 1) * Bp, :]
             + gx_b[(Tc - 1 - s) * Bp:(Tc - s) * Bp, :])
        # single gate-math dispatch covering BOTH directions (interleaved cols,
        # every slice on a 2*Hp = 256-lane boundary).
        sg = jax.nn.sigmoid(g[:, :6 * Hp])
        gg = jnp.tanh(g[:, 6 * Hp:])
        i_g = sg[:, :2 * Hp]
        f_g = sg[:, 2 * Hp:4 * Hp]
        o_g = sg[:, 4 * Hp:]
        c = f_g * c + i_g * gg
        h = o_g * jnp.tanh(c)
        # direct per-step lane-dense stores into the output tile (no lists /
        # Tc-way concat -> O(1) vreg live set); Bp % 8 == 0, Hp % 128 == 0.
        of_ref[s * Bp:(s + 1) * Bp, :] = h[:, :Hp]
        ob_ref[(Tc - 1 - s) * Bp:(Tc - s) * Bp, :] = h[:, Hp:]

    h_scr[...] = h                 # carry recurrent state to the next chunk
    c_scr[...] = c


def _linear_kernel(x_ref, w_ref, b_ref, o_ref):
    """o = x @ w + b  (decoder)."""
    o_ref[...] = (
        jnp.dot(x_ref[...], w_ref[...], preferred_element_type=jnp.float32)
        + b_ref[...]
    )


# ----------------------------------------------------------------------------
# Pallas wrappers
# ----------------------------------------------------------------------------
def _invariant_spec(shape):
    """Spec for a loop-invariant operand (constant index_map).

    Single-buffered when the API supports it: the default double-buffering
    would allocate a second, never-refilled VMEM copy of each weight.
    """
    if hasattr(pl, "Buffered"):
        try:
            return pl.BlockSpec(shape, lambda c: (0, 0),
                                pipeline_mode=pl.Buffered(1))
        except TypeError:
            pass
    return pl.BlockSpec(shape, lambda c: (0, 0))


def _layer_vmem_limit_bytes(Tc, Bp, Hp, I, x_itemsize):
    """Per-generation VMEM budget (review: re-derive instead of flat 32 MiB)."""
    est = (2 * 2 * Tc * Bp * I * x_itemsize            # two x streams, double-buffered
           + 2 * 2 * Tc * Bp * Hp * 4                  # two f32 output streams, dbl-buf
           + 2 * I * 8 * Hp * x_itemsize               # scattered W_ih (single-buffered)
           + (2 * Hp) * (8 * Hp) * 4 + 8 * Hp * 4      # W_hh + bias (f32)
           + 2 * Tc * Bp * 8 * Hp * 4                  # live hoisted gate projections
           + 2 * Bp * 2 * Hp * 4)                      # h / c scratch
    try:
        cap = int(pltpu.get_tpu_info().vmem_capacity_bytes)
    except Exception:
        cap = 64 * 1024 * 1024                         # v7x per-core VMEM (worst case)
    return int(min(0.75 * cap, max(32 * 1024 * 1024, 1.5 * est)))


def bilstm_layer(x2d, w_ih_f, w_ih_b, w_hh_blk, b_comb, *,
                 seq_len, batch_p, hidden_p, time_chunk=None):
    """x2d: (T*Bp, I) -> (fwd_hidden (T*Bp, Hp) f32, bwd_hidden (T*Bp, Hp) f32)."""
    T, Bp, Hp = seq_len, batch_p, hidden_p
    I = x2d.shape[-1]
    Tc = T if time_chunk is None else time_chunk
    if T % Tc != 0:
        raise ValueError(f"time_chunk {Tc} must divide seq_len {T}")
    nC = T // Tc

    kernel = functools.partial(_bilstm_layer_kernel, Tc=Tc, Bp=Bp, Hp=Hp)
    # TODO(synk): on v7x, split the two directions across the 2 TensorCores
    # (leading "parallel" grid axis with per-direction W_hh/state) instead of
    # the fused block-diag matmul; on 1-TC chips the fused form is faster.
    out_f, out_b = pl.pallas_call(
        kernel,
        out_shape=(jax.ShapeDtypeStruct((T * Bp, Hp), jnp.float32),
                   jax.ShapeDtypeStruct((T * Bp, Hp), jnp.float32)),
        grid_spec=pltpu.PrefetchScalarGridSpec(
            num_scalar_prefetch=0,
            grid=(nC,),
            in_specs=[
                # TODO(synk): passing x2d twice doubles input DMA traffic; if
                # the profile shows exposed input DMA for wide inner layers,
                # DMA the reversed chunk manually from a single pl.ANY input.
                pl.BlockSpec((Tc * Bp, I), lambda c: (c, 0)),            # x (fwd chunks)
                pl.BlockSpec((Tc * Bp, I), lambda c: (nC - 1 - c, 0)),   # x (bwd chunks)
                _invariant_spec((I, 8 * Hp)),                            # W_ih fwd (scattered)
                _invariant_spec((I, 8 * Hp)),                            # W_ih bwd (scattered)
                _invariant_spec((2 * Hp, 8 * Hp)),                       # W_hh block (f32)
                _invariant_spec((1, 8 * Hp)),                            # combined bias (f32)
            ],
            out_specs=[
                pl.BlockSpec((Tc * Bp, Hp), lambda c: (c, 0)),           # fwd hidden
                pl.BlockSpec((Tc * Bp, Hp), lambda c: (nC - 1 - c, 0)),  # bwd hidden
            ],
            scratch_shapes=[
                pltpu.VMEM((Bp, 2 * Hp), jnp.float32),   # h state (persists over grid)
                pltpu.VMEM((Bp, 2 * Hp), jnp.float32),   # c state
            ],
        ),
        compiler_params=pltpu.CompilerParams(
            dimension_semantics=("arbitrary",),          # sequential recurrence over chunks
            vmem_limit_bytes=_layer_vmem_limit_bytes(
                Tc, Bp, Hp, I, jnp.dtype(x2d.dtype).itemsize),
        ),
    )(x2d, x2d, w_ih_f, w_ih_b, w_hh_blk, b_comb)
    return out_f, out_b


def linear(x, w, b):
    """Tiny decoder; pad the output dim to 128 lanes for a dense store."""
    N = w.shape[1]
    Np = _round_up(N, 128)
    w_p = jnp.pad(w, ((0, 0), (0, Np - N)))
    b_p = jnp.pad(b, ((0, 0), (0, Np - N)))
    vmem = pl.BlockSpec(memory_space=pltpu.MemorySpace.VMEM)
    out = pl.pallas_call(
        _linear_kernel,
        out_shape=jax.ShapeDtypeStruct((x.shape[0], Np), jnp.float32),
        in_specs=[vmem, vmem, vmem],
        out_specs=vmem,
    )(x, w_p, b_p)
    return out[:, :N]


# ----------------------------------------------------------------------------
# Model: parameters + forward
# ----------------------------------------------------------------------------
def init_params(key, vocab_size, embed_size, num_hiddens, num_layers):
    keys = jax.random.split(key, 3 + 8 * num_layers)
    k_iter = iter(keys)
    H = num_hiddens
    scale = 1.0 / jnp.sqrt(H)

    params = {
        "embedding": jax.random.normal(next(k_iter), (vocab_size, embed_size), jnp.float32),
        "lstm": [],
    }
    for layer in range(num_layers):
        in_size = embed_size if layer == 0 else 2 * H
        layer_p = {}
        for direction in ("fwd", "bwd"):
            w_ih = jax.random.uniform(next(k_iter), (in_size, 4 * H), jnp.float32, -scale, scale)
            w_hh = jax.random.uniform(next(k_iter), (H, 4 * H), jnp.float32, -scale, scale)
            b_ih = jax.random.uniform(next(k_iter), (1, 4 * H), jnp.float32, -scale, scale)
            b_hh = jax.random.uniform(next(k_iter), (1, 4 * H), jnp.float32, -scale, scale)
            layer_p[direction] = {"w_ih": w_ih, "w_hh": w_hh, "b": b_ih + b_hh}
        params["lstm"].append(layer_p)

    dec_in = 4 * H
    dscale = 1.0 / jnp.sqrt(dec_in)
    params["dec_w"] = jax.random.uniform(next(k_iter), (dec_in, 2), jnp.float32, -dscale, dscale)
    params["dec_b"] = jax.random.uniform(next(k_iter), (1, 2), jnp.float32, -dscale, dscale)
    return params


def birnn_forward(params, inputs, *, dot_dtype=jnp.bfloat16, time_chunk=None):
    """inputs: (batch, seq_len) int32 token ids  ->  (batch, 2) logits (f32)."""
    B, T = inputs.shape
    H = params["lstm"][0]["fwd"]["w_hh"].shape[0]
    Bp = _round_up(B, 8)        # sublane-align the batch
    Hp = _round_up(H, 128)      # lane-align the hidden size

    # TODO(synk): embedding gather kept as plain-JAX jnp.take (HBM gather has no
    # profitable Pallas equivalent at these sizes).
    emb = jnp.take(params["embedding"], inputs.T, axis=0).astype(jnp.float32)   # (T, B, E)
    emb = jnp.pad(emb, ((0, 0), (0, Bp - B), (0, 0)))                           # (T, Bp, E)
    x2d = emb.reshape(T * Bp, -1).astype(dot_dtype)

    x2d_f32 = None
    for layer_idx, layer_p in enumerate(params["lstm"]):
        wf, wb, whh_blk, bc = _pack_layer(layer_p["fwd"], layer_p["bwd"],
                                          H, Hp, input_is_hidden=layer_idx > 0)
        out_f, out_b = bilstm_layer(
            x2d, wf.astype(dot_dtype), wb.astype(dot_dtype), whh_blk, bc,
            seq_len=T, batch_p=Bp, hidden_p=Hp, time_chunk=time_chunk)
        x2d_f32 = jnp.concatenate([out_f, out_b], axis=-1)                      # (T*Bp, 2Hp)
        x2d = x2d_f32.astype(dot_dtype)

    # encoding = cat(outputs[0], outputs[-1]); strip batch / lane padding.
    h0 = x2d_f32[:B]                                                            # (B, 2Hp)
    hT = x2d_f32[(T - 1) * Bp:(T - 1) * Bp + B]                                 # (B, 2Hp)
    enc = jnp.concatenate([h0[:, :H], h0[:, Hp:Hp + H],
                           hT[:, :H], hT[:, Hp:Hp + H]], axis=-1)               # (B, 4H)
    # tiny decoder kept in f32 (negligible work, avoids bf16 noise at the output)
    return linear(enc, params["dec_w"], params["dec_b"])                        # (B, 2)


# ----------------------------------------------------------------------------
# Pure-JAX reference (for correctness check)
# ----------------------------------------------------------------------------
def _lstm_layer_ref(x, w_ih, w_hh, b):
    T, B, _ = x.shape
    H = w_hh.shape[0]

    def step(carry, x_t):
        h, c = carry
        gates = x_t @ w_ih + h @ w_hh + b
        i = jax.nn.sigmoid(gates[:, 0:H])
        f = jax.nn.sigmoid(gates[:, H:2 * H])
        g = jnp.tanh(gates[:, 2 * H:3 * H])
        o = jax.nn.sigmoid(gates[:, 3 * H:4 * H])
        c = f * c + i * g
        h = o * jnp.tanh(c)
        return (h, c), h

    init = (jnp.zeros((B, H), jnp.float32), jnp.zeros((B, H), jnp.float32))
    _, hs = lax.scan(step, init, x)
    return hs


def birnn_forward_ref(params, inputs):
    emb = jnp.take(params["embedding"], inputs.T, axis=0).astype(jnp.float32)
    x = emb
    for layer_p in params["lstm"]:
        f = layer_p["fwd"]
        b = layer_p["bwd"]
        out_f = _lstm_layer_ref(x, f["w_ih"], f["w_hh"], f["b"])
        out_b = _lstm_layer_ref(x[::-1], b["w_ih"], b["w_hh"], b["b"])[::-1]
        x = jnp.concatenate([out_f, out_b], axis=-1)
    encoding = jnp.concatenate([x[0], x[-1]], axis=-1)
    return encoding @ params["dec_w"] + params["dec_b"]


# ----------------------------------------------------------------------------
if __name__ == "__main__":
    vocab_size = 50
    embed_size = 32
    num_hiddens = 32
    num_layers = 2
    batch = 2
    seq_len = 8

    key = jax.random.PRNGKey(0)
    k_param, k_inp = jax.random.split(key)
    params = init_params(k_param, vocab_size, embed_size, num_hiddens, num_layers)
    inputs = jax.random.randint(k_inp, (batch, seq_len), 0, vocab_size, dtype=jnp.int32)

    ref = jax.block_until_ready(birnn_forward_ref(params, inputs))

    # f32 MXU path, two time-chunks (exercises the pipelined grid + carried state)
    out_f32 = jax.block_until_ready(
        birnn_forward(params, inputs, dot_dtype=jnp.float32, time_chunk=4))
    assert out_f32.shape == (batch, 2), out_f32.shape
    assert jnp.allclose(out_f32, ref, atol=5e-4, rtol=5e-4), (out_f32, ref)

    # bf16 input-projection path (v6e/v7x fast path), whole-sequence chunk
    out_bf16 = jax.block_until_ready(
        birnn_forward(params, inputs, dot_dtype=jnp.bfloat16))
    assert out_bf16.shape == (batch, 2), out_bf16.shape
    assert jnp.allclose(out_bf16, ref, atol=5e-2, rtol=5e-2), (out_bf16, ref)

    print("KERNEL_OK")
</pallas_src>

<mosaic_0001>
module attributes {stable_mosaic.version = 11 : i64} {
  func.func @_bilstm_layer_kernel(%arg0: i32, %arg1: memref<32x32xf32, #tpu.memory_space<vmem>>, %arg2: memref<32x32xf32, #tpu.memory_space<vmem>>, %arg3: memref<32x1024xf32, #tpu.memory_space<vmem>>, %arg4: memref<32x1024xf32, #tpu.memory_space<vmem>>, %arg5: memref<256x1024xf32, #tpu.memory_space<vmem>>, %arg6: memref<1x1024xf32, #tpu.memory_space<vmem>>, %arg7: memref<32x128xf32, #tpu.memory_space<vmem>>, %arg8: memref<32x128xf32, #tpu.memory_space<vmem>>, %arg9: memref<8x256xf32, #tpu.memory_space<vmem>>, %arg10: memref<8x256xf32, #tpu.memory_space<vmem>>) attributes {dimension_semantics = [#tpu.dimension_semantics<arbitrary>], iteration_bounds = array<i64: 2>, scalar_prefetch = 0 : i64, scratch_operands = 2 : i64, tpu.core_type = #tpu.core_type<tc>, window_params = [{transform_indices = @transform_0, window_bounds = array<i64: 32, 32>}, {transform_indices = @transform_1, window_bounds = array<i64: 32, 32>}, {pipeline_mode = #tpu.pipeline_mode<synchronous>, transform_indices = @transform_2, window_bounds = array<i64: 32, 1024>}, {pipeline_mode = #tpu.pipeline_mode<synchronous>, transform_indices = @transform_3, window_bounds = array<i64: 32, 1024>}, {pipeline_mode = #tpu.pipeline_mode<synchronous>, transform_indices = @transform_4, window_bounds = array<i64: 256, 1024>}, {pipeline_mode = #tpu.pipeline_mode<synchronous>, transform_indices = @transform_5, window_bounds = array<i64: 1, 1024>}, {transform_indices = @transform_6, window_bounds = array<i64: 32, 128>}, {transform_indices = @transform_7, window_bounds = array<i64: 32, 128>}]} {
    %c0_i32 = arith.constant 0 : i32
    %0 = arith.cmpi eq, %arg0, %c0_i32 : i32
    %1 = arith.extui %0 : i1 to i32
    %c0_i32_0 = arith.constant 0 : i32
    %2 = arith.cmpi ne, %1, %c0_i32_0 : i32
    scf.if %2 {
      %cst_42 = arith.constant 0.000000e+00 : f32
      %117 = vector.broadcast %cst_42 : f32 to vector<8x256xf32>
      %c0_43 = arith.constant 0 : index
      %c0_44 = arith.constant 0 : index
      %118 = vector.load %arg9[%c0_43, %c0_44] : memref<8x256xf32, #tpu.memory_space<vmem>>, vector<8x256xf32>
      tpu.vector_store %arg9[%c0_43, %c0_44], %117 {strides = array<i32>} : memref<8x256xf32, #tpu.memory_space<vmem>>, vector<8x256xf32>,
      %cst_45 = arith.constant 0.000000e+00 : f32
      %119 = vector.broadcast %cst_45 : f32 to vector<8x256xf32>
      %c0_46 = arith.constant 0 : index
      %c0_47 = arith.constant 0 : index
      %120 = vector.load %arg10[%c0_46, %c0_47] : memref<8x256xf32, #tpu.memory_space<vmem>>, vector<8x256xf32>
      tpu.vector_store %arg10[%c0_46, %c0_47], %119 {strides = array<i32>} : memref<8x256xf32, #tpu.memory_space<vmem>>, vector<8x256xf32>,
    } else {
    }
    %c0 = arith.constant 0 : index
    %c0_1 = arith.constant 0 : index
    %3 = vector.load %arg1[%c0, %c0_1] : memref<32x32xf32, #tpu.memory_space<vmem>>, vector<32x32xf32>
    %c0_2 = arith.constant 0 : index
    %c0_3 = arith.constant 0 : index
    %4 = vector.load %arg3[%c0_2, %c0_3] : memref<32x1024xf32, #tpu.memory_space<vmem>>, vector<32x1024xf32>
    %cst = arith.constant dense<0.000000e+00> : vector<32x1024xf32>
    %5 = tpu.matmul %3, %4, %cst {dimension_numbers = #tpu.dot_dimension_numbers<[1], [0], [0], [1], [0, 0, 1, 1], [], []>} : vector<32x32xf32>, vector<32x1024xf32>, vector<32x1024xf32> -> vector<32x1024xf32>
    %c0_4 = arith.constant 0 : index
    %c0_5 = arith.constant 0 : index
    %6 = vector.load %arg6[%c0_4, %c0_5] : memref<1x1024xf32, #tpu.memory_space<vmem>>, vector<1x1024xf32>
    %7 = vector.broadcast %6 : vector<1x1024xf32> to vector<32x1024xf32>
    %8 = arith.addf %5, %7 : vector<32x1024xf32>
    %c0_6 = arith.constant 0 : index
    %c0_7 = arith.constant 0 : index
    %9 = vector.load %arg2[%c0_6, %c0_7] : memref<32x32xf32, #tpu.memory_space<vmem>>, vector<32x32xf32>
    %c0_8 = arith.constant 0 : index
    %c0_9 = arith.constant 0 : index
    %10 = vector.load %arg4[%c0_8, %c0_9] : memref<32x1024xf32, #tpu.memory_space<vmem>>, vector<32x1024xf32>
    %cst_10 = arith.constant dense<0.000000e+00> : vector<32x1024xf32>
    %11 = tpu.matmul %9, %10, %cst_10 {dimension_numbers = #tpu.dot_dimension_numbers<[1], [0], [0], [1], [0, 0, 1, 1], [], []>} : vector<32x32xf32>, vector<32x1024xf32>, vector<32x1024xf32> -> vector<32x1024xf32>
    %c0_11 = arith.constant 0 : index
    %c0_12 = arith.constant 0 : index
    %12 = vector.load %arg5[%c0_11, %c0_12] : memref<256x1024xf32, #tpu.memory_space<vmem>>, vector<256x1024xf32>
    %c0_13 = arith.constant 0 : index
    %c0_14 = arith.constant 0 : index
    %13 = vector.load %arg9[%c0_13, %c0_14] : memref<8x256xf32, #tpu.memory_space<vmem>>, vector<8x256xf32>
    %c0_15 = arith.constant 0 : index
    %c0_16 = arith.constant 0 : index
    %14 = vector.load %arg10[%c0_15, %c0_16] : memref<8x256xf32, #tpu.memory_space<vmem>>, vector<8x256xf32>
    %cst_17 = arith.constant dense<0.000000e+00> : vector<8x1024xf32>
    %15 = tpu.matmul %13, %12, %cst_17 {dimension_numbers = #tpu.dot_dimension_numbers<[1], [0], [0], [1], [0, 0, 1, 1], [], []>} : vector<8x256xf32>, vector<256x1024xf32>, vector<8x1024xf32> -> vector<8x1024xf32>
    %16 = vector.extract_strided_slice %8 {offsets = [0, 0], sizes = [8, 1024], strides = [1, 1]} : vector<32x1024xf32> to vector<8x1024xf32>
    %17 = arith.addf %15, %16 : vector<8x1024xf32>
    %18 = vector.extract_strided_slice %11 {offsets = [24, 0], sizes = [8, 1024], strides = [1, 1]} : vector<32x1024xf32> to vector<8x1024xf32>
    %19 = arith.addf %17, %18 : vector<8x1024xf32>
    %20 = vector.extract_strided_slice %19 {offsets = [0, 0], sizes = [8, 768], strides = [1, 1]} : vector<8x1024xf32> to vector<8x768xf32>
    %21 = arith.negf %20 : vector<8x768xf32>
    %22 = math.exp %21 : vector<8x768xf32>
    %cst_18 = arith.constant 1.000000e+00 : f32
    %23 = vector.broadcast %cst_18 : f32 to vector<8x768xf32>
    %24 = arith.addf %23, %22 : vector<8x768xf32>
    %25 = arith.divf %23, %24 : vector<8x768xf32>
    %26 = vector.extract_strided_slice %19 {offsets = [0, 768], sizes = [8, 256], strides = [1, 1]} : vector<8x1024xf32> to vector<8x256xf32>
    %27 = math.tanh %26 : vector<8x256xf32>
    %28 = vector.extract_strided_slice %25 {offsets = [0, 0], sizes = [8, 256], strides = [1, 1]} : vector<8x768xf32> to vector<8x256xf32>
    %29 = vector.extract_strided_slice %25 {offsets = [0, 256], sizes = [8, 256], strides = [1, 1]} : vector<8x768xf32> to vector<8x256xf32>
    %30 = vector.extract_strided_slice %25 {offsets = [0, 512], sizes = [8, 256], strides = [1, 1]} : vector<8x768xf32> to vector<8x256xf32>
    %31 = arith.mulf %29, %14 : vector<8x256xf32>
    %32 = arith.mulf %28, %27 : vector<8x256xf32>
    %33 = arith.addf %31, %32 : vector<8x256xf32>
    %34 = math.tanh %33 : vector<8x256xf32>
    %35 = arith.mulf %30, %34 : vector<8x256xf32>
    %36 = vector.extract_strided_slice %35 {offsets = [0, 0], sizes = [8, 128], strides = [1, 1]} : vector<8x256xf32> to vector<8x128xf32>
    %c0_19 = arith.constant 0 : index
    %c0_20 = arith.constant 0 : index
    %37 = vector.load %arg7[%c0_19, %c0_20] : memref<32x128xf32, #tpu.memory_space<vmem>>, vector<8x128xf32>
    tpu.vector_store %arg7[%c0_19, %c0_20], %36 {strides = array<i32>} : memref<32x128xf32, #tpu.memory_space<vmem>>, vector<8x128xf32>,
    %38 = vector.extract_strided_slice %35 {offsets = [0, 128], sizes = [8, 128], strides = [1, 1]} : vector<8x256xf32> to vector<8x128xf32>
    %c24 = arith.constant 24 : index
    %c0_21 = arith.constant 0 : index
    %39 = vector.load %arg8[%c24, %c0_21] : memref<32x128xf32, #tpu.memory_space<vmem>>, vector<8x128xf32>
    tpu.vector_store %arg8[%c24, %c0_21], %38 {strides = array<i32>} : memref<32x128xf32, #tpu.memory_space<vmem>>, vector<8x128xf32>,
    %cst_22 = arith.constant dense<0.000000e+00> : vector<8x1024xf32>
    %40 = tpu.matmul %35, %12, %cst_22 {dimension_numbers = #tpu.dot_dimension_numbers<[1], [0], [0], [1], [0, 0, 1, 1], [], []>} : vector<8x256xf32>, vector<256x1024xf32>, vector<8x1024xf32> -> vector<8x1024xf32>
    %41 = vector.extract_strided_slice %8 {offsets = [8, 0], sizes = [8, 1024], strides = [1, 1]} : vector<32x1024xf32> to vector<8x1024xf32>
    %42 = arith.addf %40, %41 : vector<8x1024xf32>
    %43 = vector.extract_strided_slice %11 {offsets = [16, 0], sizes = [8, 1024], strides = [1, 1]} : vector<32x1024xf32> to vector<8x1024xf32>
    %44 = arith.addf %42, %43 : vector<8x1024xf32>
    %45 = vector.extract_strided_slice %44 {offsets = [0, 0], sizes = [8, 768], strides = [1, 1]} : vector<8x1024xf32> to vector<8x768xf32>
    %46 = arith.negf %45 : vector<8x768xf32>
    %47 = math.exp %46 : vector<8x768xf32>
    %cst_23 = arith.constant 1.000000e+00 : f32
    %48 = vector.broadcast %cst_23 : f32 to vector<8x768xf32>
    %49 = arith.addf %48, %47 : vector<8x768xf32>
    %50 = arith.divf %48, %49 : vector<8x768xf32>
    %51 = vector.extract_strided_slice %44 {offsets = [0, 768], sizes = [8, 256], strides = [1, 1]} : vector<8x1024xf32> to vector<8x256xf32>
    %52 = math.tanh %51 : vector<8x256xf32>
    %53 = vector.extract_strided_slice %50 {offsets = [0, 0], sizes = [8, 256], strides = [1, 1]} : vector<8x768xf32> to vector<8x256xf32>
    %54 = vector.extract_strided_slice %50 {offsets = [0, 256], sizes = [8, 256], strides = [1, 1]} : vector<8x768xf32> to vector<8x256xf32>
    %55 = vector.extract_strided_slice %50 {offsets = [0, 512], sizes = [8, 256], strides = [1, 1]} : vector<8x768xf32> to vector<8x256xf32>
    %56 = arith.mulf %54, %33 : vector<8x256xf32>
    %57 = arith.mulf %53, %52 : vector<8x256xf32>
    %58 = arith.addf %56, %57 : vector<8x256xf32>
    %59 = math.tanh %58 : vector<8x256xf32>
    %60 = arith.mulf %55, %59 : vector<8x256xf32>
    %61 = vector.extract_strided_slice %60 {offsets = [0, 0], sizes = [8, 128], strides = [1, 1]} : vector<8x256xf32> to vector<8x128xf32>
    %c8 = arith.constant 8 : index
    %c0_24 = arith.constant 0 : index
    %62 = vector.load %arg7[%c8, %c0_24] : memref<32x128xf32, #tpu.memory_space<vmem>>, vector<8x128xf32>
    tpu.vector_store %arg7[%c8, %c0_24], %61 {strides = array<i32>} : memref<32x128xf32, #tpu.memory_space<vmem>>, vector<8x128xf32>,
    %63 = vector.extract_strided_slice %60 {offsets = [0, 128], sizes = [8, 128], strides = [1, 1]} : vector<8x256xf32> to vector<8x128xf32>
    %c16 = arith.constant 16 : index
    %c0_25 = arith.constant 0 : index
    %64 = vector.load %arg8[%c16, %c0_25] : memref<32x128xf32, #tpu.memory_space<vmem>>, vector<8x128xf32>
    tpu.vector_store %arg8[%c16, %c0_25], %63 {strides = array<i32>} : memref<32x128xf32, #tpu.memory_space<vmem>>, vector<8x128xf32>,
    %cst_26 = arith.constant dense<0.000000e+00> : vector<8x1024xf32>
    %65 = tpu.matmul %60, %12, %cst_26 {dimension_numbers = #tpu.dot_dimension_numbers<[1], [0], [0], [1], [0, 0, 1, 1], [], []>} : vector<8x256xf32>, vector<256x1024xf32>, vector<8x1024xf32> -> vector<8x1024xf32>
    %66 = vector.extract_strided_slice %8 {offsets = [16, 0], sizes = [8, 1024], strides = [1, 1]} : vector<32x1024xf32> to vector<8x1024xf32>
    %67 = arith.addf %65, %66 : vector<8x1024xf32>
    %68 = vector.extract_strided_slice %11 {offsets = [8, 0], sizes = [8, 1024], strides = [1, 1]} : vector<32x1024xf32> to vector<8x1024xf32>
    %69 = arith.addf %67, %68 : vector<8x1024xf32>
    %70 = vector.extract_strided_slice %69 {offsets = [0, 0], sizes = [8, 768], strides = [1, 1]} : vector<8x1024xf32> to vector<8x768xf32>
    %71 = arith.negf %70 : vector<8x768xf32>
    %72 = math.exp %71 : vector<8x768xf32>
    %cst_27 = arith.constant 1.000000e+00 : f32
    %73 = vector.broadcast %cst_27 : f32 to vector<8x768xf32>
    %74 = arith.addf %73, %72 : vector<8x768xf32>
    %75 = arith.divf %73, %74 : vector<8x768xf32>
    %76 = vector.extract_strided_slice %69 {offsets = [0, 768], sizes = [8, 256], strides = [1, 1]} : vector<8x1024xf32> to vector<8x256xf32>
    %77 = math.tanh %76 : vector<8x256xf32>
    %78 = vector.extract_strided_slice %75 {offsets = [0, 0], sizes = [8, 256], strides = [1, 1]} : vector<8x768xf32> to vector<8x256xf32>
    %79 = vector.extract_strided_slice %75 {offsets = [0, 256], sizes = [8, 256], strides = [1, 1]} : vector<8x768xf32> to vector<8x256xf32>
    %80 = vector.extract_strided_slice %75 {offsets = [0, 512], sizes = [8, 256], strides = [1, 1]} : vector<8x768xf32> to vector<8x256xf32>
    %81 = arith.mulf %79, %58 : vector<8x256xf32>
    %82 = arith.mulf %78, %77 : vector<8x256xf32>
    %83 = arith.addf %81, %82 : vector<8x256xf32>
    %84 = math.tanh %83 : vector<8x256xf32>
    %85 = arith.mulf %80, %84 : vector<8x256xf32>
    %86 = vector.extract_strided_slice %85 {offsets = [0, 0], sizes = [8, 128], strides = [1, 1]} : vector<8x256xf32> to vector<8x128xf32>
    %c16_28 = arith.constant 16 : index
    %c0_29 = arith.constant 0 : index
    %87 = vector.load %arg7[%c16_28, %c0_29] : memref<32x128xf32, #tpu.memory_space<vmem>>, vector<8x128xf32>
    tpu.vector_store %arg7[%c16_28, %c0_29], %86 {strides = array<i32>} : memref<32x128xf32, #tpu.memory_space<vmem>>, vector<8x128xf32>,
    %88 = vector.extract_strided_slice %85 {offsets = [0, 128], sizes = [8, 128], strides = [1, 1]} : vector<8x256xf32> to vector<8x128xf32>
    %c8_30 = arith.constant 8 : index
    %c0_31 = arith.constant 0 : index
    %89 = vector.load %arg8[%c8_30, %c0_31] : memref<32x128xf32, #tpu.memory_space<vmem>>, vector<8x128xf32>
    tpu.vector_store %arg8[%c8_30, %c0_31], %88 {strides = array<i32>} : memref<32x128xf32, #tpu.memory_space<vmem>>, vector<8x128xf32>,
    %cst_32 = arith.constant dense<0.000000e+00> : vector<8x1024xf32>
    %90 = tpu.matmul %85, %12, %cst_32 {dimension_numbers = #tpu.dot_dimension_numbers<[1], [0], [0], [1], [0, 0, 1, 1], [], []>} : vector<8x256xf32>, vector<256x1024xf32>, vector<8x1024xf32> -> vector<8x1024xf32>
    %91 = vector.extract_strided_slice %8 {offsets = [24, 0], sizes = [8, 1024], strides = [1, 1]} : vector<32x1024xf32> to vector<8x1024xf32>
    %92 = arith.addf %90, %91 : vector<8x1024xf32>
    %93 = vector.extract_strided_slice %11 {offsets = [0, 0], sizes = [8, 1024], strides = [1, 1]} : vector<32x1024xf32> to vector<8x1024xf32>
    %94 = arith.addf %92, %93 : vector<8x1024xf32>
    %95 = vector.extract_strided_slice %94 {offsets = [0, 0], sizes = [8, 768], strides = [1, 1]} : vector<8x1024xf32> to vector<8x768xf32>
    %96 = arith.negf %95 : vector<8x768xf32>
    %97 = math.exp %96 : vector<8x768xf32>
    %cst_33 = arith.constant 1.000000e+00 : f32
    %98 = vector.broadcast %cst_33 : f32 to vector<8x768xf32>
    %99 = arith.addf %98, %97 : vector<8x768xf32>
    %100 = arith.divf %98, %99 : vector<8x768xf32>
    %101 = vector.extract_strided_slice %94 {offsets = [0, 768], sizes = [8, 256], strides = [1, 1]} : vector<8x1024xf32> to vector<8x256xf32>
    %102 = math.tanh %101 : vector<8x256xf32>
    %103 = vector.extract_strided_slice %100 {offsets = [0, 0], sizes = [8, 256], strides = [1, 1]} : vector<8x768xf32> to vector<8x256xf32>
    %104 = vector.extract_strided_slice %100 {offsets = [0, 256], sizes = [8, 256], strides = [1, 1]} : vector<8x768xf32> to vector<8x256xf32>
    %105 = vector.extract_strided_slice %100 {offsets = [0, 512], sizes = [8, 256], strides = [1, 1]} : vector<8x768xf32> to vector<8x256xf32>
    %106 = arith.mulf %104, %83 : vector<8x256xf32>
    %107 = arith.mulf %103, %102 : vector<8x256xf32>
    %108 = arith.addf %106, %107 : vector<8x256xf32>
    %109 = math.tanh %108 : vector<8x256xf32>
    %110 = arith.mulf %105, %109 : vector<8x256xf32>
    %111 = vector.extract_strided_slice %110 {offsets = [0, 0], sizes = [8, 128], strides = [1, 1]} : vector<8x256xf32> to vector<8x128xf32>
    %c24_34 = arith.constant 24 : index
    %c0_35 = arith.constant 0 : index
    %112 = vector.load %arg7[%c24_34, %c0_35] : memref<32x128xf32, #tpu.memory_space<vmem>>, vector<8x128xf32>
    tpu.vector_store %arg7[%c24_34, %c0_35], %111 {strides = array<i32>} : memref<32x128xf32, #tpu.memory_space<vmem>>, vector<8x128xf32>,
    %113 = vector.extract_strided_slice %110 {offsets = [0, 128], sizes = [8, 128], strides = [1, 1]} : vector<8x256xf32> to vector<8x128xf32>
    %c0_36 = arith.constant 0 : index
    %c0_37 = arith.constant 0 : index
    %114 = vector.load %arg8[%c0_36, %c0_37] : memref<32x128xf32, #tpu.memory_space<vmem>>, vector<8x128xf32>
    tpu.vector_store %arg8[%c0_36, %c0_37], %113 {strides = array<i32>} : memref<32x128xf32, #tpu.memory_space<vmem>>, vector<8x128xf32>,
    %c0_38 = arith.constant 0 : index
    %c0_39 = arith.constant 0 : index
    %115 = vector.load %arg9[%c0_38, %c0_39] : memref<8x256xf32, #tpu.memory_space<vmem>>, vector<8x256xf32>
    tpu.vector_store %arg9[%c0_38, %c0_39], %110 {strides = array<i32>} : memref<8x256xf32, #tpu.memory_space<vmem>>, vector<8x256xf32>,
    %c0_40 = arith.constant 0 : index
    %c0_41 = arith.constant 0 : index
    %116 = vector.load %arg10[%c0_40, %c0_41] : memref<8x256xf32, #tpu.memory_space<vmem>>, vector<8x256xf32>
    tpu.vector_store %arg10[%c0_40, %c0_41], %108 {strides = array<i32>} : memref<8x256xf32, #tpu.memory_space<vmem>>, vector<8x256xf32>,
    return
  }
  func.func @transform_0(%arg0: i32) -> (i32, i32) {
    %c0_i32 = arith.constant 0 : i32
    %c0_i32_0 = arith.constant 0 : i32
    return %arg0, %c0_i32 : i32, i32
  }
  func.func @transform_1(%arg0: i32) -> (i32, i32) {
    %c1_i32 = arith.constant 1 : i32
    %0 = arith.subi %c1_i32, %arg0 : i32
    %c0_i32 = arith.constant 0 : i32
    %c0_i32_0 = arith.constant 0 : i32
    return %0, %c0_i32 : i32, i32
  }
  func.func @transform_2(%arg0: i32) -> (i32, i32) {
    %c0_i32 = arith.constant 0 : i32
    %c0_i32_0 = arith.constant 0 : i32
    %c0_i32_1 = arith.constant 0 : i32
    return %c0_i32, %c0_i32_0 : i32, i32
  }
  func.func @transform_3(%arg0: i32) -> (i32, i32) {
    %c0_i32 = arith.constant 0 : i32
    %c0_i32_0 = arith.constant 0 : i32
    %c0_i32_1 = arith.constant 0 : i32
    return %c0_i32, %c0_i32_0 : i32, i32
  }
  func.func @transform_4(%arg0: i32) -> (i32, i32) {
    %c0_i32 = arith.constant 0 : i32
    %c0_i32_0 = arith.constant 0 : i32
    %c0_i32_1 = arith.constant 0 : i32
    return %c0_i32, %c0_i32_0 : i32, i32
  }
  func.func @transform_5(%arg0: i32) -> (i32, i32) {
    %c0_i32 = arith.constant 0 : i32
    %c0_i32_0 = arith.constant 0 : i32
    %c0_i32_1 = arith.constant 0 : i32
    return %c0_i32, %c0_i32_0 : i32, i32
  }
  func.func @transform_6(%arg0: i32) -> (i32, i32) {
    %c0_i32 = arith.constant 0 : i32
    %c0_i32_0 = arith.constant 0 : i32
    return %arg0, %c0_i32 : i32, i32
  }
  func.func @transform_7(%arg0: i32) -> (i32, i32) {
    %c1_i32 = arith.constant 1 : i32
    %0 = arith.subi %c1_i32, %arg0 : i32
    %c0_i32 = arith.constant 0 : i32
    %c0_i32_0 = arith.constant 0 : i32
    return %0, %c0_i32 : i32, i32
  }
}

</mosaic_0001>

<bundles_post_ra>
// kernel: tpu_custom_call.1
= control target key start
LH: loop header
LB: loop body
LE: loop exit
PB: predicated region body
PF: predicated region fallthrough
CT: control target
= control target key end

     0   :  { %13 = vsyncpa [#allocation5], 0  ;;  %s6115_s0 = inlined_call_operand.vmem [shape: f32[64,32], index: 0, kind: input, shape index: {}]   ;;  %s6116_s1 = inlined_call_operand.vmem [shape: f32[64,32], index: 1, kind: input, shape index: {}]   ;;  %s6117_s2 = inlined_call_operand.hbm [shape: f32[32,1024], index: 2, kind: input, shape index: {}]   ;;  %s6118_s3 = inlined_call_operand.hbm [shape: f32[32,1024], index: 3, kind: input, shape index: {}]   ;;  %s6119_s4 = inlined_call_operand.hbm [shape: f32[256,1024], index: 4, kind: input, shape index: {}]   ;;  %s6120_s5 = inlined_call_operand.vmem [shape: f32[1,1024], index: 5, kind: input, shape index: {}]   ;;  %s6121_s6 = inlined_call_operand.hbm [shape: f32[64,128], index: 6, kind: output, shape index: {0}]   ;;  %s6122_s7 = inlined_call_operand.hbm [shape: f32[64,128], index: 7, kind: output, shape index: {1}]  }
   0x1   :  { %14 = vsyncpa [#allocation8], 0 }
   0x2   :  { %15 = vsyncpa [#allocation6], 0 }
   0x3   :  { %17 = vsyncpa [#allocation6 + $0x1], 0 }
   0x4   :  { %18 = vsyncpa [#allocation12], 0 }
   0x5   :  { %20 = vsyncpa [#allocation12 + $0x1], 0  ;;  %s4795_s24 = smov 0   ;;  %s4797_s25 = smov 0  }
   0x6   :  { %s4799_s26 = smov 0   ;;  %s4801_s27 = smov 0  }
   0x7   :  { %s4803_s28 = smov 0   ;;  %s4805_s29 = smov 0  }
   0x8   :  { %s4807_s30 = smov 0  }
   0x9 LB: > { %6343 = sst [smem:[#allocation17_spill]] %s4718_s24  ;;  %s4831_s8 = sadd.s32 4294967295, %s4742_s30   ;;  %s4742_s30 = sphi %s4807_s30, %s6725_s30   ;;  %s4738_s29 = sphi %s4805_s29, %s6729_s29   ;;  %s4734_s28 = sphi %s4803_s28, %s6733_s28   ;;  %s4730_s27 = sphi %s4801_s27, %s6732_s27   ;;  %s4726_s26 = sphi %s4799_s26, %s6727_s26   ;;  %s4722_s25 = sphi %s4797_s25, %s6731_s25   ;;  %s4718_s24 = sphi %s4795_s24, %s6730_s24  }
   0xa   : > { %6344 = sst [smem:[#allocation18_spill]] %s4726_s26  ;;  %s3032_s9 = sadd.s32 4294967294, %s4742_s30  }
   0xb   : > { %6345 = sst [smem:[#allocation19_spill]] %s4730_s27  ;;  %s4835_s10 = sadd.s32 1, %s4742_s30  }
   0xc   : > { %6346 = sst [smem:[#allocation20_spill]] %s4738_s29  ;;  %s171_s11 = sadd.s32 1, %s4738_s29 }
   0xd   : > { %6347 = sst [smem:[#allocation21_spill]] %s4835_s10  ;;  %s168_s12 = ssub.s32 %s4742_s30, %s4835_s10 }
   0xe   : > { %p181_p0 = scmp.ne.s32.totalorder %s4738_s29, %s4734_s28  ;;  %p169_p1 = scmp.eq.s32.totalorder %s168_s12, 0 }
   0xf   : > { %p182_p2 = scmp.eq.s32.totalorder %s4831_s8, 1  ;;  %p187_p3 = scmp.ne.s32.totalorder %s4734_s28, %s4730_s27 }
  0x10   : > { %p4845_p4 = scmp.eq.s32.totalorder %s3032_s9, 1  ;;  %s194_s17 = ssub.s32 1, %s4742_s30 }
  0x11   : > { %s4850_s14 = scalar_select %p169_p1, %s4738_s29, %s171_s11  }
  0x12   : > { %p4854_p5 = por %p182_p2, %p181_p0  ;;  %p4860_p6 = por %p4845_p4, %p187_p3 }
  0x13   : > { %6349 = sst [smem:[#allocation22_spill]] %s4850_s14  ;;  %s195_s18 = ssub.s32 1, %s4835_s10 }
  0x14   : > { %s6350_s15 = scalar_select %p4854_p5, 1, 0 }
  0x15   : > { %s6351_s16 = scalar_select %p4860_p6, 1, 0 }
  0x16   : > { %s196_s19 = ssub.s32 %s194_s17, %s195_s18  ;;  %s199_s20 = sadd.s32 1, %s4726_s26 }
  0x17   : > { %6352 = sst [smem:[#allocation23_spill]] %s6351_s16  ;;  %p197_p7 = scmp.eq.s32.totalorder %s196_s19, 0 }
  0x18   : > { %p209_p8 = scmp.ne.s32.totalorder %s4726_s26, %s4722_s25  ;;  %p215_p9 = scmp.ne.s32.totalorder %s4722_s25, %s4718_s24 }
  0x19   : > { %p3033_p10 = scmp.ge.s32.totalorder %s4742_s30, 1  ;;  %p223_p13 = scmp.lt.s32.totalorder %s4742_s30, 3 }
  0x1a   : > { %s4873_s21 = scalar_select %p197_p7, %s4726_s26, %s199_s20  }
  0x1b   : > { %p4877_p11 = por %p209_p8, %p182_p2  ;;  %p4883_p12 = por %p215_p9, %p4845_p4 }
  0x1c   : > { %6353 = sst [smem:[#allocation24_spill]] %s4873_s21  ;;  %p6127_p1 = scmp.eq.s32.totalorder %s4831_s8, 0 }
  0x1d   : > { %s6354_s22 = scalar_select %p4877_p11, 1, 0 }
  0x1e   : > { %s6355_s23 = scalar_select %p4883_p12, 1, 0 }
  0x1f   : > { %p4890_p3 = pnand %p3033_p10, %p223_p13  ;;  %s4744_s11 = smov [#allocation7]  }
  0x20   : > { %6356 = sst [smem:[#allocation25_spill]] %s6355_s23  ;;  %s248_s12 = sshll.u32 %s4744_s11, 4  ;;  %s249_s12 = int_to_ptr.vmem [resolvable:$true] %s248_s12 }
  0x21   : > { %s6357_s9 = scalar_select %p4890_p3, 1, 0 }
  0x22   : > { %p4315_p7 = pneg %p4890_p3  ;;  %s4745_s17 = smov [#allocation4]  }
  0x23   : > { %s235_s18 = sshll.u32 %s4745_s17, 4  ;;  %s4746_s19 = smov [#allocation9]   ;;  %s4902_s18 = int_to_ptr.vmem [resolvable:$true] %s235_s18 }
  0x24   : > { %p4898_p2 = pnand %p6127_p1, %p4315_p7  ;;  %s4904_s20 = sshll.u32 %s4746_s19, 4  ;;  %s262_s20 = int_to_ptr.vmem [resolvable:$true] %s4904_s20 }
  0x25   : > { %s4532_s21 = scalar_lea.hbm %s6118_s3, 4096 }
  0x26   : > { %p4533_p4 = scmp.ne.s32.totalorder %s6118_s3, %s4532_s21  ;;  %p4914_p8 = pneg %p4898_p2 }
  0x27   : > { %p4539_p13 = scmp.lt.u32.totalorder %s4532_s21, %s6118_s3 }
  0x28   : > { %p4535_p9 = pnand %p4914_p8, %p4533_p4 }
  0x2a   : > { %p4536_p10 = pneg %p4535_p9 }
  0x2c   : > { %p4541_p7 = pnand %p4539_p13, %p4536_p10 }
  0x2e   : > { %4544 = shalt.err (!%p4541_p7)
}
  0x2f   : > { %s4545_s29 = scalar_lea.vmem %s249_s12, 4096  ;;  %p4553_p6 = scmp.lt.s32.totalorder %s249_s12, %s249_s12 }
  0x30   : > { %p4546_p0 = scmp.ne.s32.totalorder %s249_s12, %s4545_s29  ;;  %p4554_p11 = scmp.lt.s32.totalorder %s4545_s29, %s4545_s29 }
  0x32   : > { %p4548_p1 = pnand %p4546_p0, %p4914_p8  ;;  %p4555_p5 = por %p4554_p11, %p4553_p6 }
  0x34   : > { %p4549_p12 = pneg %p4548_p1 }
  0x36   : > { %p4556_p3 = pnand %p4555_p5, %p4549_p12 }
  0x38   : > { %4559 = shalt.err (!%p4556_p3)
}
  0x39   : > { %s4747_s26 = smov 1024   ;;  %s4748_s14 = smov 64  }
  0x3a   : > { %4321 = dma.hbm_to_vmem [thread:$0]  (!%p4898_p2), %s6118_s3, 4096, %s249_s12, [#allocation8], %s4747_s26, %s4747_s26, %s4748_s14  }
  0x3b   : > { %s4560_s23 = scalar_lea.hbm %s6117_s2, 4096 }
  0x3c   : > { %p4561_p5 = scmp.ne.s32.totalorder %s6117_s2, %s4560_s23  ;;  %p4567_p12 = scmp.lt.u32.totalorder %s4560_s23, %s6117_s2 }
  0x3e   : > { %p4563_p6 = pnand %p4561_p5, %p4914_p8 }
  0x40   : > { %p4564_p11 = pneg %p4563_p6 }
  0x42   : > { %p4569_p0 = pnand %p4567_p12, %p4564_p11 }
  0x44   : > { %4572 = shalt.err (!%p4569_p0)
}
  0x45   : > { %s4573_s12 = scalar_lea.vmem %s4902_s18, 4096  ;;  %p4581_p9 = scmp.lt.s32.totalorder %s4902_s18, %s4902_s18 }
  0x46   : > { %p4574_p1 = scmp.ne.s32.totalorder %s4902_s18, %s4573_s12  ;;  %p4582_p10 = scmp.lt.s32.totalorder %s4573_s12, %s4573_s12 }
  0x48   : > { %p4576_p3 = pnand %p4574_p1, %p4914_p8  ;;  %p4583_p13 = por %p4582_p10, %p4581_p9 }
  0x4a   : > { %p4577_p4 = pneg %p4576_p3 }
  0x4c   : > { %p4584_p7 = pnand %p4583_p13, %p4577_p4 }
  0x4e   : > { %4587 = shalt.err (!%p4584_p7)
}
  0x4f   : > { %4318 = dma.hbm_to_vmem [thread:$0]  (!%p4898_p2), %s6117_s2, 4096, %s4902_s18, [#allocation5], %s4747_s26, %s4747_s26, %s4748_s14  }
  0x50   : > { %s4588_s10 = scalar_lea.hbm %s6119_s4, 32768 }
  0x51   : > { %p4589_p5 = scmp.ne.s32.totalorder %s6119_s4, %s4588_s10  ;;  %p4595_p12 = scmp.lt.u32.totalorder %s4588_s10, %s6119_s4 }
  0x53   : > { %p4591_p6 = pnand %p4589_p5, %p4914_p8 }
  0x55   : > { %p4592_p11 = pneg %p4591_p6 }
  0x57   : > { %p4597_p0 = pnand %p4595_p12, %p4592_p11 }
  0x59   : > { %4600 = shalt.err (!%p4597_p0)
}
  0x5a   : > { %s4601_s12 = scalar_lea.vmem %s262_s20, 32768  ;;  %p4609_p9 = scmp.lt.s32.totalorder %s262_s20, %s262_s20 }
  0x5b   : > { %p4602_p1 = scmp.ne.s32.totalorder %s262_s20, %s4601_s12  ;;  %p4610_p10 = scmp.lt.s32.totalorder %s4601_s12, %s4601_s12 }
  0x5d   : > { %p4604_p3 = pnand %p4602_p1, %p4914_p8  ;;  %p4611_p13 = por %p4610_p10, %p4609_p9 }
  0x5f   : > { %p4605_p4 = pneg %p4604_p3 }
  0x61   : > { %p4612_p7 = pnand %p4611_p13, %p4605_p4 }
  0x63   : > { %4615 = shalt.err (!%p4612_p7)
}
  0x64   : > { %4324 = dma.hbm_to_vmem [thread:$0]  (!%p4898_p2), %s6119_s4, 32768, %s262_s20, [#allocation8], %s4747_s26, %s4747_s26, %s4748_s14  }
  0x65   : > { %p6360_p5 = scmp.ne.s32.totalorder %s6357_s9, 0 }
  0x67   : > { %300 = sbr.rel (%p6360_p5) target bundleno = 1541 (0x605), region = 44 }
  0x6e   : > { %p6361_p8 = scmp.eq.s32.totalorder %s4831_s8, 0 }
  0x70   : > { %4701 = dma.done.wait (%p6361_p8), [#allocation5], 4096   ;;  %p6362_p6 = pmov %p6361_p8 }
  0x72   : > { %4703 = vsyncadd (%p6362_p6), [#allocation5], 4294963200  ;;  %p6363_p11 = pmov %p6362_p6 }
  0x73   : > { %p6364_p12 = pmov %p6362_p6 }
  0x74   : > { %4705 = dma.done.wait (%p6363_p11), [#allocation8], 36864  }
  0x75   : > { %4707 = vsyncadd (%p6364_p12), [#allocation8], 4294930432  ;;  %s341_s9 = sand.u32 1, %s4734_s28   ;;  %s348_s13 = sand.u32 1, %s4722_s25  }
  0x76   : > { %s3042_s20 = sshll.u32 %s341_s9, 5  ;;  %s3043_s17 = sshll.u32 %s348_s13, 5 }
  0x77   : > { %s3044_s26 = sshll.u32 %s4831_s8, 2  ;;  %s357_s14 = ssub.s32 1, %s4831_s8 }
  0x78   : > { %p352_p2 = scmp.lt.s32.totalorder %s3044_s26, 7  ;;  %s3046_s27 = sshll.u32 %s357_s14, 2 }
  0x79   : > { %p359_p0 = scmp.lt.s32.totalorder %s3046_s27, 7  ;;  %s5011_s18 = scalar_lea.vmem [#allocation10], %s3042_s20 }
  0x7a   : > { %s6735_s26 = smov (!%p352_p2, %s3044_s26), 7  ;;  %s5013_s24 = scalar_lea.vmem [#allocation11], %s3043_s17 }
  0x7b   : > { %s6737_s27 = smov (!%p359_p0, %s3046_s27), 7  ;;  %s3045_s16 = sshll.u32 %s6735_s26, 3 }
  0x7c   : > { %s5004_s21 = scalar_lea.vmem %s6115_s0, %s3045_s16  ;;  %s3047_s11 = sshll.u32 %s6737_s27, 3 }
  0x7d   : > { %s5009_s12 = scalar_lea.vmem %s6116_s1, %s3047_s11  ;;  %p6365_p1 = scmp.ne.s32.totalorder %s4831_s8, 0 }
  0x7e   : > { %v4749_v0 = vmov (!%p6365_p1), 0.0  }
  0x7f   : > { %371 = sbr.rel (%p6365_p1) target bundleno = 134 (0x86), region = 60  ;;  %372 = vst [vmem:[#allocation2] sm:$0xff] (!%p6365_p1), %v4749_v0  ;;  %373 = vst [vmem:[#allocation2 + $0x8] sm:$0xff] (!%p6365_p1), %v4749_v0 }
  0x80   : > { %374 = vst [vmem:[#allocation3] sm:$0xff] (!%p6365_p1), %v4749_v0  ;;  %375 = vst [vmem:[#allocation3 + $0x8] sm:$0xff] (!%p6365_p1), %v4749_v0 }
  0x86 PF: > { %v381_v1 = vld [vmem:[#allocation4 + $0x8] sm:$0xff]  ;;  %v383_v3 = vld [vmem:[#allocation4 + $0x18] sm:$0xff]  ;;  %v380_v6 = vld [vmem:[#allocation4] sm:$0xff]  ;;  %v4750_v8 = vmov 0.0   ;;  %vm454_vm0 = vcmask 261120   ;;  %s3113_s26 = sshll.u32 %s4831_s8, 9 }
  0x87   : > { %v389_v2 = vld [vmem:[#allocation4 + $0x48] sm:$0xff]  ;;  %v391_v5 = vld [vmem:[#allocation4 + $0x58] sm:$0xff]  ;;  %v388_v7 = vld [vmem:[#allocation4 + $0x40] sm:$0xff]  ;;  %531 = vmatprep.mubr.f32.mxu0 %v4750_v8  ;;  %620 = vmatprep.mubr.f32.mxu1 %v4750_v8  ;;  %s2878_s27 = sshll.u32 %s5011_s18, 4  ;;  %s6012_s10 = scalar_lea.hbm %s6121_s6, %s3113_s26  ;;  %s6014_s27 = int_to_ptr.vmem [resolvable:$true] %s2878_s27 }
  0x88   : > { %v3115_v4 = vpack.c.bf16 %v389_v2, %v381_v1  ;;  %v3123_v9 = vpack.c.bf16 %v391_v5, %v383_v3  ;;  %v3117_v10 = vpack.c.bf16 %v388_v7, %v380_v6  ;;  %v382_v11 = vld [vmem:[#allocation4 + $0x10] sm:$0xff]  ;;  %v397_v13 = vld [vmem:[#allocation4 + $0x88] sm:$0xff]  ;;  %v399_v16 = vld [vmem:[#allocation4 + $0x98] sm:$0xff]  ;;  %s2895_s11 = sshll.u32 %s5013_s24, 4  ;;  %s6029_s20 = scalar_lea.sflag [#allocation6], %s341_s9  ;;  %s6025_s11 = int_to_ptr.vmem [resolvable:$true] %s2895_s11 }
  0x89   : > { %v390_v12 = vld [vmem:[#allocation4 + $0x50] sm:$0xff]  ;;  %v405_v15 = vld [vmem:[#allocation4 + $0xc8] sm:$0xff]  ;;  %v407_v17 = vld [vmem:[#allocation4 + $0xd8] sm:$0xff]  ;;  %s4616_s8 = scalar_lea.vmem %s6014_s27, 512  ;;  %p6717_p4 = scmp.ne.s32.totalorder %s6350_s15, 0 }
  0x8a   : > { %3116 = vmatprep.subr.bf16.mxu0 %v3115_v4  ;;  %v3125_v14 = vpack.c.bf16 %v390_v12, %v382_v11  ;;  %3124 = vmatprep.subr.bf16.mxu1 %v3123_v9  ;;  %v3119_v18 = vpack.c.bf16 %v405_v15, %v397_v13  ;;  %v3127_v19 = vpack.c.bf16 %v407_v17, %v399_v16  ;;  %v396_v20 = vld [vmem:[#allocation4 + $0x80] sm:$0xff]  ;;  %v398_v22 = vld [vmem:[#allocation4 + $0x90] sm:$0xff]  ;;  %v385_v25 = vld [vmem:[#allocation4 + $0x28] sm:$0xff]  ;;  %p4617_p3 = scmp.ne.s32.totalorder %s6014_s27, %s4616_s8 }
  0x8b   : > { %3118 = vmatpush1.bf16.msra.mxu0 %v3117_v10  ;;  %v404_v21 = vld [vmem:[#allocation4 + $0xc0] sm:$0xff]  ;;  %v406_v24 = vld [vmem:[#allocation4 + $0xd0] sm:$0xff]  ;;  %v393_v27 = vld [vmem:[#allocation4 + $0x68] sm:$0xff] }
  0x8c   : > { %3126 = vmatpush1.bf16.msra.mxu1 %v3125_v14  ;;  %v3121_v23 = vpack.c.bf16 %v404_v21, %v396_v20  ;;  %3120 = vmatprep.subr.bf16.mxu0 %v3119_v18  ;;  %v3129_v26 = vpack.c.bf16 %v406_v24, %v398_v22  ;;  %v387_v28 = vld [vmem:[#allocation4 + $0x38] sm:$0xff]  ;;  %v3131_v30 = vpack.c.bf16 %v393_v27, %v385_v25  ;;  %v384_v32 = vld [vmem:[#allocation4 + $0x20] sm:$0xff]  ;;  %v386_v34 = vld [vmem:[#allocation4 + $0x30] sm:$0xff]  ;;  %p4618_p9 = pnand %p4617_p3, %p6717_p4 }
  0x8d   : > { %3128 = vmatprep.subr.bf16.mxu1 %v3127_v19  ;;  %v395_v29 = vld [vmem:[#allocation4 + $0x78] sm:$0xff]  ;;  %v392_v33 = vld [vmem:[#allocation4 + $0x60] sm:$0xff]  ;;  %v394_v37 = vld [vmem:[#allocation4 + $0x70] sm:$0xff] }
  0x8e   : > { %v3139_v31 = vpack.c.bf16 %v395_v29, %v387_v28  ;;  %v5020_v35 = vld [vmem:[%s5004_s21] sm:$0xff]  ;;  %v3133_v36 = vpack.c.bf16 %v392_v33, %v384_v32  ;;  %v3141_v38 = vpack.c.bf16 %v394_v37, %v386_v34  ;;  %v401_v39 = vld [vmem:[#allocation4 + $0xa8] sm:$0xff]  ;;  %v403_v41 = vld [vmem:[#allocation4 + $0xb8] sm:$0xff]  ;;  %p4619_p10 = pneg %p4618_p9 }
  0x8f   : > { %3122 = vmatpush1.bf16.msra.mxu0 %v3121_v23  ;;  %v409_v40 = vld [vmem:[#allocation4 + $0xe8] sm:$0xff]  ;;  %v411_v43 = vld [vmem:[#allocation4 + $0xf8] sm:$0xff]  ;;  %v400_v44 = vld [vmem:[#allocation4 + $0xa0] sm:$0xff] }
  0x90   : > { %3130 = vmatpush1.bf16.msra.mxu1 %v3129_v26  ;;  %3132 = vmatprep.subr.bf16.mxu0 %v3131_v30  ;;  %v3135_v42 = vpack.c.bf16 %v409_v40, %v401_v39  ;;  %v408_v45 = vld [vmem:[#allocation4 + $0xe0] sm:$0xff]  ;;  %v5025_v46 = vld [vmem:[%s5004_s21 + $0x8] sm:$0xff]  ;;  %v3143_v47 = vpack.c.bf16 %v411_v43, %v403_v41  ;;  %v402_v48 = vld [vmem:[#allocation4 + $0xb0] sm:$0xff] }
  0x91   : > { %3140 = vmatprep.subr.bf16.mxu1 %v3139_v31  ;;  %v410_v49 = vld [vmem:[#allocation4 + $0xf0] sm:$0xff]  ;;  %v828_v50 = vld [vmem:[#allocation7 + $0x8] sm:$0xff]  ;;  %v830_v52 = vld [vmem:[#allocation7 + $0x18] sm:$0xff]  ;;  %v3137_v53 = vpack.c.bf16 %v408_v45, %v400_v44 }
  0x92   : > { %3049 = vmatmul.mubr.msk.f32.vlgmr.msra.gmra.mrb[0].mxu0 %vm454_vm0, %v5020_v35  ;;  %v836_v51 = vld [vmem:[#allocation7 + $0x48] sm:$0xff]  ;;  %v838_v54 = vld [vmem:[#allocation7 + $0x58] sm:$0xff]  ;;  %v3145_v55 = vpack.c.bf16 %v410_v49, %v402_v48  ;;  %v378_v58 = vld [vmem:[%s5004_s21 + $0x10] sm:$0xff] }
  0x93   : > { %3053 = vmatmul.mubr.msk.f32.vlgmr.msra.gmra.mrb[0].mxu1 %vm454_vm0, %v5020_v35  ;;  %3134 = vmatpush1.bf16.msra.mxu0 %v3133_v36  ;;  %v3147_v56 = vpack.c.bf16 %v836_v51, %v828_v50  ;;  %v3155_v57 = vpack.c.bf16 %v838_v54, %v830_v52  ;;  %v379_v59 = vld [vmem:[%s5004_s21 + $0x18] sm:$0xff]  ;;  %v827_v60 = vld [vmem:[#allocation7] sm:$0xff]  ;;  %v829_v62 = vld [vmem:[#allocation7 + $0x10] sm:$0xff]  ;;  %s3114_s21 = sshll.u32 %s357_s14, 9  ;;  %s4751_s14 = smov [#allocation10]  }
  0x94   : > { %3142 = vmatpush1.bf16.msra.mxu1 %v3141_v38  ;;  %537 = vmatprep.mubr.f32.mxu0 %v4750_v8  ;;  %v835_v61 = vld [vmem:[#allocation7 + $0x40] sm:$0xff]  ;;  %v837_v63 = vld [vmem:[#allocation7 + $0x50] sm:$0xff]  ;;  %v844_v0 = vld [vmem:[#allocation7 + $0x88] sm:$0xff]  ;;  %s4620_s17 = sshll.u32 %s4751_s14, 4  ;;  %s4621_s17 = int_to_ptr.vmem [resolvable:$false] %s4620_s17 }
  0x95   : > { %626 = vmatprep.mubr.f32.mxu1 %v4750_v8  ;;  %3136 = vmatprep.subr.bf16.mxu0 %v3135_v42  ;;  %v852_v1 = vld [vmem:[#allocation7 + $0xc8] sm:$0xff]  ;;  %v3149_v2 = vpack.c.bf16 %v835_v61, %v827_v60  ;;  %v846_v3 = vld [vmem:[#allocation7 + $0x98] sm:$0xff]  ;;  %v3157_v5 = vpack.c.bf16 %v837_v63, %v829_v62  ;;  %v843_v7 = vld [vmem:[#allocation7 + $0x80] sm:$0xff]  ;;  %p4623_p13 = scmp.lt.s32.totalorder %s6014_s27, %s4621_s17 }
  0x96   : > { %3050 = vmatmul.mubr.msk.f32.gmra.mrb[2].mxu0 %vm454_vm0, %v5025_v46  ;;  %3144 = vmatprep.subr.bf16.mxu1 %v3143_v47  ;;  %v854_v4 = vld [vmem:[#allocation7 + $0xd8] sm:$0xff]  ;;  %v3151_v6 = vpack.c.bf16 %v852_v1, %v844_v0  ;;  %v851_v9 = vld [vmem:[#allocation7 + $0xc0] sm:$0xff]  ;;  %v845_v10 = vld [vmem:[#allocation7 + $0x90] sm:$0xff] }
  0x97   : > { %3054 = vmatmul.mubr.msk.f32.gmra.mrb[2].mxu1 %vm454_vm0, %v5025_v46  ;;  %543 = vmatprep.mubr.f32.mxu0 %v4750_v8  ;;  %v3159_v11 = vpack.c.bf16 %v854_v4, %v846_v3  ;;  %v853_v12 = vld [vmem:[#allocation7 + $0xd0] sm:$0xff]  ;;  %v832_v13 = vld [vmem:[#allocation7 + $0x28] sm:$0xff]  ;;  %v834_v15 = vld [vmem:[#allocation7 + $0x38] sm:$0xff]  ;;  %v3153_v17 = vpack.c.bf16 %v851_v9, %v843_v7 }
  0x98   : > { %632 = vmatprep.mubr.f32.mxu1 %v4750_v8  ;;  %3138 = vmatpush1.bf16.msra.mxu0 %v3137_v53  ;;  %v840_v14 = vld [vmem:[#allocation7 + $0x68] sm:$0xff]  ;;  %v842_v16 = vld [vmem:[#allocation7 + $0x78] sm:$0xff]  ;;  %v3161_v18 = vpack.c.bf16 %v853_v12, %v845_v10  ;;  %v831_v21 = vld [vmem:[#allocation7 + $0x20] sm:$0xff] }
  0x99   : > { %3146 = vmatpush1.bf16.msra.mxu1 %v3145_v55  ;;  %3148 = vmatprep.subr.bf16.mxu0 %v3147_v56  ;;  %v3163_v19 = vpack.c.bf16 %v840_v14, %v832_v13  ;;  %v3171_v20 = vpack.c.bf16 %v842_v16, %v834_v15  ;;  %v839_v22 = vld [vmem:[#allocation7 + $0x60] sm:$0xff]  ;;  %v833_v23 = vld [vmem:[#allocation7 + $0x30] sm:$0xff]  ;;  %v848_v25 = vld [vmem:[#allocation7 + $0xa8] sm:$0xff] }
  0x9a   : > { %3051 = vmatmul.mubr.msk.f32.gmra.mrb[4].mxu0 %vm454_vm0, %v378_v58  ;;  %3156 = vmatprep.subr.bf16.mxu1 %v3155_v57  ;;  %v841_v24 = vld [vmem:[#allocation7 + $0x70] sm:$0xff]  ;;  %v856_v26 = vld [vmem:[#allocation7 + $0xe8] sm:$0xff]  ;;  %v5067_v27 = vld [vmem:[%s5009_s12] sm:$0xff]  ;;  %v3165_v28 = vpack.c.bf16 %v839_v22, %v831_v21 }
  0x9b   : > { %3055 = vmatmul.mubr.msk.f32.gmra.mrb[4].mxu1 %vm454_vm0, %v378_v58  ;;  %549 = vmatprep.mubr.f32.mxu0 %v4750_v8  ;;  %v850_v29 = vld [vmem:[#allocation7 + $0xb8] sm:$0xff]  ;;  %v3173_v31 = vpack.c.bf16 %v841_v24, %v833_v23  ;;  %v3167_v32 = vpack.c.bf16 %v856_v26, %v848_v25  ;;  %v847_v33 = vld [vmem:[#allocation7 + $0xa0] sm:$0xff]  ;;  %v857_v37 = vld [vmem:[#allocation7 + $0xf0] sm:$0xff] }
  0x9c   : > { %638 = vmatprep.mubr.f32.mxu1 %v4750_v8  ;;  %v858_v30 = vld [vmem:[#allocation7 + $0xf8] sm:$0xff]  ;;  %v855_v34 = vld [vmem:[#allocation7 + $0xe0] sm:$0xff]  ;;  %v1228_v38 = vld [vmem:[#allocation9 + $0x8] sm:$0xff] }
  0x9d   : > { %v3175_v36 = vpack.c.bf16 %v858_v30, %v850_v29  ;;  %v1236_v39 = vld [vmem:[#allocation9 + $0x48] sm:$0xff]  ;;  %v1230_v41 = vld [vmem:[#allocation9 + $0x18] sm:$0xff]  ;;  %v3169_v43 = vpack.c.bf16 %v855_v34, %v847_v33  ;;  %v5089_v47 = vld [vmem:[%s5009_s12 + $0x10] sm:$0xff] }
  0x9e   : > { %3052 = vmatmul.mubr.msk.f32.gmra.mrb[6].mxu0 %vm454_vm0, %v379_v59  ;;  %v5075_v40 = vld [vmem:[%s5009_s12 + $0x8] sm:$0xff]  ;;  %v1238_v42 = vld [vmem:[#allocation9 + $0x58] sm:$0xff]  ;;  %v5079_v45 = vpack.c.bf16 %v1236_v39, %v1228_v38  ;;  %v1227_v49 = vld [vmem:[#allocation9] sm:$0xff] }
  0x9f   : > { %3056 = vmatmul.mubr.msk.f32.gmra.mrb[6].mxu1 %vm454_vm0, %v379_v59  ;;  %709 = vmatprep.mubr.f32.mxu0 %v4750_v8  ;;  %v5100_v48 = vld [vmem:[%s5009_s12 + $0x18] sm:$0xff]  ;;  %v1235_v50 = vld [vmem:[#allocation9 + $0x40] sm:$0xff]  ;;  %v1229_v51 = vld [vmem:[#allocation9 + $0x10] sm:$0xff]  ;;  %s6023_s12 = scalar_lea.hbm %s6122_s7, %s3114_s21 }
  0xa0   : > { %798 = vmatprep.mubr.f32.mxu1 %v4750_v8  ;;  %v1237_v52 = vld [vmem:[#allocation9 + $0x50] sm:$0xff]  ;;  %v1244_v53 = vld [vmem:[#allocation9 + $0x88] sm:$0xff]  ;;  %v1246_v55 = vld [vmem:[#allocation9 + $0x98] sm:$0xff]  ;;  %v5108_v57 = vpack.c.bf16 %v1235_v50, %v1227_v49 }
  0xa1   : > { %v1252_v54 = vld [vmem:[#allocation9 + $0xc8] sm:$0xff]  ;;  %v1254_v56 = vld [vmem:[#allocation9 + $0xd8] sm:$0xff]  ;;  %v1243_v60 = vld [vmem:[#allocation9 + $0x80] sm:$0xff] }
  0xa2   : > { %3057 = vmatmul.mubr.msk.f32.vlgmr.msra.gmra.mrb[8].mxu0 %vm454_vm0, %v5020_v35  ;;  %v1251_v61 = vld [vmem:[#allocation9 + $0xc0] sm:$0xff]  ;;  %v1245_v62 = vld [vmem:[#allocation9 + $0x90] sm:$0xff]  ;;  %v5115_v63 = vpack.c.bf16 %v1254_v56, %v1246_v55  ;;  %v1260_v1 = vld [vmem:[#allocation9 + $0x108] sm:$0xff] }
  0xa3   : > { %3061 = vmatmul.mubr.msk.f32.vlgmr.msra.gmra.mrb[8].mxu1 %vm454_vm0, %v5020_v35  ;;  %3150 = vmatpush1.bf16.msra.mxu0 %v3149_v2  ;;  %v849_v35 = vld [vmem:[#allocation7 + $0xb0] sm:$0xff]  ;;  %v1268_v2 = vld [vmem:[#allocation9 + $0x148] sm:$0xff]  ;;  %v1262_v3 = vld [vmem:[#allocation9 + $0x118] sm:$0xff] }
  0xa4   : > { %3158 = vmatpush1.bf16.msra.mxu1 %v3157_v5  ;;  %715 = vmatprep.mubr.f32.mxu0 %v4750_v8  ;;  %v3177_v44 = vpack.c.bf16 %v857_v37, %v849_v35  ;;  %v1253_v0 = vld [vmem:[#allocation9 + $0xd0] sm:$0xff]  ;;  %v1270_v4 = vld [vmem:[#allocation9 + $0x158] sm:$0xff]  ;;  %v5122_v5 = vpack.c.bf16 %v1251_v61, %v1243_v60  ;;  %v5128_v7 = vpack.c.bf16 %v1268_v2, %v1260_v1  ;;  %v1259_v9 = vld [vmem:[#allocation9 + $0x100] sm:$0xff] }
  0xa5   : > { %804 = vmatprep.mubr.f32.mxu1 %v4750_v8  ;;  %3152 = vmatprep.subr.bf16.mxu0 %v3151_v6  ;;  %v5126_v6 = vpack.c.bf16 %v1253_v0, %v1245_v62  ;;  %v1267_v10 = vld [vmem:[#allocation9 + $0x140] sm:$0xff]  ;;  %v5131_v12 = vpack.c.bf16 %v1270_v4, %v1262_v3  ;;  %v1269_v13 = vld [vmem:[#allocation9 + $0x150] sm:$0xff]  ;;  %v1276_v14 = vld [vmem:[#allocation9 + $0x188] sm:$0xff] }
  0xa6   : > { %3058 = vmatmul.mubr.msk.f32.gmra.mrb[10].mxu0 %vm454_vm0, %v5025_v46  ;;  %3160 = vmatprep.subr.bf16.mxu1 %v3159_v11  ;;  %v1261_v11 = vld [vmem:[#allocation9 + $0x110] sm:$0xff]  ;;  %v1284_v15 = vld [vmem:[#allocation9 + $0x1c8] sm:$0xff]  ;;  %v1278_v16 = vld [vmem:[#allocation9 + $0x198] sm:$0xff] }
  0xa7   : > { %3062 = vmatmul.mubr.msk.f32.gmra.mrb[10].mxu1 %vm454_vm0, %v5025_v46  ;;  %721 = vmatprep.mubr.f32.mxu0 %v4750_v8  ;;  %v5083_v46 = vpack.c.bf16 %v1238_v42, %v1230_v41  ;;  %v1275_v21 = vld [vmem:[#allocation9 + $0x180] sm:$0xff]  ;;  %v1277_v23 = vld [vmem:[#allocation9 + $0x190] sm:$0xff]  ;;  %v1292_v26 = vld [vmem:[#allocation9 + $0x208] sm:$0xff] }
  0xa8   : > { %810 = vmatprep.mubr.f32.mxu1 %v4750_v8  ;;  %3154 = vmatpush1.bf16.msra.mxu0 %v3153_v17  ;;  %v1286_v17 = vld [vmem:[#allocation9 + $0x1d8] sm:$0xff]  ;;  %v1283_v22 = vld [vmem:[#allocation9 + $0x1c0] sm:$0xff]  ;;  %v1285_v25 = vld [vmem:[#allocation9 + $0x1d0] sm:$0xff] }
  0xa9   : > { %3162 = vmatpush1.bf16.msra.mxu1 %v3161_v18  ;;  %3164 = vmatprep.subr.bf16.mxu0 %v3163_v19  ;;  %v5138_v18 = vpack.c.bf16 %v1267_v10, %v1259_v9  ;;  %v5144_v19 = vpack.c.bf16 %v1269_v13, %v1261_v11  ;;  %v5149_v24 = vpack.c.bf16 %v1286_v17, %v1278_v16  ;;  %v1302_v29 = vld [vmem:[#allocation9 + $0x258] sm:$0xff]  ;;  %v1291_v33 = vld [vmem:[#allocation9 + $0x200] sm:$0xff]  ;;  %v1293_v35 = vld [vmem:[#allocation9 + $0x210] sm:$0xff] }
  0xaa   : > { %3059 = vmatmul.mubr.msk.f32.gmra.mrb[12].mxu0 %vm454_vm0, %v378_v58  ;;  %3172 = vmatprep.subr.bf16.mxu1 %v3171_v20  ;;  %v5146_v20 = vpack.c.bf16 %v1284_v15, %v1276_v14  ;;  %v5156_v30 = vpack.c.bf16 %v1283_v22, %v1275_v21  ;;  %v1299_v34 = vld [vmem:[#allocation9 + $0x240] sm:$0xff]  ;;  %v1301_v37 = vld [vmem:[#allocation9 + $0x250] sm:$0xff]  ;;  %v1308_v38 = vld [vmem:[#allocation9 + $0x288] sm:$0xff] }
  0xab   : > { %3063 = vmatmul.mubr.msk.f32.gmra.mrb[12].mxu1 %vm454_vm0, %v378_v58  ;;  %727 = vmatprep.mubr.f32.mxu0 %v4750_v8  ;;  %v5111_v58 = vpack.c.bf16 %v1237_v52, %v1229_v51  ;;  %6366 = vst [vmem:[#allocation26_spill] sm:$0xff] %v5138_v18  ;;  %6367 = vst [vmem:[#allocation27_spill] sm:$0xff] %v5144_v19  ;;  %v1316_v39 = vld [vmem:[#allocation9 + $0x2c8] sm:$0xff]  ;;  %v1318_v41 = vld [vmem:[#allocation9 + $0x2d8] sm:$0xff] }
  0xac   : > { %816 = vmatprep.mubr.f32.mxu1 %v4750_v8  ;;  %6368 = vst [vmem:[#allocation28_spill] sm:$0xff] %v5146_v20  ;;  %6369 = vst [vmem:[#allocation29_spill] sm:$0xff] %v5149_v24  ;;  %v5173_v42 = vld [vmem:[#allocation2 + $0x8] sm:$0xff]  ;;  %v1315_v49 = vld [vmem:[#allocation9 + $0x2c0] sm:$0xff] }
  0xad   : > { %6370 = vst [vmem:[#allocation30_spill] sm:$0xff] %v5156_v30  ;;  %v1309_v50 = vld [vmem:[#allocation9 + $0x290] sm:$0xff]  ;;  %v1334_v55 = vld [vmem:[#allocation9 + $0x358] sm:$0xff]  ;;  %v1323_v62 = vld [vmem:[#allocation9 + $0x300] sm:$0xff] }
  0xae   : > { %3060 = vmatmul.mubr.msk.f32.gmra.mrb[14].mxu0 %vm454_vm0, %v379_v59  ;;  %v1317_v52 = vld [vmem:[#allocation9 + $0x2d0] sm:$0xff]  ;;  %v1331_v0 = vld [vmem:[#allocation9 + $0x340] sm:$0xff]  ;;  %v1340_v4 = vld [vmem:[#allocation9 + $0x388] sm:$0xff] }
  0xaf   : > { %3064 = vmatmul.mubr.msk.f32.gmra.mrb[14].mxu1 %vm454_vm0, %v379_v59  ;;  %935 = vmatprep.mubr.f32.mxu0 %v4750_v8  ;;  %v5113_v59 = vpack.c.bf16 %v1252_v54, %v1244_v53  ;;  %v1324_v53 = vld [vmem:[#allocation9 + $0x308] sm:$0xff]  ;;  %v5196_v60 = vpack.c.bf16 %v1317_v52, %v1309_v50  ;;  %v1325_v1 = vld [vmem:[#allocation9 + $0x310] sm:$0xff]  ;;  %v1342_v10 = vld [vmem:[#allocation9 + $0x398] sm:$0xff]  ;;  %v5204_v13 = vpack.c.bf16 %v1331_v0, %v1323_v62 }
  0xb0   : > { %1024 = vmatprep.mubr.f32.mxu1 %v4750_v8  ;;  %v1332_v54 = vld [vmem:[#allocation9 + $0x348] sm:$0xff]  ;;  %v1333_v3 = vld [vmem:[#allocation9 + $0x350] sm:$0xff]  ;;  %v1350_v11 = vld [vmem:[#allocation9 + $0x3d8] sm:$0xff] }
  0xb1   : > { %6379 = vst [vmem:[#allocation39_spill] sm:$0xff] %v5196_v60  ;;  %v5198_v61 = vpack.c.bf16 %v1332_v54, %v1324_v53  ;;  %v1348_v9 = vld [vmem:[#allocation9 + $0x3c8] sm:$0xff]  ;;  %6382 = vst [vmem:[#allocation42_spill] sm:$0xff] %v5204_v13  ;;  %v5208_v14 = vpack.c.bf16 %v1333_v3, %v1325_v1  ;;  %v1339_v16 = vld [vmem:[#allocation9 + $0x380] sm:$0xff]  ;;  %v5213_v22 = vpack.c.bf16 %v1350_v11, %v1342_v10 }
  0xb2   : > { %3065 = vmatmul.mubr.msk.f32.vlgmr.msra.gmra.mrb[6].mxu0 %vm454_vm0, %v5067_v27  ;;  %v5210_v15 = vpack.c.bf16 %v1348_v9, %v1340_v4  ;;  %v1347_v17 = vld [vmem:[#allocation9 + $0x3c0] sm:$0xff]  ;;  %v1341_v21 = vld [vmem:[#allocation9 + $0x390] sm:$0xff]  ;;  %v1382_v50 = vld [vmem:[#allocation9 + $0x4d8] sm:$0xff] }
  0xb3   : > { %3069 = vmatmul.mubr.msk.f32.vlgmr.msra.gmra.mrb[6].mxu1 %vm454_vm0, %v5067_v27  ;;  %3166 = vmatpush1.bf16.msra.mxu0 %v3165_v28  ;;  %v1294_v28 = vld [vmem:[#allocation9 + $0x218] sm:$0xff]  ;;  %6380 = vst [vmem:[#allocation40_spill] sm:$0xff] %v5198_v61  ;;  %6383 = vst [vmem:[#allocation43_spill] sm:$0xff] %v5208_v14  ;;  %v1373_v62 = vld [vmem:[#allocation9 + $0x490] sm:$0xff] }
  0xb4   : > { %3174 = vmatpush1.bf16.msra.mxu1 %v3173_v31  ;;  %941 = vmatprep.mubr.f32.mxu0 %v4750_v8  ;;  %v5162_v31 = vpack.c.bf16 %v1285_v25, %v1277_v23  ;;  %6384 = vst [vmem:[#allocation44_spill] sm:$0xff] %v5210_v15  ;;  %6385 = vst [vmem:[#allocation45_spill] sm:$0xff] %v5213_v22  ;;  %v1349_v23 = vld [vmem:[#allocation9 + $0x3d0] sm:$0xff]  ;;  %v1356_v25 = vld [vmem:[#allocation9 + $0x408] sm:$0xff] }
  0xb5   : > { %1030 = vmatprep.mubr.f32.mxu1 %v4750_v8  ;;  %3168 = vmatprep.subr.bf16.mxu0 %v3167_v32  ;;  %v1381_v1 = vld [vmem:[#allocation9 + $0x4d0] sm:$0xff]  ;;  %v1388_v3 = vld [vmem:[#allocation9 + $0x508] sm:$0xff]  ;;  %v1390_v9 = vld [vmem:[#allocation9 + $0x518] sm:$0xff] }
  0xb6   : > { %3066 = vmatmul.mubr.msk.f32.gmra.mrb[4].mxu0 %vm454_vm0, %v5075_v40  ;;  %3176 = vmatprep.subr.bf16.mxu1 %v3175_v36  ;;  %6371 = vst [vmem:[#allocation31_spill] sm:$0xff] %v5162_v31  ;;  %v5167_v36 = vpack.c.bf16 %v1302_v29, %v1294_v28  ;;  %v1366_v28 = vld [vmem:[#allocation9 + $0x458] sm:$0xff]  ;;  %v5216_v29 = vpack.c.bf16 %v1347_v17, %v1339_v16  ;;  %v1396_v4 = vld [vmem:[#allocation9 + $0x548] sm:$0xff] }
  0xb7   : > { %3070 = vmatmul.mubr.msk.f32.gmra.mrb[4].mxu1 %vm454_vm0, %v5075_v40  ;;  %947 = vmatprep.mubr.f32.mxu0 %v4750_v8  ;;  %v1398_v10 = vld [vmem:[#allocation9 + $0x558] sm:$0xff]  ;;  %v5244_v16 = vpack.c.bf16 %v1381_v1, %v1373_v62  ;;  %v5246_v17 = vpack.c.bf16 %v1396_v4, %v1388_v3  ;;  %v1413_v62 = vld [vmem:[#allocation9 + $0x5d0] sm:$0xff]  ;;  %v1420_v1 = vld [vmem:[#allocation9 + $0x608] sm:$0xff] }
  0xb8   : > { %1036 = vmatprep.mubr.f32.mxu1 %v4750_v8  ;;  %3170 = vmatpush1.bf16.msra.mxu0 %v3169_v43  ;;  %6373 = vst [vmem:[#allocation33_spill] sm:$0xff] %v5167_v36  ;;  %v5176_v43 = vpack.c.bf16 %v1299_v34, %v1291_v33  ;;  %6386 = vst [vmem:[#allocation46_spill] sm:$0xff] %v5216_v29  ;;  %v5220_v33 = vpack.c.bf16 %v1349_v23, %v1341_v21  ;;  %v1387_v21 = vld [vmem:[#allocation9 + $0x500] sm:$0xff]  ;;  %v1428_v3 = vld [vmem:[#allocation9 + $0x648] sm:$0xff] }
  0xb9   : > { %3178 = vmatpush1.bf16.msra.mxu1 %v3177_v44  ;;  %3180 = vmatprep.subr.bf16.mxu0 %v5079_v45  ;;  %v5182_v44 = vpack.c.bf16 %v1301_v37, %v1293_v35  ;;  %v1355_v35 = vld [vmem:[#allocation9 + $0x400] sm:$0xff]  ;;  %6395 = vst [vmem:[#allocation55_spill] sm:$0xff] %v5244_v16  ;;  %6396 = vst [vmem:[#allocation56_spill] sm:$0xff] %v5246_v17  ;;  %v1422_v4 = vld [vmem:[#allocation9 + $0x618] sm:$0xff] }
  0xba   : > { %3067 = vmatmul.mubr.msk.f32.gmra.mrb[2].mxu0 %vm454_vm0, %v5089_v47  ;;  %3244 = vmatprep.subr.bf16.mxu1 %v5083_v46  ;;  %6374 = vst [vmem:[#allocation34_spill] sm:$0xff] %v5176_v43  ;;  %6387 = vst [vmem:[#allocation47_spill] sm:$0xff] %v5220_v33  ;;  %v1363_v37 = vld [vmem:[#allocation9 + $0x440] sm:$0xff] }
  0xbb   : > { %3071 = vmatmul.mubr.msk.f32.gmra.mrb[2].mxu1 %vm454_vm0, %v5089_v47  ;;  %953 = vmatprep.mubr.f32.mxu0 %v4750_v8  ;;  %6375 = vst [vmem:[#allocation35_spill] sm:$0xff] %v5182_v44  ;;  %v5228_v52 = vpack.c.bf16 %v1363_v37, %v1355_v35  ;;  %v1395_v23 = vld [vmem:[#allocation9 + $0x540] sm:$0xff]  ;;  %v1412_v35 = vld [vmem:[#allocation9 + $0x5c8] sm:$0xff]  ;;  %v1406_v37 = vld [vmem:[#allocation9 + $0x598] sm:$0xff] }
  0xbc   : > { %1042 = vmatprep.mubr.f32.mxu1 %v4750_v8 }
  0xbd   : > { %6390 = vst [vmem:[#allocation50_spill] sm:$0xff] %v5228_v52 }
  0xbe   : > { %3068 = vmatmul.mubr.msk.f32.gmra.mrb[0].mxu0 %vm454_vm0, %v5100_v48 }
  0xbf   : > { %3072 = vmatmul.mubr.msk.f32.gmra.mrb[0].mxu1 %vm454_vm0, %v5100_v48  ;;  %1113 = vmatprep.mubr.f32.mxu0 %v4750_v8 }
  0xc0   : > { %1202 = vmatprep.mubr.f32.mxu1 %v4750_v8 }
  0xc2   : > { %3073 = vmatmul.mubr.msk.f32.vlgmr.msra.gmra.mrb[14].mxu0 %vm454_vm0, %v5067_v27 }
  0xc3   : > { %3077 = vmatmul.mubr.msk.f32.vlgmr.msra.gmra.mrb[14].mxu1 %vm454_vm0, %v5067_v27  ;;  %3182 = vmatpush1.bf16.msra.mxu0 %v5108_v57  ;;  %v1300_v27 = vld [vmem:[#allocation9 + $0x248] sm:$0xff] }
  0xc4   : > { %3246 = vmatpush1.bf16.msra.mxu1 %v5111_v58  ;;  %3184 = vmatprep.subr.bf16.mxu0 %v5113_v59  ;;  %v5164_v32 = vpack.c.bf16 %v1300_v27, %v1292_v26  ;;  %v1364_v26 = vld [vmem:[#allocation9 + $0x448] sm:$0xff]  ;;  %v1358_v27 = vld [vmem:[#allocation9 + $0x418] sm:$0xff] }
  0xc5   : > { %3248 = vmatprep.subr.bf16.mxu1 %v5115_v63  ;;  %1119 = vmatprep.mubr.f32.mxu0 %v4750_v8  ;;  %v5222_v34 = vpack.c.bf16 %v1364_v26, %v1356_v25  ;;  %v1389_v25 = vld [vmem:[#allocation9 + $0x510] sm:$0xff]  ;;  %v5249_v26 = vpack.c.bf16 %v1398_v10, %v1390_v9  ;;  %v1430_v9 = vld [vmem:[#allocation9 + $0x658] sm:$0xff] }
  0xc6   : > { %1208 = vmatprep.mubr.f32.mxu1 %v4750_v8  ;;  %3074 = vmatmul.mubr.msk.f32.gmra.mrb[12].mxu0 %vm454_vm0, %v5075_v40  ;;  %6372 = vst [vmem:[#allocation32_spill] sm:$0xff] %v5164_v32 }
  0xc7   : > { %3186 = vmatpush1.bf16.msra.mxu0 %v5122_v5  ;;  %3078 = vmatmul.mubr.msk.f32.gmra.mrb[12].mxu1 %vm454_vm0, %v5075_v40  ;;  %v1310_v40 = vld [vmem:[#allocation9 + $0x298] sm:$0xff]  ;;  %6388 = vst [vmem:[#allocation48_spill] sm:$0xff] %v5222_v34  ;;  %6397 = vst [vmem:[#allocation57_spill] sm:$0xff] %v5249_v26 }
  0xc8   : > { %3250 = vmatpush1.bf16.msra.mxu1 %v5126_v6  ;;  %3188 = vmatprep.subr.bf16.mxu0 %v5128_v7  ;;  %v5187_v51 = vpack.c.bf16 %v1318_v41, %v1310_v40  ;;  %v1365_v40 = vld [vmem:[#allocation9 + $0x450] sm:$0xff]  ;;  %v1372_v41 = vld [vmem:[#allocation9 + $0x488] sm:$0xff] }
  0xc9   : > { %3252 = vmatprep.subr.bf16.mxu1 %v5131_v12  ;;  %1125 = vmatprep.mubr.f32.mxu0 %v4750_v8 }
  0xca   : > { %1214 = vmatprep.mubr.f32.mxu1 %v4750_v8  ;;  %3075 = vmatmul.mubr.msk.f32.gmra.mrb[10].mxu0 %vm454_vm0, %v5089_v47  ;;  %6377 = vst [vmem:[#allocation37_spill] sm:$0xff] %v5187_v51 }
  0xcb   : > { %3190 = vmatpush1.bf16.msra.mxu0 %v5138_v18  ;;  %3079 = vmatmul.mubr.msk.f32.gmra.mrb[10].mxu1 %vm454_vm0, %v5089_v47  ;;  %v5184_v47 = vpack.c.bf16 %v1316_v39, %v1308_v38  ;;  %v1357_v38 = vld [vmem:[#allocation9 + $0x410] sm:$0xff]  ;;  %v5225_v39 = vpack.c.bf16 %v1366_v28, %v1358_v27  ;;  %v1404_v28 = vld [vmem:[#allocation9 + $0x588] sm:$0xff] }
  0xcc   : > { %3254 = vmatpush1.bf16.msra.mxu1 %v5144_v19  ;;  %3192 = vmatprep.subr.bf16.mxu0 %v5146_v20  ;;  %v5232_v53 = vpack.c.bf16 %v1365_v40, %v1357_v38  ;;  %v1397_v27 = vld [vmem:[#allocation9 + $0x550] sm:$0xff]  ;;  %v1414_v38 = vld [vmem:[#allocation9 + $0x5d8] sm:$0xff]  ;;  %v5252_v40 = vpack.c.bf16 %v1395_v23, %v1387_v21  ;;  %v5270_v23 = vpack.c.bf16 %v1428_v3, %v1420_v1  ;;  %v1435_v1 = vld [vmem:[#allocation9 + $0x680] sm:$0xff] }
  0xcd   : > { %3256 = vmatprep.subr.bf16.mxu1 %v5149_v24  ;;  %1131 = vmatprep.mubr.f32.mxu0 %v4750_v8  ;;  %6376 = vst [vmem:[#allocation36_spill] sm:$0xff] %v5184_v47  ;;  %6389 = vst [vmem:[#allocation49_spill] sm:$0xff] %v5225_v39  ;;  %v1443_v3 = vld [vmem:[#allocation9 + $0x6c0] sm:$0xff] }
  0xce   : > { %1220 = vmatprep.mubr.f32.mxu1 %v4750_v8  ;;  %3076 = vmatmul.mubr.msk.f32.gmra.mrb[8].mxu0 %vm454_vm0, %v5100_v48  ;;  %v1307_v8 = vld [vmem:[#allocation9 + $0x280] sm:$0xff]  ;;  %6391 = vst [vmem:[#allocation51_spill] sm:$0xff] %v5232_v53  ;;  %6398 = vst [vmem:[#allocation58_spill] sm:$0xff] %v5252_v40 }
  0xcf   : > { %3194 = vmatpush1.bf16.msra.mxu0 %v5156_v30  ;;  %3080 = vmatmul.mubr.msk.f32.gmra.mrb[8].mxu1 %vm454_vm0, %v5100_v48  ;;  %v1326_v48 = vld [vmem:[#allocation9 + $0x318] sm:$0xff]  ;;  %v5192_v56 = vpack.c.bf16 %v1315_v49, %v1307_v8  ;;  %v1380_v8 = vld [vmem:[#allocation9 + $0x4c8] sm:$0xff]  ;;  %6404 = vst [vmem:[#allocation64_spill] sm:$0xff] %v5270_v23 }
  0xd0   : > { %3258 = vmatpush1.bf16.msra.mxu1 %v5162_v31  ;;  %3196 = vmatprep.subr.bf16.mxu0 %v5164_v32  ;;  %v5201_v2 = vpack.c.bf16 %v1334_v55, %v1326_v48  ;;  %v1374_v49 = vld [vmem:[#allocation9 + $0x498] sm:$0xff]  ;;  %v5234_v54 = vpack.c.bf16 %v1380_v8, %v1372_v41  ;;  %v1371_v48 = vld [vmem:[#allocation9 + $0x480] sm:$0xff]  ;;  %v5256_v41 = vpack.c.bf16 %v1397_v27, %v1389_v25 }
  0xd1   : > { %3260 = vmatprep.subr.bf16.mxu1 %v5167_v36  ;;  %1551 = vmatprep.mubr.f32.mxu0 %v5173_v42  ;;  %6378 = vst [vmem:[#allocation38_spill] sm:$0xff] %v5192_v56  ;;  %v1379_v55 = vld [vmem:[#allocation9 + $0x4c0] sm:$0xff]  ;;  %v5237_v0 = vpack.c.bf16 %v1382_v50, %v1374_v49  ;;  %v5258_v8 = vpack.c.bf16 %v1412_v35, %v1404_v28  ;;  %v1421_v28 = vld [vmem:[#allocation9 + $0x610] sm:$0xff] }
  0xd2   : > { %1622 = vmatprep.mubr.f32.mxu1 %v5173_v42  ;;  %6381 = vst [vmem:[#allocation41_spill] sm:$0xff] %v5201_v2  ;;  %6392 = vst [vmem:[#allocation52_spill] sm:$0xff] %v5234_v54  ;;  %v5240_v11 = vpack.c.bf16 %v1379_v55, %v1371_v48  ;;  %v1403_v49 = vld [vmem:[#allocation9 + $0x580] sm:$0xff]  ;;  %v1405_v48 = vld [vmem:[#allocation9 + $0x590] sm:$0xff]  ;;  %v5261_v55 = vpack.c.bf16 %v1414_v38, %v1406_v37  ;;  %v5273_v35 = vpack.c.bf16 %v1430_v9, %v1422_v4 }
  0xd3   : > { %3198 = vmatpush1.bf16.msra.mxu0 %v5176_v43  ;;  %6393 = vst [vmem:[#allocation53_spill] sm:$0xff] %v5237_v0  ;;  %6399 = vst [vmem:[#allocation59_spill] sm:$0xff] %v5256_v41  ;;  %v1411_v50 = vld [vmem:[#allocation9 + $0x5c0] sm:$0xff]  ;;  %v5268_v21 = vpack.c.bf16 %v1413_v62, %v1405_v48  ;;  %v1429_v37 = vld [vmem:[#allocation9 + $0x650] sm:$0xff] }
  0xd4   : > { %3262 = vmatpush1.bf16.msra.mxu1 %v5182_v44  ;;  %3200 = vmatprep.subr.bf16.mxu0 %v5184_v47  ;;  %6394 = vst [vmem:[#allocation54_spill] sm:$0xff] %v5240_v11  ;;  %6400 = vst [vmem:[#allocation60_spill] sm:$0xff] %v5258_v8  ;;  %v5264_v10 = vpack.c.bf16 %v1411_v50, %v1403_v49  ;;  %v1419_v25 = vld [vmem:[#allocation9 + $0x600] sm:$0xff]  ;;  %v1436_v38 = vld [vmem:[#allocation9 + $0x688] sm:$0xff]  ;;  %v5280_v48 = vpack.c.bf16 %v1429_v37, %v1421_v28 }
  0xd5   : > { %3264 = vmatprep.subr.bf16.mxu1 %v5187_v51  ;;  %6401 = vst [vmem:[#allocation61_spill] sm:$0xff] %v5261_v55  ;;  %6403 = vst [vmem:[#allocation63_spill] sm:$0xff] %v5268_v21  ;;  %v1427_v27 = vld [vmem:[#allocation9 + $0x640] sm:$0xff]  ;;  %v1438_v49 = vld [vmem:[#allocation9 + $0x698] sm:$0xff] }
  0xd6   : > { %6402 = vst [vmem:[#allocation62_spill] sm:$0xff] %v5264_v10  ;;  %6405 = vst [vmem:[#allocation65_spill] sm:$0xff] %v5273_v35  ;;  %v1446_v50 = vld [vmem:[#allocation9 + $0x6d8] sm:$0xff]  ;;  %v1437_v4 = vld [vmem:[#allocation9 + $0x690] sm:$0xff] }
  0xd7   : > { %3202 = vmatpush1.bf16.msra.mxu0 %v5192_v56  ;;  %6407 = vst [vmem:[#allocation67_spill] sm:$0xff] %v5280_v48  ;;  %v5285_v9 = vpack.c.bf16 %v1446_v50, %v1438_v49  ;;  %v1451_v37 = vld [vmem:[#allocation9 + $0x700] sm:$0xff]  ;;  %v1453_v49 = vld [vmem:[#allocation9 + $0x710] sm:$0xff] }
  0xd8   : > { %3266 = vmatpush1.bf16.msra.mxu1 %v5196_v60  ;;  %3204 = vmatprep.subr.bf16.mxu0 %v5198_v61 }
  0xd9   : > { %3268 = vmatprep.subr.bf16.mxu1 %v5201_v2  ;;  %6409 = vst [vmem:[#allocation69_spill] sm:$0xff] %v5285_v9 }
  0xdb   : > { %3206 = vmatpush1.bf16.msra.mxu0 %v5204_v13 }
  0xdc   : > { %3270 = vmatpush1.bf16.msra.mxu1 %v5208_v14  ;;  %3208 = vmatprep.subr.bf16.mxu0 %v5210_v15 }
  0xdd   : > { %3272 = vmatprep.subr.bf16.mxu1 %v5213_v22 }
  0xdf   : > { %3210 = vmatpush1.bf16.msra.mxu0 %v5216_v29 }
  0xe0   : > { %3274 = vmatpush1.bf16.msra.mxu1 %v5220_v33  ;;  %3212 = vmatprep.subr.bf16.mxu0 %v5222_v34 }
  0xe1   : > { %3276 = vmatprep.subr.bf16.mxu1 %v5225_v39 }
  0xe3   : > { %3214 = vmatpush1.bf16.msra.mxu0 %v5228_v52 }
  0xe4   : > { %3278 = vmatpush1.bf16.msra.mxu1 %v5232_v53  ;;  %3216 = vmatprep.subr.bf16.mxu0 %v5234_v54 }
  0xe5   : > { %3280 = vmatprep.subr.bf16.mxu1 %v5237_v0 }
  0xe7   : > { %3218 = vmatpush1.bf16.msra.mxu0 %v5240_v11 }
  0xe8   : > { %3282 = vmatpush1.bf16.msra.mxu1 %v5244_v16  ;;  %3220 = vmatprep.subr.bf16.mxu0 %v5246_v17 }
  0xe9   : > { %3284 = vmatprep.subr.bf16.mxu1 %v5249_v26  ;;  %v1272_v26 = vld [vmem:[#allocation9 + $0x168] sm:$0xff] }
  0xeb   : > { %3222 = vmatpush1.bf16.msra.mxu0 %v5252_v40  ;;  %v1444_v40 = vld [vmem:[#allocation9 + $0x6c8] sm:$0xff] }
  0xec   : > { %3286 = vmatpush1.bf16.msra.mxu1 %v5256_v41  ;;  %3224 = vmatprep.subr.bf16.mxu0 %v5258_v8  ;;  %v5276_v41 = vpack.c.bf16 %v1427_v27, %v1419_v25  ;;  %v5282_v62 = vpack.c.bf16 %v1444_v40, %v1436_v38  ;;  %v1452_v8 = vld [vmem:[#allocation9 + $0x708] sm:$0xff]  ;;  %v1454_v25 = vld [vmem:[#allocation9 + $0x718] sm:$0xff]  ;;  %v1459_v38 = vld [vmem:[#allocation9 + $0x740] sm:$0xff] }
  0xed   : > { %3288 = vmatprep.subr.bf16.mxu1 %v5261_v55  ;;  %v1445_v55 = vld [vmem:[#allocation9 + $0x6d0] sm:$0xff]  ;;  %v1462_v27 = vld [vmem:[#allocation9 + $0x758] sm:$0xff] }
  0xee   : > { %6406 = vst [vmem:[#allocation66_spill] sm:$0xff] %v5276_v41  ;;  %6408 = vst [vmem:[#allocation68_spill] sm:$0xff] %v5282_v62  ;;  %v5292_v40 = vpack.c.bf16 %v1445_v55, %v1437_v4  ;;  %v5297_v50 = vpack.c.bf16 %v1462_v27, %v1454_v25  ;;  %v1475_v4 = vld [vmem:[#allocation9 + $0x7c0] sm:$0xff]  ;;  %v1469_v25 = vld [vmem:[#allocation9 + $0x790] sm:$0xff] }
  0xef   : > { %3226 = vmatpush1.bf16.msra.mxu0 %v5264_v10  ;;  %v1460_v10 = vld [vmem:[#allocation9 + $0x748] sm:$0xff] }
  0xf0   : > { %3290 = vmatpush1.bf16.msra.mxu1 %v5268_v21  ;;  %3228 = vmatprep.subr.bf16.mxu0 %v5270_v23  ;;  %v5288_v21 = vpack.c.bf16 %v1443_v3, %v1435_v1  ;;  %6411 = vst [vmem:[#allocation71_spill] sm:$0xff] %v5292_v40  ;;  %v5294_v28 = vpack.c.bf16 %v1460_v10, %v1452_v8  ;;  %6413 = vst [vmem:[#allocation73_spill] sm:$0xff] %v5297_v50  ;;  %v1468_v23 = vld [vmem:[#allocation9 + $0x788] sm:$0xff]  ;;  %v1470_v1 = vld [vmem:[#allocation9 + $0x798] sm:$0xff] }
  0xf1   : > { %3292 = vmatprep.subr.bf16.mxu1 %v5273_v35  ;;  %v1461_v35 = vld [vmem:[#allocation9 + $0x750] sm:$0xff]  ;;  %v1478_v3 = vld [vmem:[#allocation9 + $0x7d8] sm:$0xff]  ;;  %v1467_v10 = vld [vmem:[#allocation9 + $0x780] sm:$0xff] }
  0xf2   : > { %6410 = vst [vmem:[#allocation70_spill] sm:$0xff] %v5288_v21  ;;  %6412 = vst [vmem:[#allocation72_spill] sm:$0xff] %v5294_v28  ;;  %v5304_v8 = vpack.c.bf16 %v1461_v35, %v1453_v49  ;;  %v5309_v27 = vpack.c.bf16 %v1478_v3, %v1470_v1  ;;  %v1231_v35 = vld [vmem:[#allocation9 + $0x20] sm:$0xff]  ;;  %v1233_v1 = vld [vmem:[#allocation9 + $0x30] sm:$0xff] }
  0xf3   : > { %3230 = vmatpush1.bf16.msra.mxu0 %v5276_v41  ;;  %v1476_v41 = vld [vmem:[#allocation9 + $0x7c8] sm:$0xff]  ;;  %v1239_v49 = vld [vmem:[#allocation9 + $0x60] sm:$0xff] }
  0xf4   : > { %3294 = vmatpush1.bf16.msra.mxu1 %v5280_v48  ;;  %3232 = vmatprep.subr.bf16.mxu0 %v5282_v62  ;;  %v5300_v48 = vpack.c.bf16 %v1459_v38, %v1451_v37  ;;  %6415 = vst [vmem:[#allocation75_spill] sm:$0xff] %v5304_v8  ;;  %v5306_v55 = vpack.c.bf16 %v1476_v41, %v1468_v23  ;;  %6417 = vst [vmem:[#allocation77_spill] sm:$0xff] %v5309_v27  ;;  %v1232_v62 = vld [vmem:[#allocation9 + $0x28] sm:$0xff]  ;;  %v1234_v37 = vld [vmem:[#allocation9 + $0x38] sm:$0xff] }
  0xf5   : > { %3296 = vmatprep.subr.bf16.mxu1 %v5285_v9  ;;  %v1477_v9 = vld [vmem:[#allocation9 + $0x7d0] sm:$0xff]  ;;  %v1242_v38 = vld [vmem:[#allocation9 + $0x78] sm:$0xff] }
  0xf6   : > { %6414 = vst [vmem:[#allocation74_spill] sm:$0xff] %v5300_v48  ;;  %6416 = vst [vmem:[#allocation76_spill] sm:$0xff] %v5306_v55  ;;  %v5316_v41 = vpack.c.bf16 %v1477_v9, %v1469_v25  ;;  %v5321_v3 = vpack.c.bf16 %v1242_v38, %v1234_v37  ;;  %v5326_v9 = vpack.c.bf16 %v1239_v49, %v1231_v35  ;;  %v1247_v25 = vld [vmem:[#allocation9 + $0xa0] sm:$0xff]  ;;  %v1249_v38 = vld [vmem:[#allocation9 + $0xb0] sm:$0xff] }
  0xf7   : > { %3234 = vmatpush1.bf16.msra.mxu0 %v5288_v21  ;;  %v1240_v21 = vld [vmem:[#allocation9 + $0x68] sm:$0xff]  ;;  %v1255_v37 = vld [vmem:[#allocation9 + $0xe0] sm:$0xff]  ;;  %v1266_v35 = vld [vmem:[#allocation9 + $0x138] sm:$0xff] }
  0xf8   : > { %3298 = vmatpush1.bf16.msra.mxu1 %v5292_v40  ;;  %3236 = vmatprep.subr.bf16.mxu0 %v5294_v28  ;;  %v5312_v40 = vpack.c.bf16 %v1475_v4, %v1467_v10  ;;  %6419 = vst [vmem:[#allocation79_spill] sm:$0xff] %v5316_v41  ;;  %v5318_v23 = vpack.c.bf16 %v1240_v21, %v1232_v62  ;;  %6421 = vst [vmem:[#allocation81_spill] sm:$0xff] %v5321_v3  ;;  %v1248_v28 = vld [vmem:[#allocation9 + $0xa8] sm:$0xff]  ;;  %v1250_v10 = vld [vmem:[#allocation9 + $0xb8] sm:$0xff] }
  0xf9   : > { %3300 = vmatprep.subr.bf16.mxu1 %v5297_v50  ;;  %v1241_v50 = vld [vmem:[#allocation9 + $0x70] sm:$0xff]  ;;  %v1258_v4 = vld [vmem:[#allocation9 + $0xf8] sm:$0xff]  ;;  %6422 = vst [vmem:[#allocation82_spill] sm:$0xff] %v5326_v9 }
  0xfa   : > { %6418 = vst [vmem:[#allocation78_spill] sm:$0xff] %v5312_v40  ;;  %6420 = vst [vmem:[#allocation80_spill] sm:$0xff] %v5318_v23  ;;  %v5330_v21 = vpack.c.bf16 %v1241_v50, %v1233_v1  ;;  %v1274_v49 = vld [vmem:[#allocation9 + $0x178] sm:$0xff]  ;;  %v1263_v1 = vld [vmem:[#allocation9 + $0x120] sm:$0xff] }
  0xfb   : > { %3238 = vmatpush1.bf16.msra.mxu0 %v5300_v48  ;;  %v1256_v48 = vld [vmem:[#allocation9 + $0xe8] sm:$0xff] }
  0xfc   : > { %3302 = vmatpush1.bf16.msra.mxu1 %v5304_v8  ;;  %3240 = vmatprep.subr.bf16.mxu0 %v5306_v55  ;;  %v5324_v8 = vld [vmem:[#allocation2] sm:$0xff]  ;;  %v5332_v62 = vpack.c.bf16 %v1256_v48, %v1248_v28  ;;  %v1264_v55 = vld [vmem:[#allocation9 + $0x128] sm:$0xff]  ;;  %v5340_v48 = vpack.c.bf16 %v1255_v37, %v1247_v25  ;;  %v1282_v25 = vld [vmem:[#allocation9 + $0x1b8] sm:$0xff] }
  0xfd   : > { %3304 = vmatprep.subr.bf16.mxu1 %v5309_v27  ;;  %v5335_v27 = vpack.c.bf16 %v1258_v4, %v1250_v10  ;;  %v5346_v50 = vpack.c.bf16 %v1272_v26, %v1264_v55  ;;  %v1271_v10 = vld [vmem:[#allocation9 + $0x160] sm:$0xff]  ;;  %v1265_v4 = vld [vmem:[#allocation9 + $0x130] sm:$0xff]  ;;  %v1290_v37 = vld [vmem:[#allocation9 + $0x1f8] sm:$0xff] }
  0xfe   : > { %6423 = vst [vmem:[#allocation83_spill] sm:$0xff] %v5332_v62  ;;  %6425 = vst [vmem:[#allocation85_spill] sm:$0xff] %v5340_v48  ;;  %v5354_v26 = vpack.c.bf16 %v1271_v10, %v1263_v1  ;;  %v1298_v1 = vld [vmem:[#allocation9 + $0x238] sm:$0xff] }
  0xff   : > { %3242 = vmatpush1.bf16.msra.mxu0 %v5312_v40  ;;  %6424 = vst [vmem:[#allocation84_spill] sm:$0xff] %v5335_v27  ;;  %v1257_v40 = vld [vmem:[#allocation9 + $0xf0] sm:$0xff]  ;;  %6427 = vst [vmem:[#allocation87_spill] sm:$0xff] %v5346_v50  ;;  %v1306_v10 = vld [vmem:[#allocation9 + $0x278] sm:$0xff] }
 0x100   : > { %3306 = vmatpush1.bf16.msra.mxu1 %v5316_v41  ;;  %3308 = vmatprep.subr.bf16.mxu0 %v5318_v23  ;;  %v5344_v28 = vpack.c.bf16 %v1257_v40, %v1249_v38  ;;  %v1273_v23 = vld [vmem:[#allocation9 + $0x170] sm:$0xff]  ;;  %v1280_v41 = vld [vmem:[#allocation9 + $0x1a8] sm:$0xff]  ;;  %6429 = vst [vmem:[#allocation89_spill] sm:$0xff] %v5354_v26  ;;  %v1279_v38 = vld [vmem:[#allocation9 + $0x1a0] sm:$0xff] }
 0x101   : > { %3372 = vmatprep.subr.bf16.mxu1 %v5321_v3  ;;  %v5349_v3 = vpack.c.bf16 %v1274_v49, %v1266_v35  ;;  %v5358_v40 = vpack.c.bf16 %v1273_v23, %v1265_v4  ;;  %v1287_v35 = vld [vmem:[#allocation9 + $0x1e0] sm:$0xff]  ;;  %v1281_v49 = vld [vmem:[#allocation9 + $0x1b0] sm:$0xff] }
 0x102   : > { %1552 = vmatmul.mubr.f32.vlgmr.msra.gmra.mrb[0].mxu0 %v5324_v8  ;;  %6426 = vst [vmem:[#allocation86_spill] sm:$0xff] %v5344_v28  ;;  %v1303_v4 = vld [vmem:[#allocation9 + $0x260] sm:$0xff] }
 0x103   : > { %1623 = vmatmul.mubr.f32.vlgmr.msra.gmra.mrb[0].mxu1 %v5324_v8  ;;  %3310 = vmatpush1.bf16.msra.mxu0 %v5326_v9  ;;  %6428 = vst [vmem:[#allocation88_spill] sm:$0xff] %v5349_v3  ;;  %v1288_v9 = vld [vmem:[#allocation9 + $0x1e8] sm:$0xff]  ;;  %6430 = vst [vmem:[#allocation90_spill] sm:$0xff] %v5358_v40 }
 0x104   : > { %3374 = vmatpush1.bf16.msra.mxu1 %v5330_v21  ;;  %3312 = vmatprep.subr.bf16.mxu0 %v5332_v62  ;;  %v5360_v55 = vpack.c.bf16 %v1288_v9, %v1280_v41  ;;  %v1296_v62 = vld [vmem:[#allocation9 + $0x228] sm:$0xff]  ;;  %v1295_v9 = vld [vmem:[#allocation9 + $0x220] sm:$0xff] }
 0x105   : > { %3376 = vmatprep.subr.bf16.mxu1 %v5335_v27  ;;  %1693 = vmatprep.mubr.f32.mxu0 %v5173_v42  ;;  %v5363_v27 = vpack.c.bf16 %v1290_v37, %v1282_v25  ;;  %v1297_v25 = vld [vmem:[#allocation9 + $0x230] sm:$0xff]  ;;  %v5375_v37 = vpack.c.bf16 %v1306_v10, %v1298_v1 }
 0x106   : > { %1764 = vmatprep.mubr.f32.mxu1 %v5173_v42  ;;  %6431 = vst [vmem:[#allocation91_spill] sm:$0xff] %v5360_v55  ;;  %v1289_v42 = vld [vmem:[#allocation9 + $0x1f0] sm:$0xff] }
 0x107   : > { %3314 = vmatpush1.bf16.msra.mxu0 %v5340_v48  ;;  %6432 = vst [vmem:[#allocation92_spill] sm:$0xff] %v5363_v27  ;;  %v1304_v48 = vld [vmem:[#allocation9 + $0x268] sm:$0xff]  ;;  %v5370_v41 = vpack.c.bf16 %v1289_v42, %v1281_v49  ;;  %6436 = vst [vmem:[#allocation96_spill] sm:$0xff] %v5375_v37  ;;  %v1311_v49 = vld [vmem:[#allocation9 + $0x2a0] sm:$0xff] }
 0x108   : > { %3378 = vmatpush1.bf16.msra.mxu1 %v5344_v28  ;;  %3316 = vmatprep.subr.bf16.mxu0 %v5346_v50  ;;  %v5366_v28 = vpack.c.bf16 %v1287_v35, %v1279_v38  ;;  %v5372_v23 = vpack.c.bf16 %v1304_v48, %v1296_v62  ;;  %v1312_v50 = vld [vmem:[#allocation9 + $0x2a8] sm:$0xff]  ;;  %v1314_v38 = vld [vmem:[#allocation9 + $0x2b8] sm:$0xff]  ;;  %v1319_v42 = vld [vmem:[#allocation9 + $0x2e0] sm:$0xff] }
 0x109   : > { %3380 = vmatprep.subr.bf16.mxu1 %v5349_v3  ;;  %6434 = vst [vmem:[#allocation94_spill] sm:$0xff] %v5370_v41  ;;  %v1305_v3 = vld [vmem:[#allocation9 + $0x270] sm:$0xff]  ;;  %v1322_v35 = vld [vmem:[#allocation9 + $0x2f8] sm:$0xff] }
 0x10a   : > { %6433 = vst [vmem:[#allocation93_spill] sm:$0xff] %v5366_v28  ;;  %6435 = vst [vmem:[#allocation95_spill] sm:$0xff] %v5372_v23  ;;  %v5382_v62 = vpack.c.bf16 %v1305_v3, %v1297_v25  ;;  %v1313_v1 = vld [vmem:[#allocation9 + $0x2b0] sm:$0xff]  ;;  %v5387_v10 = vpack.c.bf16 %v1322_v35, %v1314_v38  ;;  %v1335_v25 = vld [vmem:[#allocation9 + $0x360] sm:$0xff] }
 0x10b   : > { %3318 = vmatpush1.bf16.msra.mxu0 %v5354_v26  ;;  %v1320_v26 = vld [vmem:[#allocation9 + $0x2e8] sm:$0xff]  ;;  %v1329_v38 = vld [vmem:[#allocation9 + $0x330] sm:$0xff] }
 0x10c   : > { %3382 = vmatpush1.bf16.msra.mxu1 %v5358_v40  ;;  %3320 = vmatprep.subr.bf16.mxu0 %v5360_v55  ;;  %v5378_v40 = vpack.c.bf16 %v1303_v4, %v1295_v9  ;;  %6438 = vst [vmem:[#allocation98_spill] sm:$0xff] %v5382_v62  ;;  %v5384_v48 = vpack.c.bf16 %v1320_v26, %v1312_v50  ;;  %6440 = vst [vmem:[#allocation100_spill] sm:$0xff] %v5387_v10  ;;  %v1328_v55 = vld [vmem:[#allocation9 + $0x328] sm:$0xff]  ;;  %v1330_v9 = vld [vmem:[#allocation9 + $0x338] sm:$0xff] }
 0x10d   : > { %3384 = vmatprep.subr.bf16.mxu1 %v5363_v27  ;;  %v1321_v27 = vld [vmem:[#allocation9 + $0x2f0] sm:$0xff]  ;;  %v1338_v4 = vld [vmem:[#allocation9 + $0x378] sm:$0xff]  ;;  %v1327_v26 = vld [vmem:[#allocation9 + $0x320] sm:$0xff] }
 0x10e   : > { %6437 = vst [vmem:[#allocation97_spill] sm:$0xff] %v5378_v40  ;;  %6439 = vst [vmem:[#allocation99_spill] sm:$0xff] %v5384_v48  ;;  %v5394_v3 = vpack.c.bf16 %v1321_v27, %v1313_v1  ;;  %v5399_v35 = vpack.c.bf16 %v1338_v4, %v1330_v9  ;;  %v1351_v1 = vld [vmem:[#allocation9 + $0x3e0] sm:$0xff]  ;;  %v1345_v9 = vld [vmem:[#allocation9 + $0x3b0] sm:$0xff] }
 0x10f   : > { %3322 = vmatpush1.bf16.msra.mxu0 %v5366_v28  ;;  %v1336_v28 = vld [vmem:[#allocation9 + $0x368] sm:$0xff] }
 0x110   : > { %3386 = vmatpush1.bf16.msra.mxu1 %v5370_v41  ;;  %3324 = vmatprep.subr.bf16.mxu0 %v5372_v23  ;;  %v5390_v41 = vpack.c.bf16 %v1319_v42, %v1311_v49  ;;  %6442 = vst [vmem:[#allocation102_spill] sm:$0xff] %v5394_v3  ;;  %v5396_v50 = vpack.c.bf16 %v1336_v28, %v1328_v55  ;;  %6444 = vst [vmem:[#allocation104_spill] sm:$0xff] %v5399_v35  ;;  %v1344_v23 = vld [vmem:[#allocation9 + $0x3a8] sm:$0xff]  ;;  %v1346_v49 = vld [vmem:[#allocation9 + $0x3b8] sm:$0xff] }
 0x111   : > { %3388 = vmatprep.subr.bf16.mxu1 %v5375_v37  ;;  %v1337_v37 = vld [vmem:[#allocation9 + $0x370] sm:$0xff]  ;;  %v1354_v42 = vld [vmem:[#allocation9 + $0x3f8] sm:$0xff]  ;;  %v1343_v55 = vld [vmem:[#allocation9 + $0x3a0] sm:$0xff] }
 0x112   : > { %6441 = vst [vmem:[#allocation101_spill] sm:$0xff] %v5390_v41  ;;  %6443 = vst [vmem:[#allocation103_spill] sm:$0xff] %v5396_v50  ;;  %v5406_v27 = vpack.c.bf16 %v1337_v37, %v1329_v38  ;;  %v5411_v4 = vpack.c.bf16 %v1354_v42, %v1346_v49  ;;  %v1359_v37 = vld [vmem:[#allocation9 + $0x420] sm:$0xff]  ;;  %v1361_v49 = vld [vmem:[#allocation9 + $0x430] sm:$0xff] }
 0x113   : > { %3326 = vmatpush1.bf16.msra.mxu0 %v5378_v40  ;;  %v1352_v40 = vld [vmem:[#allocation9 + $0x3e8] sm:$0xff]  ;;  %v1367_v38 = vld [vmem:[#allocation9 + $0x460] sm:$0xff] }
 0x114   : > { %3390 = vmatpush1.bf16.msra.mxu1 %v5382_v62  ;;  %3328 = vmatprep.subr.bf16.mxu0 %v5384_v48  ;;  %v5402_v62 = vpack.c.bf16 %v1335_v25, %v1327_v26  ;;  %6446 = vst [vmem:[#allocation106_spill] sm:$0xff] %v5406_v27  ;;  %v5408_v28 = vpack.c.bf16 %v1352_v40, %v1344_v23  ;;  %6448 = vst [vmem:[#allocation108_spill] sm:$0xff] %v5411_v4  ;;  %v1360_v48 = vld [vmem:[#allocation9 + $0x428] sm:$0xff]  ;;  %v1362_v26 = vld [vmem:[#allocation9 + $0x438] sm:$0xff] }
 0x115   : > { %3392 = vmatprep.subr.bf16.mxu1 %v5387_v10  ;;  %v1353_v10 = vld [vmem:[#allocation9 + $0x3f0] sm:$0xff]  ;;  %v1370_v25 = vld [vmem:[#allocation9 + $0x478] sm:$0xff] }
 0x116   : > { %6445 = vst [vmem:[#allocation105_spill] sm:$0xff] %v5402_v62  ;;  %6447 = vst [vmem:[#allocation107_spill] sm:$0xff] %v5408_v28  ;;  %v5418_v40 = vpack.c.bf16 %v1353_v10, %v1345_v9  ;;  %v5423_v42 = vpack.c.bf16 %v1370_v25, %v1362_v26  ;;  %v1375_v10 = vld [vmem:[#allocation9 + $0x4a0] sm:$0xff]  ;;  %v1377_v26 = vld [vmem:[#allocation9 + $0x4b0] sm:$0xff] }
 0x117   : > { %3330 = vmatpush1.bf16.msra.mxu0 %v5390_v41  ;;  %v1368_v41 = vld [vmem:[#allocation9 + $0x468] sm:$0xff]  ;;  %v1383_v9 = vld [vmem:[#allocation9 + $0x4e0] sm:$0xff] }
 0x118   : > { %3394 = vmatpush1.bf16.msra.mxu1 %v5394_v3  ;;  %3332 = vmatprep.subr.bf16.mxu0 %v5396_v50  ;;  %v5414_v3 = vpack.c.bf16 %v1351_v1, %v1343_v55  ;;  %6450 = vst [vmem:[#allocation110_spill] sm:$0xff] %v5418_v40  ;;  %v5420_v23 = vpack.c.bf16 %v1368_v41, %v1360_v48  ;;  %6452 = vst [vmem:[#allocation112_spill] sm:$0xff] %v5423_v42  ;;  %v1376_v50 = vld [vmem:[#allocation9 + $0x4a8] sm:$0xff]  ;;  %v1378_v55 = vld [vmem:[#allocation9 + $0x4b8] sm:$0xff] }
 0x119   : > { %3396 = vmatprep.subr.bf16.mxu1 %v5399_v35  ;;  %v1369_v35 = vld [vmem:[#allocation9 + $0x470] sm:$0xff]  ;;  %v1386_v1 = vld [vmem:[#allocation9 + $0x4f8] sm:$0xff] }
 0x11a   : > { %6449 = vst [vmem:[#allocation109_spill] sm:$0xff] %v5414_v3  ;;  %6451 = vst [vmem:[#allocation111_spill] sm:$0xff] %v5420_v23  ;;  %v5430_v41 = vpack.c.bf16 %v1369_v35, %v1361_v49  ;;  %v5435_v25 = vpack.c.bf16 %v1386_v1, %v1378_v55  ;;  %v1391_v35 = vld [vmem:[#allocation9 + $0x520] sm:$0xff]  ;;  %v1393_v55 = vld [vmem:[#allocation9 + $0x530] sm:$0xff] }
 0x11b   : > { %3334 = vmatpush1.bf16.msra.mxu0 %v5402_v62  ;;  %v1384_v62 = vld [vmem:[#allocation9 + $0x4e8] sm:$0xff]  ;;  %v1399_v49 = vld [vmem:[#allocation9 + $0x560] sm:$0xff] }
 0x11c   : > { %3398 = vmatpush1.bf16.msra.mxu1 %v5406_v27  ;;  %3336 = vmatprep.subr.bf16.mxu0 %v5408_v28  ;;  %v5426_v27 = vpack.c.bf16 %v1367_v38, %v1359_v37  ;;  %6454 = vst [vmem:[#allocation114_spill] sm:$0xff] %v5430_v41  ;;  %v5432_v48 = vpack.c.bf16 %v1384_v62, %v1376_v50  ;;  %6456 = vst [vmem:[#allocation116_spill] sm:$0xff] %v5435_v25  ;;  %v1392_v28 = vld [vmem:[#allocation9 + $0x528] sm:$0xff]  ;;  %v1394_v37 = vld [vmem:[#allocation9 + $0x538] sm:$0xff] }
 0x11d   : > { %3400 = vmatprep.subr.bf16.mxu1 %v5411_v4  ;;  %v1385_v4 = vld [vmem:[#allocation9 + $0x4f0] sm:$0xff]  ;;  %v1402_v38 = vld [vmem:[#allocation9 + $0x578] sm:$0xff] }
 0x11e   : > { %6453 = vst [vmem:[#allocation113_spill] sm:$0xff] %v5426_v27  ;;  %6455 = vst [vmem:[#allocation115_spill] sm:$0xff] %v5432_v48  ;;  %v5442_v62 = vpack.c.bf16 %v1385_v4, %v1377_v26  ;;  %v5447_v1 = vpack.c.bf16 %v1402_v38, %v1394_v37  ;;  %v1407_v4 = vld [vmem:[#allocation9 + $0x5a0] sm:$0xff]  ;;  %v1409_v37 = vld [vmem:[#allocation9 + $0x5b0] sm:$0xff] }
 0x11f   : > { %3338 = vmatpush1.bf16.msra.mxu0 %v5414_v3  ;;  %v1400_v3 = vld [vmem:[#allocation9 + $0x568] sm:$0xff]  ;;  %v1415_v26 = vld [vmem:[#allocation9 + $0x5e0] sm:$0xff] }
 0x120   : > { %3402 = vmatpush1.bf16.msra.mxu1 %v5418_v40  ;;  %3340 = vmatprep.subr.bf16.mxu0 %v5420_v23  ;;  %v5438_v40 = vpack.c.bf16 %v1383_v9, %v1375_v10  ;;  %6458 = vst [vmem:[#allocation118_spill] sm:$0xff] %v5442_v62  ;;  %v5444_v50 = vpack.c.bf16 %v1400_v3, %v1392_v28  ;;  %6460 = vst [vmem:[#allocation120_spill] sm:$0xff] %v5447_v1  ;;  %v1408_v23 = vld [vmem:[#allocation9 + $0x5a8] sm:$0xff]  ;;  %v1410_v10 = vld [vmem:[#allocation9 + $0x5b8] sm:$0xff] }
 0x121   : > { %3404 = vmatprep.subr.bf16.mxu1 %v5423_v42  ;;  %v1401_v42 = vld [vmem:[#allocation9 + $0x570] sm:$0xff]  ;;  %v1418_v9 = vld [vmem:[#allocation9 + $0x5f8] sm:$0xff] }
 0x122   : > { %6457 = vst [vmem:[#allocation117_spill] sm:$0xff] %v5438_v40  ;;  %6459 = vst [vmem:[#allocation119_spill] sm:$0xff] %v5444_v50  ;;  %v5454_v3 = vpack.c.bf16 %v1401_v42, %v1393_v55  ;;  %v5459_v38 = vpack.c.bf16 %v1418_v9, %v1410_v10  ;;  %v1423_v42 = vld [vmem:[#allocation9 + $0x620] sm:$0xff]  ;;  %v1425_v10 = vld [vmem:[#allocation9 + $0x630] sm:$0xff] }
 0x123   : > { %3342 = vmatpush1.bf16.msra.mxu0 %v5426_v27  ;;  %v1416_v27 = vld [vmem:[#allocation9 + $0x5e8] sm:$0xff]  ;;  %v1431_v55 = vld [vmem:[#allocation9 + $0x660] sm:$0xff] }
 0x124   : > { %3406 = vmatpush1.bf16.msra.mxu1 %v5430_v41  ;;  %3344 = vmatprep.subr.bf16.mxu0 %v5432_v48  ;;  %v5450_v41 = vpack.c.bf16 %v1399_v49, %v1391_v35  ;;  %6462 = vst [vmem:[#allocation122_spill] sm:$0xff] %v5454_v3  ;;  %v5456_v28 = vpack.c.bf16 %v1416_v27, %v1408_v23  ;;  %6464 = vst [vmem:[#allocation124_spill] sm:$0xff] %v5459_v38  ;;  %v1424_v48 = vld [vmem:[#allocation9 + $0x628] sm:$0xff]  ;;  %v1426_v35 = vld [vmem:[#allocation9 + $0x638] sm:$0xff] }
 0x125   : > { %3408 = vmatprep.subr.bf16.mxu1 %v5435_v25  ;;  %v1417_v25 = vld [vmem:[#allocation9 + $0x5f0] sm:$0xff]  ;;  %v1434_v49 = vld [vmem:[#allocation9 + $0x678] sm:$0xff] }
 0x126   : > { %6461 = vst [vmem:[#allocation121_spill] sm:$0xff] %v5450_v41  ;;  %6463 = vst [vmem:[#allocation123_spill] sm:$0xff] %v5456_v28  ;;  %v5466_v27 = vpack.c.bf16 %v1417_v25, %v1409_v37  ;;  %v5471_v9 = vpack.c.bf16 %v1434_v49, %v1426_v35  ;;  %v1439_v25 = vld [vmem:[#allocation9 + $0x6a0] sm:$0xff]  ;;  %v1441_v35 = vld [vmem:[#allocation9 + $0x6b0] sm:$0xff] }
 0x127   : > { %3346 = vmatpush1.bf16.msra.mxu0 %v5438_v40  ;;  %v1432_v40 = vld [vmem:[#allocation9 + $0x668] sm:$0xff]  ;;  %v1447_v37 = vld [vmem:[#allocation9 + $0x6e0] sm:$0xff] }
 0x128   : > { %3410 = vmatpush1.bf16.msra.mxu1 %v5442_v62  ;;  %3348 = vmatprep.subr.bf16.mxu0 %v5444_v50  ;;  %v5462_v62 = vpack.c.bf16 %v1415_v26, %v1407_v4  ;;  %6466 = vst [vmem:[#allocation126_spill] sm:$0xff] %v5466_v27  ;;  %v5468_v23 = vpack.c.bf16 %v1432_v40, %v1424_v48  ;;  %6468 = vst [vmem:[#allocation128_spill] sm:$0xff] %v5471_v9  ;;  %v1440_v50 = vld [vmem:[#allocation9 + $0x6a8] sm:$0xff]  ;;  %v1442_v4 = vld [vmem:[#allocation9 + $0x6b8] sm:$0xff] }
 0x129   : > { %3412 = vmatprep.subr.bf16.mxu1 %v5447_v1  ;;  %v1433_v1 = vld [vmem:[#allocation9 + $0x670] sm:$0xff]  ;;  %v1450_v26 = vld [vmem:[#allocation9 + $0x6f8] sm:$0xff] }
 0x12a   : > { %6465 = vst [vmem:[#allocation125_spill] sm:$0xff] %v5462_v62  ;;  %6467 = vst [vmem:[#allocation127_spill] sm:$0xff] %v5468_v23  ;;  %v5478_v40 = vpack.c.bf16 %v1433_v1, %v1425_v10  ;;  %v5483_v49 = vpack.c.bf16 %v1450_v26, %v1442_v4  ;;  %v1455_v1 = vld [vmem:[#allocation9 + $0x720] sm:$0xff]  ;;  %v1457_v4 = vld [vmem:[#allocation9 + $0x730] sm:$0xff] }
 0x12b   : > { %3350 = vmatpush1.bf16.msra.mxu0 %v5450_v41  ;;  %v1448_v41 = vld [vmem:[#allocation9 + $0x6e8] sm:$0xff]  ;;  %v1463_v10 = vld [vmem:[#allocation9 + $0x760] sm:$0xff] }
 0x12c   : > { %3414 = vmatpush1.bf16.msra.mxu1 %v5454_v3  ;;  %3352 = vmatprep.subr.bf16.mxu0 %v5456_v28  ;;  %v5474_v3 = vpack.c.bf16 %v1431_v55, %v1423_v42  ;;  %6470 = vst [vmem:[#allocation130_spill] sm:$0xff] %v5478_v40  ;;  %v5480_v48 = vpack.c.bf16 %v1448_v41, %v1440_v50  ;;  %6471 = vst [vmem:[#allocation131_spill] sm:$0xff] %v5483_v49  ;;  %v1456_v28 = vld [vmem:[#allocation9 + $0x728] sm:$0xff]  ;;  %v1458_v42 = vld [vmem:[#allocation9 + $0x738] sm:$0xff] }
 0x12d   : > { %3416 = vmatprep.subr.bf16.mxu1 %v5459_v38  ;;  %v1449_v38 = vld [vmem:[#allocation9 + $0x6f0] sm:$0xff]  ;;  %v1466_v55 = vld [vmem:[#allocation9 + $0x778] sm:$0xff] }
 0x12e   : > { %6469 = vst [vmem:[#allocation129_spill] sm:$0xff] %v5474_v3  ;;  %v5490_v41 = vpack.c.bf16 %v1449_v38, %v1441_v35  ;;  %v5495_v26 = vpack.c.bf16 %v1466_v55, %v1458_v42  ;;  %v1471_v38 = vld [vmem:[#allocation9 + $0x7a0] sm:$0xff]  ;;  %v1473_v55 = vld [vmem:[#allocation9 + $0x7b0] sm:$0xff] }
 0x12f   : > { %3354 = vmatpush1.bf16.msra.mxu0 %v5462_v62  ;;  %v1464_v62 = vld [vmem:[#allocation9 + $0x768] sm:$0xff]  ;;  %v1479_v35 = vld [vmem:[#allocation9 + $0x7e0] sm:$0xff] }
 0x130   : > { %3418 = vmatpush1.bf16.msra.mxu1 %v5466_v27  ;;  %3356 = vmatprep.subr.bf16.mxu0 %v5468_v23  ;;  %v5486_v27 = vpack.c.bf16 %v1447_v37, %v1439_v25  ;;  %v5492_v50 = vpack.c.bf16 %v1464_v62, %v1456_v28  ;;  %6472 = vst [vmem:[#allocation132_spill] sm:$0xff] %v5495_v26  ;;  %v1472_v23 = vld [vmem:[#allocation9 + $0x7a8] sm:$0xff]  ;;  %v1474_v25 = vld [vmem:[#allocation9 + $0x7b8] sm:$0xff] }
 0x131   : > { %3420 = vmatprep.subr.bf16.mxu1 %v5471_v9  ;;  %v1465_v9 = vld [vmem:[#allocation9 + $0x770] sm:$0xff]  ;;  %v1482_v37 = vld [vmem:[#allocation9 + $0x7f8] sm:$0xff] }
 0x132   : > { %v5502_v62 = vpack.c.bf16 %v1465_v9, %v1457_v4  ;;  %v5507_v42 = vpack.c.bf16 %v1482_v37, %v1474_v25  ;;  %v6484_v4 = vld [vmem:[#allocation62_spill] sm:$0xff]  ;;  %v6485_v25 = vld [vmem:[#allocation63_spill] sm:$0xff]  ;;  %v6486_v37 = vld [vmem:[#allocation64_spill] sm:$0xff] }
 0x133   : > { %3358 = vmatpush1.bf16.msra.mxu0 %v5474_v3  ;;  %v1480_v3 = vld [vmem:[#allocation9 + $0x7e8] sm:$0xff] }
 0x134   : > { %3422 = vmatpush1.bf16.msra.mxu1 %v5478_v40  ;;  %3360 = vmatprep.subr.bf16.mxu0 %v5480_v48  ;;  %v5498_v40 = vpack.c.bf16 %v1463_v10, %v1455_v1  ;;  %6474 = vst [vmem:[#allocation134_spill] sm:$0xff] %v5502_v62  ;;  %v5504_v28 = vpack.c.bf16 %v1480_v3, %v1472_v23  ;;  %6476 = vst [vmem:[#allocation136_spill] sm:$0xff] %v5507_v42  ;;  %v6480_v3 = vld [vmem:[#allocation58_spill] sm:$0xff]  ;;  %v6481_v23 = vld [vmem:[#allocation59_spill] sm:$0xff] }
 0x135   : > { %3424 = vmatprep.subr.bf16.mxu1 %v5483_v49  ;;  %v1481_v49 = vld [vmem:[#allocation9 + $0x7f0] sm:$0xff]  ;;  %v5510_v1 = vpack.c.bf16 %v1479_v35, %v1471_v38  ;;  %v6483_v10 = vld [vmem:[#allocation61_spill] sm:$0xff]  ;;  %v6488_v35 = vld [vmem:[#allocation66_spill] sm:$0xff] }
 0x136   : > { %6473 = vst [vmem:[#allocation133_spill] sm:$0xff] %v5498_v40  ;;  %6475 = vst [vmem:[#allocation135_spill] sm:$0xff] %v5504_v28  ;;  %v5514_v9 = vpack.c.bf16 %v1481_v49, %v1473_v55  ;;  %v6482_v49 = vld [vmem:[#allocation60_spill] sm:$0xff]  ;;  %v6487_v38 = vld [vmem:[#allocation65_spill] sm:$0xff] }
 0x137   : > { %3362 = vmatpush1.bf16.msra.mxu0 %v5486_v27  ;;  %6477 = vst [vmem:[#allocation137_spill] sm:$0xff] %v5510_v1  ;;  %v6489_v55 = vld [vmem:[#allocation67_spill] sm:$0xff] }
 0x138   : > { %3426 = vmatpush1.bf16.msra.mxu1 %v5490_v41  ;;  %3364 = vmatprep.subr.bf16.mxu0 %v5492_v50  ;;  %6478 = vst [vmem:[#allocation138_spill] sm:$0xff] %v5514_v9 }
 0x139   : > { %3428 = vmatprep.subr.bf16.mxu1 %v5495_v26 }
 0x13b   : > { %3366 = vmatpush1.bf16.msra.mxu0 %v5498_v40 }
 0x13c   : > { %3430 = vmatpush1.bf16.msra.mxu1 %v5502_v62  ;;  %3368 = vmatprep.subr.bf16.mxu0 %v5504_v28 }
 0x13d   : > { %3432 = vmatprep.subr.bf16.mxu1 %v5507_v42 }
 0x13f   : > { %3370 = vmatpush1.bf16.msra.mxu0 %v5510_v1 }
 0x140   : > { %3434 = vmatpush1.bf16.msra.mxu1 %v5514_v9  ;;  %3436 = vmatprep.subr.bf16.mxu0 %v5079_v45 }
 0x141   : > { %3500 = vmatprep.subr.bf16.mxu1 %v5083_v46 }
 0x142   : > { %1694 = vmatmul.mubr.f32.vlgmr.msra.gmra.mrb[8].mxu0 %v5324_v8 }
 0x143   : > { %1765 = vmatmul.mubr.f32.vlgmr.msra.gmra.mrb[8].mxu1 %v5324_v8  ;;  %3438 = vmatpush1.bf16.msra.mxu0 %v5108_v57  ;;  %v6479_v8 = vld [vmem:[#allocation57_spill] sm:$0xff] }
 0x144   : > { %3502 = vmatpush1.bf16.msra.mxu1 %v5111_v58  ;;  %3440 = vmatprep.subr.bf16.mxu0 %v5113_v59 }
 0x145   : > { %3504 = vmatprep.subr.bf16.mxu1 %v5115_v63 }
 0x147   : > { %3442 = vmatpush1.bf16.msra.mxu0 %v5122_v5 }
 0x148   : > { %3506 = vmatpush1.bf16.msra.mxu1 %v5126_v6  ;;  %3444 = vmatprep.subr.bf16.mxu0 %v5128_v7 }
 0x149   : > { %3508 = vmatprep.subr.bf16.mxu1 %v5131_v12 }
 0x14b   : > { %3446 = vmatpush1.bf16.msra.mxu0 %v5138_v18 }
 0x14c   : > { %3510 = vmatpush1.bf16.msra.mxu1 %v5144_v19  ;;  %3448 = vmatprep.subr.bf16.mxu0 %v5146_v20 }
 0x14d   : > { %3512 = vmatprep.subr.bf16.mxu1 %v5149_v24 }
 0x14f   : > { %3450 = vmatpush1.bf16.msra.mxu0 %v5156_v30 }
 0x150   : > { %3514 = vmatpush1.bf16.msra.mxu1 %v5162_v31  ;;  %3452 = vmatprep.subr.bf16.mxu0 %v5164_v32 }
 0x151   : > { %3516 = vmatprep.subr.bf16.mxu1 %v5167_v36 }
 0x153   : > { %3454 = vmatpush1.bf16.msra.mxu0 %v5176_v43 }
 0x154   : > { %3518 = vmatpush1.bf16.msra.mxu1 %v5182_v44  ;;  %3456 = vmatprep.subr.bf16.mxu0 %v5184_v47 }
 0x155   : > { %3520 = vmatprep.subr.bf16.mxu1 %v5187_v51 }
 0x157   : > { %3458 = vmatpush1.bf16.msra.mxu0 %v5192_v56 }
 0x158   : > { %3522 = vmatpush1.bf16.msra.mxu1 %v5196_v60  ;;  %3460 = vmatprep.subr.bf16.mxu0 %v5198_v61 }
 0x159   : > { %3524 = vmatprep.subr.bf16.mxu1 %v5201_v2 }
 0x15b   : > { %3462 = vmatpush1.bf16.msra.mxu0 %v5204_v13 }
 0x15c   : > { %3526 = vmatpush1.bf16.msra.mxu1 %v5208_v14  ;;  %3464 = vmatprep.subr.bf16.mxu0 %v5210_v15 }
 0x15d   : > { %3528 = vmatprep.subr.bf16.mxu1 %v5213_v22 }
 0x15f   : > { %3466 = vmatpush1.bf16.msra.mxu0 %v5216_v29 }
 0x160   : > { %3530 = vmatpush1.bf16.msra.mxu1 %v5220_v33  ;;  %3468 = vmatprep.subr.bf16.mxu0 %v5222_v34 }
 0x161   : > { %3532 = vmatprep.subr.bf16.mxu1 %v5225_v39 }
 0x163   : > { %3470 = vmatpush1.bf16.msra.mxu0 %v5228_v52 }
 0x164   : > { %3534 = vmatpush1.bf16.msra.mxu1 %v5232_v53  ;;  %3472 = vmatprep.subr.bf16.mxu0 %v5234_v54 }
 0x165   : > { %3536 = vmatprep.subr.bf16.mxu1 %v5237_v0 }
 0x167   : > { %3474 = vmatpush1.bf16.msra.mxu0 %v5240_v11 }
 0x168   : > { %3538 = vmatpush1.bf16.msra.mxu1 %v5244_v16  ;;  %3476 = vmatprep.subr.bf16.mxu0 %v5246_v17  ;;  %v414_v16 = vlaneseq }
 0x169   : > { %3540 = vmatprep.subr.bf16.mxu1 %v6479_v8  ;;  %v6490_v8 = vld [vmem:[#allocation68_spill] sm:$0xff] }
 0x16b   : > { %3478 = vmatpush1.bf16.msra.mxu0 %v6480_v3  ;;  %v6491_v3 = vld [vmem:[#allocation69_spill] sm:$0xff] }
 0x16c   : > { %3542 = vmatpush1.bf16.msra.mxu1 %v6481_v23  ;;  %3480 = vmatprep.subr.bf16.mxu0 %v6482_v49  ;;  %v6492_v23 = vld [vmem:[#allocation70_spill] sm:$0xff]  ;;  %v6493_v49 = vld [vmem:[#allocation71_spill] sm:$0xff] }
 0x16d   : > { %3544 = vmatprep.subr.bf16.mxu1 %v6483_v10  ;;  %v6494_v10 = vld [vmem:[#allocation72_spill] sm:$0xff] }
 0x16f   : > { %3482 = vmatpush1.bf16.msra.mxu0 %v6484_v4  ;;  %v6495_v4 = vld [vmem:[#allocation73_spill] sm:$0xff] }
 0x170   : > { %3546 = vmatpush1.bf16.msra.mxu1 %v6485_v25  ;;  %3484 = vmatprep.subr.bf16.mxu0 %v6486_v37  ;;  %v6496_v25 = vld [vmem:[#allocation74_spill] sm:$0xff]  ;;  %v6497_v37 = vld [vmem:[#allocation75_spill] sm:$0xff] }
 0x171   : > { %3548 = vmatprep.subr.bf16.mxu1 %v6487_v38  ;;  %v6498_v38 = vld [vmem:[#allocation76_spill] sm:$0xff] }
 0x173   : > { %3486 = vmatpush1.bf16.msra.mxu0 %v6488_v35  ;;  %v6499_v35 = vld [vmem:[#allocation77_spill] sm:$0xff] }
 0x174   : > { %3550 = vmatpush1.bf16.msra.mxu1 %v6489_v55  ;;  %3488 = vmatprep.subr.bf16.mxu0 %v6490_v8  ;;  %v6500_v55 = vld [vmem:[#allocation78_spill] sm:$0xff]  ;;  %v6501_v8 = vld [vmem:[#allocation79_spill] sm:$0xff] }
 0x175   : > { %3552 = vmatprep.subr.bf16.mxu1 %v6491_v3  ;;  %v6502_v3 = vld [vmem:[#allocation80_spill] sm:$0xff] }
 0x177   : > { %3490 = vmatpush1.bf16.msra.mxu0 %v6492_v23  ;;  %v6503_v23 = vld [vmem:[#allocation81_spill] sm:$0xff] }
 0x178   : > { %3554 = vmatpush1.bf16.msra.mxu1 %v6493_v49  ;;  %3492 = vmatprep.subr.bf16.mxu0 %v6494_v10 }
 0x179   : > { %3556 = vmatprep.subr.bf16.mxu1 %v6495_v4 }
 0x17b   : > { %3494 = vmatpush1.bf16.msra.mxu0 %v6496_v25  ;;  %v415_v25 = vshrl.u32 %v414_v16, 7 }
 0x17c   : > { %3558 = vmatpush1.bf16.msra.mxu1 %v6497_v37  ;;  %3496 = vmatprep.subr.bf16.mxu0 %v6498_v38  ;;  %v412_v38 = vld [vmem:[%s6120_s5] sm:$0xff] }
 0x17d   : > { %3560 = vmatprep.subr.bf16.mxu1 %v6499_v35  ;;  %v416_v11 = vsub.s32 0, %v415_v25  ;;  %v424_v35 = vsub.s32 2, %v415_v25  ;;  %v420_v37 = vsub.s32 1, %v415_v25  ;;  %v436_v22 = vsub.s32 5, %v415_v25 }
 0x17f   : > { %3498 = vmatpush1.bf16.msra.mxu0 %v6500_v55  ;;  %v428_v55 = vsub.s32 3, %v415_v25  ;;  %v5590_v0 = vrot.slane %v412_v38, %v416_v11 }
 0x180   : > { %3562 = vmatpush1.bf16.msra.mxu1 %v6501_v8  ;;  %3564 = vmatprep.subr.bf16.mxu0 %v6502_v3  ;;  %v5592_v8 = vrot.slane %v412_v38, %v424_v35  ;;  %v5594_v3 = vrot.slane %v412_v38, %v420_v37  ;;  %v432_v37 = vsub.s32 4, %v415_v25 }
 0x181   : > { %3628 = vmatprep.subr.bf16.mxu1 %v6503_v23  ;;  %6504 = vst [vmem:[#allocation139_spill] sm:$0xff] %v5590_v0  ;;  %v5596_v23 = vrot.slane %v412_v38, %v428_v55  ;;  %v440_v55 = vsub.s32 6, %v415_v25 }
 0x182   : > { %6505 = vst [vmem:[#allocation140_spill] sm:$0xff] %v5592_v8  ;;  %6506 = vst [vmem:[#allocation141_spill] sm:$0xff] %v5594_v3 }
 0x1d5   : > { %v1553_v49 = vpop.f32.mrb[0].mxu0 }
 0x1d6   : > { %v1624_v10 = vpop.f32.mrb[0].mxu1  ;;  %v1555_v17 = vpop.f32.mrb[1].mxu0  ;;  %v4203_v54 = vadd.f32 %v1553_v49, %v5590_v0  ;;  %v444_v0 = vsub.s32 7, %v415_v25 }
 0x1d7   : > { %v1626_v4 = vpop.f32.mrb[1].mxu1  ;;  %v4211_v16 = vadd.f32 %v1624_v10, %v5592_v8  ;;  %v4204_v53 = vadd.f32 %v1555_v17, %v5594_v3  ;;  %v5602_v3 = vrot.slane %v412_v38, %v432_v37 }
 0x1d8   : > { %v4212_v52 = vadd.f32 %v1626_v4, %v5596_v23  ;;  %v3081_v39 = vmul.f32 -1.442695, %v4203_v54  ;;  %v5604_v4 = vrot.slane %v412_v38, %v440_v55 }
 0x1d9   : > { %v3083_v34 = vmul.f32 -1.442695, %v4211_v16  ;;  %v3082_v33 = vmul.f32 -1.442695, %v4204_v53 }
 0x1da   : > { %v3084_v29 = vmul.f32 -1.442695, %v4212_v52  ;;  %4404 = vpow2.f32 %v3081_v39  ;;  %v5606_v52 = vrot.slane %v412_v38, %v436_v22 }
 0x1db   : > { %4406 = vpow2.f32 %v3083_v34 }
 0x1dc   : > { %4408 = vpow2.f32 %v3082_v33  ;;  %6507 = vst [vmem:[#allocation142_spill] sm:$0xff] %v5606_v52  ;;  %v5608_v33 = vrot.slane %v412_v38, %v444_v0 }
 0x1dd   : > { %4410 = vpow2.f32 %v3084_v29 }
 0x1e4   : > { %v4405_v11 = vpop.eup %4404 }
 0x1e5   : > { %v4407_v35 = vpop.eup %4406  ;;  %v1797_v8 = vadd.f32 1.0, %v4405_v11 }
 0x1e6   : > { %v4409_v49 = vpop.eup %4408  ;;  %v1799_v17 = vadd.f32 1.0, %v4407_v35 }
 0x1e7   : > { %v4411_v10 = vpop.eup %4410  ;;  %v1798_v54 = vadd.f32 1.0, %v4409_v49  ;;  %4412 = vrcp.f32 %v1797_v8  ;;  %v1485_v49 = vld [vmem:[#allocation3] sm:$0xff] }
 0x1e8   : > { %v1800_v34 = vadd.f32 1.0, %v4411_v10  ;;  %4414 = vrcp.f32 %v1799_v17 }
 0x1e9   : > { %4416 = vrcp.f32 %v1798_v54 }
 0x1ea   : > { %4418 = vrcp.f32 %v1800_v34 }
 0x1f1   : > { %v4413_v8 = vpop.eup %4412 }
 0x1f2   : > { %v4415_v38 = vpop.eup %4414 }
 0x1f3   : > { %v4417_v55 = vpop.eup %4416 }
 0x1f4   : > { %v4419_v10 = vpop.eup %4418 }
 0x215   : > { %v1695_v29 = vpop.f32.mrb[8].mxu0 }
 0x216   : > { %v4219_v39 = vadd.f32 %v1695_v29, %v5602_v3  ;;  %v1766_v53 = vpop.f32.mrb[8].mxu1  ;;  %v1697_v25 = vpop.f32.mrb[9].mxu0  ;;  %v1817_v29 = vmul.f32 %v4415_v38, %v1485_v49 }
 0x217   : > { %v4227_v16 = vadd.f32 %v1766_v53, %v5604_v4  ;;  %v4220_v11 = vadd.f32 %v1697_v25, %v5606_v52  ;;  %v1768_v37 = vpop.f32.mrb[9].mxu1  ;;  %v1486_v53 = vld [vmem:[#allocation3 + $0x8] sm:$0xff] }
 0x218   : > { %v3085_v35 = vmul.f32 -1.442695, %v4219_v39  ;;  %v4228_v22 = vadd.f32 %v1768_v37, %v5608_v33 }
 0x219   : > { %4420 = vtanh.f32 %v4227_v16  ;;  %v3086_v0 = vmul.f32 -1.442695, %v4220_v11  ;;  %v1818_v11 = vmul.f32 %v4419_v10, %v1486_v53  ;;  %v6509_v10 = vld [vmem:[#allocation83_spill] sm:$0xff]  ;;  %v6512_v53 = vld [vmem:[#allocation86_spill] sm:$0xff] }
 0x21a   : > { %4422 = vpow2.f32 %v3085_v35 }
 0x21b   : > { %4424 = vpow2.f32 %v3086_v0 }
 0x21c   : > { %4426 = vtanh.f32 %v4228_v22 }
 0x223   : > { %v4421_v17 = vpop.eup %4420 }
 0x224   : > { %v4423_v54 = vpop.eup %4422  ;;  %v1819_v25 = vmul.f32 %v4421_v17, %v4413_v8 }
 0x225   : > { %v4425_v52 = vpop.eup %4424  ;;  %v1801_v34 = vadd.f32 1.0, %v4423_v54  ;;  %v6510_v54 = vld [vmem:[#allocation84_spill] sm:$0xff] }
 0x226   : > { %v4427_v39 = vpop.eup %4426  ;;  %v5614_v37 = vadd.f32 %v1819_v25, %v1817_v29  ;;  %v1802_v16 = vadd.f32 1.0, %v4425_v52  ;;  %v6511_v29 = vld [vmem:[#allocation85_spill] sm:$0xff]  ;;  %v6513_v25 = vld [vmem:[#allocation87_spill] sm:$0xff] }
 0x227   : > { %4428 = vrcp.f32 %v1801_v34  ;;  %v1820_v35 = vmul.f32 %v4427_v39, %v4417_v55  ;;  %v6508_v55 = vld [vmem:[#allocation82_spill] sm:$0xff]  ;;  %v6514_v34 = vld [vmem:[#allocation88_spill] sm:$0xff]  ;;  %v6515_v39 = vld [vmem:[#allocation89_spill] sm:$0xff] }
 0x228   : > { %4430 = vtanh.f32 %v5614_v37 }
 0x229   : > { %4432 = vrcp.f32 %v1802_v16  ;;  %v5617_v22 = vadd.f32 %v1820_v35, %v1818_v11  ;;  %v6516_v16 = vld [vmem:[#allocation90_spill] sm:$0xff]  ;;  %v6517_v11 = vld [vmem:[#allocation91_spill] sm:$0xff]  ;;  %v6518_v35 = vld [vmem:[#allocation92_spill] sm:$0xff] }
 0x22b   : > { %4434 = vtanh.f32 %v5617_v22 }
 0x231   : > { %v4429_v0 = vpop.eup %4428 }
 0x232   : > { %v4431_v8 = vpop.eup %4430 }
 0x233   : > { %v4433_v38 = vpop.eup %4432  ;;  %v5620_v49 = vmul.f32 %v4431_v8, %v4429_v0  ;;  %v6519_v0 = vld [vmem:[#allocation93_spill] sm:$0xff]  ;;  %v6520_v8 = vld [vmem:[#allocation94_spill] sm:$0xff] }
 0x235   : > { %v4435_v17 = vpop.eup %4434  ;;  %1827 = vst [vmem:[%s5011_s18] sm:$0xff] %v5620_v49 }
 0x236   : > { %v1826_v52 = vmul.f32 %v4435_v17, %v4433_v38  ;;  %v6521_v38 = vld [vmem:[#allocation95_spill] sm:$0xff]  ;;  %v6522_v17 = vld [vmem:[#allocation96_spill] sm:$0xff] }
 0x238   : > { %1893 = vmatprep.mubr.f32.mxu0 %v1826_v52  ;;  %1828 = vst [vmem:[%s5013_s24 + $0x18] sm:$0xff] %v1826_v52  ;;  %1964 = vmatprep.mubr.f32.mxu1 %v1826_v52 }
 0x239   : > { %1894 = vmatmul.mubr.f32.vlgmr.msra.gmra.mrb[2].mxu0 %v5620_v49  ;;  %1965 = vmatmul.mubr.f32.vlgmr.msra.gmra.mrb[2].mxu1 %v5620_v49 }
 0x23a   : > { %3566 = vmatpush1.bf16.msra.mxu0 %v6508_v55  ;;  %3630 = vmatpush1.bf16.msra.mxu1 %v5330_v21 }
 0x23b   : > { %2035 = vmatprep.mubr.f32.mxu0 %v1826_v52  ;;  %2106 = vmatprep.mubr.f32.mxu1 %v1826_v52  ;;  %v6523_v52 = vld [vmem:[#allocation97_spill] sm:$0xff] }
 0x23c   : > { %3568 = vmatprep.subr.bf16.mxu0 %v6509_v10  ;;  %3632 = vmatprep.subr.bf16.mxu1 %v6510_v54 }
 0x23e   : > { %3570 = vmatpush1.bf16.msra.mxu0 %v6511_v29  ;;  %3634 = vmatpush1.bf16.msra.mxu1 %v6512_v53 }
 0x23f   : > { %3572 = vmatprep.subr.bf16.mxu0 %v6513_v25  ;;  %3636 = vmatprep.subr.bf16.mxu1 %v6514_v34  ;;  %v6524_v25 = vld [vmem:[#allocation98_spill] sm:$0xff]  ;;  %v6525_v34 = vld [vmem:[#allocation99_spill] sm:$0xff] }
 0x242   : > { %3574 = vmatpush1.bf16.msra.mxu0 %v6515_v39  ;;  %3638 = vmatpush1.bf16.msra.mxu1 %v6516_v16  ;;  %v6526_v39 = vld [vmem:[#allocation100_spill] sm:$0xff]  ;;  %v6527_v16 = vld [vmem:[#allocation101_spill] sm:$0xff] }
 0x243   : > { %3576 = vmatprep.subr.bf16.mxu0 %v6517_v11  ;;  %3640 = vmatprep.subr.bf16.mxu1 %v6518_v35  ;;  %v6528_v11 = vld [vmem:[#allocation102_spill] sm:$0xff]  ;;  %v6529_v35 = vld [vmem:[#allocation103_spill] sm:$0xff] }
 0x246   : > { %3578 = vmatpush1.bf16.msra.mxu0 %v6519_v0  ;;  %3642 = vmatpush1.bf16.msra.mxu1 %v6520_v8  ;;  %v6530_v0 = vld [vmem:[#allocation104_spill] sm:$0xff]  ;;  %v6531_v8 = vld [vmem:[#allocation105_spill] sm:$0xff] }
 0x247   : > { %3580 = vmatprep.subr.bf16.mxu0 %v6521_v38  ;;  %3644 = vmatprep.subr.bf16.mxu1 %v6522_v17  ;;  %v6532_v38 = vld [vmem:[#allocation106_spill] sm:$0xff]  ;;  %v6533_v17 = vld [vmem:[#allocation107_spill] sm:$0xff] }
 0x24a   : > { %3582 = vmatpush1.bf16.msra.mxu0 %v6523_v52  ;;  %3646 = vmatpush1.bf16.msra.mxu1 %v6524_v25  ;;  %v6534_v52 = vld [vmem:[#allocation108_spill] sm:$0xff]  ;;  %v6535_v25 = vld [vmem:[#allocation109_spill] sm:$0xff] }
 0x24b   : > { %3584 = vmatprep.subr.bf16.mxu0 %v6525_v34  ;;  %3648 = vmatprep.subr.bf16.mxu1 %v6526_v39  ;;  %v6536_v34 = vld [vmem:[#allocation110_spill] sm:$0xff]  ;;  %v6537_v39 = vld [vmem:[#allocation111_spill] sm:$0xff] }
 0x24e   : > { %3586 = vmatpush1.bf16.msra.mxu0 %v6527_v16  ;;  %3650 = vmatpush1.bf16.msra.mxu1 %v6528_v11  ;;  %v6538_v16 = vld [vmem:[#allocation112_spill] sm:$0xff]  ;;  %v6539_v11 = vld [vmem:[#allocation113_spill] sm:$0xff] }
 0x24f   : > { %3588 = vmatprep.subr.bf16.mxu0 %v6529_v35  ;;  %3652 = vmatprep.subr.bf16.mxu1 %v6530_v0  ;;  %v6540_v35 = vld [vmem:[#allocation114_spill] sm:$0xff]  ;;  %v6541_v0 = vld [vmem:[#allocation115_spill] sm:$0xff] }
 0x252   : > { %3590 = vmatpush1.bf16.msra.mxu0 %v6531_v8  ;;  %3654 = vmatpush1.bf16.msra.mxu1 %v6532_v38  ;;  %v6542_v8 = vld [vmem:[#allocation116_spill] sm:$0xff]  ;;  %v6543_v38 = vld [vmem:[#allocation117_spill] sm:$0xff] }
 0x253   : > { %3592 = vmatprep.subr.bf16.mxu0 %v6533_v17  ;;  %3656 = vmatprep.subr.bf16.mxu1 %v6534_v52  ;;  %v6544_v17 = vld [vmem:[#allocation118_spill] sm:$0xff]  ;;  %v6545_v52 = vld [vmem:[#allocation119_spill] sm:$0xff] }
 0x256   : > { %3594 = vmatpush1.bf16.msra.mxu0 %v6535_v25  ;;  %3658 = vmatpush1.bf16.msra.mxu1 %v6536_v34  ;;  %v6546_v25 = vld [vmem:[#allocation120_spill] sm:$0xff]  ;;  %v6547_v34 = vld [vmem:[#allocation121_spill] sm:$0xff] }
 0x257   : > { %3596 = vmatprep.subr.bf16.mxu0 %v6537_v39  ;;  %3660 = vmatprep.subr.bf16.mxu1 %v6538_v16  ;;  %v6548_v39 = vld [vmem:[#allocation122_spill] sm:$0xff]  ;;  %v6549_v16 = vld [vmem:[#allocation123_spill] sm:$0xff] }
 0x25a   : > { %3598 = vmatpush1.bf16.msra.mxu0 %v6539_v11  ;;  %3662 = vmatpush1.bf16.msra.mxu1 %v6540_v35  ;;  %v6550_v11 = vld [vmem:[#allocation124_spill] sm:$0xff]  ;;  %v6551_v35 = vld [vmem:[#allocation125_spill] sm:$0xff] }
 0x25b   : > { %3600 = vmatprep.subr.bf16.mxu0 %v6541_v0  ;;  %3664 = vmatprep.subr.bf16.mxu1 %v6542_v8  ;;  %v6552_v0 = vld [vmem:[#allocation126_spill] sm:$0xff]  ;;  %v6553_v8 = vld [vmem:[#allocation127_spill] sm:$0xff] }
 0x25e   : > { %3602 = vmatpush1.bf16.msra.mxu0 %v6543_v38  ;;  %3666 = vmatpush1.bf16.msra.mxu1 %v6544_v17  ;;  %v6554_v38 = vld [vmem:[#allocation128_spill] sm:$0xff]  ;;  %v6555_v17 = vld [vmem:[#allocation129_spill] sm:$0xff] }
 0x25f   : > { %3604 = vmatprep.subr.bf16.mxu0 %v6545_v52  ;;  %3668 = vmatprep.subr.bf16.mxu1 %v6546_v25  ;;  %v6556_v52 = vld [vmem:[#allocation130_spill] sm:$0xff] }
 0x262   : > { %3606 = vmatpush1.bf16.msra.mxu0 %v6547_v34  ;;  %3670 = vmatpush1.bf16.msra.mxu1 %v6548_v39  ;;  %v6557_v34 = vld [vmem:[#allocation131_spill] sm:$0xff] }
 0x263   : > { %3608 = vmatprep.subr.bf16.mxu0 %v6549_v16  ;;  %3672 = vmatprep.subr.bf16.mxu1 %v6550_v11 }
 0x266   : > { %3610 = vmatpush1.bf16.msra.mxu0 %v6551_v35  ;;  %3674 = vmatpush1.bf16.msra.mxu1 %v6552_v0 }
 0x267   : > { %3612 = vmatprep.subr.bf16.mxu0 %v6553_v8  ;;  %3676 = vmatprep.subr.bf16.mxu1 %v6554_v38 }
 0x26a   : > { %3614 = vmatpush1.bf16.msra.mxu0 %v6555_v17  ;;  %3678 = vmatpush1.bf16.msra.mxu1 %v6556_v52 }
 0x26b   : > { %3616 = vmatprep.subr.bf16.mxu0 %v5480_v48  ;;  %3680 = vmatprep.subr.bf16.mxu1 %v6557_v34 }
 0x26e   : > { %3618 = vmatpush1.bf16.msra.mxu0 %v5486_v27  ;;  %3682 = vmatpush1.bf16.msra.mxu1 %v5490_v41 }
 0x26f   : > { %3620 = vmatprep.subr.bf16.mxu0 %v5492_v50  ;;  %3684 = vmatprep.subr.bf16.mxu1 %v5495_v26 }
 0x272   : > { %3622 = vmatpush1.bf16.msra.mxu0 %v5498_v40  ;;  %3686 = vmatpush1.bf16.msra.mxu1 %v5502_v62 }
 0x273   : > { %3624 = vmatprep.subr.bf16.mxu0 %v5504_v28  ;;  %3688 = vmatprep.subr.bf16.mxu1 %v5507_v42 }
 0x276   : > { %3626 = vmatpush1.bf16.msra.mxu0 %v5510_v1  ;;  %3690 = vmatpush1.bf16.msra.mxu1 %v5514_v9 }
 0x277   : > { %3692 = vmatprep.subr.bf16.mxu0 %v5079_v45  ;;  %3756 = vmatprep.subr.bf16.mxu1 %v5083_v46 }
 0x279   : > { %2036 = vmatmul.mubr.f32.vlgmr.msra.gmra.mrb[10].mxu0 %v5620_v49  ;;  %2107 = vmatmul.mubr.f32.vlgmr.msra.gmra.mrb[10].mxu1 %v5620_v49  ;;  %v6558_v49 = vld [vmem:[#allocation45_spill] sm:$0xff] }
 0x27a   : > { %3694 = vmatpush1.bf16.msra.mxu0 %v5108_v57  ;;  %3758 = vmatpush1.bf16.msra.mxu1 %v5111_v58 }
 0x27b   : > { %3696 = vmatprep.subr.bf16.mxu0 %v5113_v59  ;;  %3760 = vmatprep.subr.bf16.mxu1 %v5115_v63 }
 0x27e   : > { %3698 = vmatpush1.bf16.msra.mxu0 %v5122_v5  ;;  %3762 = vmatpush1.bf16.msra.mxu1 %v5126_v6 }
 0x27f   : > { %3700 = vmatprep.subr.bf16.mxu0 %v5128_v7  ;;  %3764 = vmatprep.subr.bf16.mxu1 %v5131_v12 }
 0x282   : > { %3702 = vmatpush1.bf16.msra.mxu0 %v5138_v18  ;;  %3766 = vmatpush1.bf16.msra.mxu1 %v5144_v19 }
 0x283   : > { %3704 = vmatprep.subr.bf16.mxu0 %v5146_v20  ;;  %3768 = vmatprep.subr.bf16.mxu1 %v5149_v24 }
 0x286   : > { %3706 = vmatpush1.bf16.msra.mxu0 %v5156_v30  ;;  %3770 = vmatpush1.bf16.msra.mxu1 %v5162_v31  ;;  %v6597_v31 = vld [vmem:[#allocation141_spill] sm:$0xff] }
 0x287   : > { %3708 = vmatprep.subr.bf16.mxu0 %v5164_v32  ;;  %3772 = vmatprep.subr.bf16.mxu1 %v5167_v36  ;;  %v6595_v36 = vld [vmem:[#allocation139_spill] sm:$0xff]  ;;  %v6596_v32 = vld [vmem:[#allocation140_spill] sm:$0xff] }
 0x28a   : > { %3710 = vmatpush1.bf16.msra.mxu0 %v5176_v43  ;;  %3774 = vmatpush1.bf16.msra.mxu1 %v5182_v44  ;;  %v6559_v44 = vld [vmem:[#allocation46_spill] sm:$0xff] }
 0x28b   : > { %3712 = vmatprep.subr.bf16.mxu0 %v5184_v47  ;;  %3776 = vmatprep.subr.bf16.mxu1 %v5187_v51  ;;  %v6560_v47 = vld [vmem:[#allocation47_spill] sm:$0xff]  ;;  %v6561_v51 = vld [vmem:[#allocation48_spill] sm:$0xff] }
 0x28e   : > { %3714 = vmatpush1.bf16.msra.mxu0 %v5192_v56  ;;  %3778 = vmatpush1.bf16.msra.mxu1 %v5196_v60  ;;  %v6562_v56 = vld [vmem:[#allocation49_spill] sm:$0xff]  ;;  %v6563_v60 = vld [vmem:[#allocation50_spill] sm:$0xff] }
 0x28f   : > { %3716 = vmatprep.subr.bf16.mxu0 %v5198_v61  ;;  %3780 = vmatprep.subr.bf16.mxu1 %v5201_v2  ;;  %v6564_v61 = vld [vmem:[#allocation51_spill] sm:$0xff]  ;;  %v6565_v2 = vld [vmem:[#allocation52_spill] sm:$0xff] }
 0x292   : > { %3718 = vmatpush1.bf16.msra.mxu0 %v5204_v13  ;;  %3782 = vmatpush1.bf16.msra.mxu1 %v5208_v14  ;;  %v6566_v13 = vld [vmem:[#allocation53_spill] sm:$0xff]  ;;  %v6567_v14 = vld [vmem:[#allocation54_spill] sm:$0xff] }
 0x293   : > { %3720 = vmatprep.subr.bf16.mxu0 %v5210_v15  ;;  %3784 = vmatprep.subr.bf16.mxu1 %v6558_v49  ;;  %v6568_v15 = vld [vmem:[#allocation55_spill] sm:$0xff]  ;;  %v6569_v49 = vld [vmem:[#allocation56_spill] sm:$0xff] }
 0x296   : > { %3722 = vmatpush1.bf16.msra.mxu0 %v6559_v44  ;;  %3786 = vmatpush1.bf16.msra.mxu1 %v6560_v47  ;;  %v6570_v44 = vld [vmem:[#allocation57_spill] sm:$0xff]  ;;  %v6571_v47 = vld [vmem:[#allocation58_spill] sm:$0xff] }
 0x297   : > { %3724 = vmatprep.subr.bf16.mxu0 %v6561_v51  ;;  %3788 = vmatprep.subr.bf16.mxu1 %v6562_v56  ;;  %v6572_v51 = vld [vmem:[#allocation59_spill] sm:$0xff]  ;;  %v6573_v56 = vld [vmem:[#allocation60_spill] sm:$0xff] }
 0x29a   : > { %3726 = vmatpush1.bf16.msra.mxu0 %v6563_v60  ;;  %3790 = vmatpush1.bf16.msra.mxu1 %v6564_v61  ;;  %v6574_v60 = vld [vmem:[#allocation61_spill] sm:$0xff]  ;;  %v6575_v61 = vld [vmem:[#allocation62_spill] sm:$0xff] }
 0x29b   : > { %3728 = vmatprep.subr.bf16.mxu0 %v6565_v2  ;;  %3792 = vmatprep.subr.bf16.mxu1 %v6566_v13  ;;  %v6576_v2 = vld [vmem:[#allocation63_spill] sm:$0xff]  ;;  %v6577_v13 = vld [vmem:[#allocation64_spill] sm:$0xff] }
 0x29e   : > { %3730 = vmatpush1.bf16.msra.mxu0 %v6567_v14  ;;  %3794 = vmatpush1.bf16.msra.mxu1 %v6568_v15  ;;  %v6578_v14 = vld [vmem:[#allocation65_spill] sm:$0xff]  ;;  %v6579_v15 = vld [vmem:[#allocation66_spill] sm:$0xff] }
 0x29f   : > { %3732 = vmatprep.subr.bf16.mxu0 %v6569_v49  ;;  %3796 = vmatprep.subr.bf16.mxu1 %v6570_v44  ;;  %v6580_v49 = vld [vmem:[#allocation67_spill] sm:$0xff]  ;;  %v6581_v44 = vld [vmem:[#allocation68_spill] sm:$0xff] }
 0x2a2   : > { %3734 = vmatpush1.bf16.msra.mxu0 %v6571_v47  ;;  %3798 = vmatpush1.bf16.msra.mxu1 %v6572_v51  ;;  %v6582_v47 = vld [vmem:[#allocation69_spill] sm:$0xff]  ;;  %v6583_v51 = vld [vmem:[#allocation70_spill] sm:$0xff] }
 0x2a3   : > { %3736 = vmatprep.subr.bf16.mxu0 %v6573_v56  ;;  %3800 = vmatprep.subr.bf16.mxu1 %v6574_v60  ;;  %v6584_v56 = vld [vmem:[#allocation71_spill] sm:$0xff]  ;;  %v6585_v60 = vld [vmem:[#allocation72_spill] sm:$0xff] }
 0x2a6   : > { %3738 = vmatpush1.bf16.msra.mxu0 %v6575_v61  ;;  %3802 = vmatpush1.bf16.msra.mxu1 %v6576_v2  ;;  %v6586_v61 = vld [vmem:[#allocation73_spill] sm:$0xff]  ;;  %v6587_v2 = vld [vmem:[#allocation74_spill] sm:$0xff] }
 0x2a7   : > { %3740 = vmatprep.subr.bf16.mxu0 %v6577_v13  ;;  %3804 = vmatprep.subr.bf16.mxu1 %v6578_v14  ;;  %v6588_v13 = vld [vmem:[#allocation75_spill] sm:$0xff]  ;;  %v6589_v14 = vld [vmem:[#allocation76_spill] sm:$0xff] }
 0x2aa   : > { %3742 = vmatpush1.bf16.msra.mxu0 %v6579_v15  ;;  %3806 = vmatpush1.bf16.msra.mxu1 %v6580_v49  ;;  %v6590_v15 = vld [vmem:[#allocation77_spill] sm:$0xff]  ;;  %v6591_v49 = vld [vmem:[#allocation78_spill] sm:$0xff] }
 0x2ab   : > { %3744 = vmatprep.subr.bf16.mxu0 %v6581_v44  ;;  %3808 = vmatprep.subr.bf16.mxu1 %v6582_v47  ;;  %v6592_v44 = vld [vmem:[#allocation79_spill] sm:$0xff]  ;;  %v6593_v47 = vld [vmem:[#allocation80_spill] sm:$0xff] }
 0x2ae   : > { %3746 = vmatpush1.bf16.msra.mxu0 %v6583_v51  ;;  %3810 = vmatpush1.bf16.msra.mxu1 %v6584_v56  ;;  %v6594_v51 = vld [vmem:[#allocation81_spill] sm:$0xff] }
 0x2af   : > { %3748 = vmatprep.subr.bf16.mxu0 %v6585_v60  ;;  %3812 = vmatprep.subr.bf16.mxu1 %v6586_v61 }
 0x2b2   : > { %3750 = vmatpush1.bf16.msra.mxu0 %v6587_v2  ;;  %3814 = vmatpush1.bf16.msra.mxu1 %v6588_v13 }
 0x2b3   : > { %3752 = vmatprep.subr.bf16.mxu0 %v6589_v14  ;;  %3816 = vmatprep.subr.bf16.mxu1 %v6590_v15 }
 0x2b6   : > { %3754 = vmatpush1.bf16.msra.mxu0 %v6591_v49  ;;  %3818 = vmatpush1.bf16.msra.mxu1 %v6592_v44 }
 0x2b7   : > { %3820 = vmatprep.subr.bf16.mxu0 %v6593_v47  ;;  %3884 = vmatprep.subr.bf16.mxu1 %v6594_v51 }
 0x30c   : > { %v1895_v56 = vpop.f32.mrb[2].mxu0  ;;  %v1966_v60 = vpop.f32.mrb[2].mxu1 }
 0x30d   : > { %v1897_v43 = vpop.f32.mrb[3].mxu0  ;;  %v1968_v61 = vpop.f32.mrb[3].mxu1  ;;  %v4205_v2 = vadd.f32 %v1895_v56, %v6595_v36  ;;  %v4213_v13 = vadd.f32 %v1966_v60, %v6596_v32 }
 0x30e   : > { %v4206_v14 = vadd.f32 %v1897_v43, %v6597_v31  ;;  %v4214_v15 = vadd.f32 %v1968_v61, %v5596_v23 }
 0x30f   : > { %v3087_v30 = vmul.f32 -1.442695, %v4205_v2  ;;  %v3089_v49 = vmul.f32 -1.442695, %v4213_v13 }
 0x310   : > { %v3088_v24 = vmul.f32 -1.442695, %v4206_v14  ;;  %v3090_v44 = vmul.f32 -1.442695, %v4214_v15 }
 0x311   : > { %4436 = vpow2.f32 %v3087_v30 }
 0x312   : > { %4438 = vpow2.f32 %v3089_v49 }
 0x313   : > { %4440 = vpow2.f32 %v3088_v24 }
 0x314   : > { %4442 = vpow2.f32 %v3090_v44  ;;  %v6598_v44 = vld [vmem:[#allocation142_spill] sm:$0xff] }
 0x31b   : > { %v4437_v51 = vpop.eup %4436 }
 0x31c   : > { %v4439_v47 = vpop.eup %4438  ;;  %v2139_v18 = vadd.f32 1.0, %v4437_v51 }
 0x31d   : > { %v4441_v20 = vpop.eup %4440  ;;  %v2141_v56 = vadd.f32 1.0, %v4439_v47 }
 0x31e   : > { %v4443_v19 = vpop.eup %4442  ;;  %v2140_v36 = vadd.f32 1.0, %v4441_v20  ;;  %4444 = vrcp.f32 %v2139_v18 }
 0x31f   : > { %v2142_v60 = vadd.f32 1.0, %v4443_v19  ;;  %4446 = vrcp.f32 %v2141_v56 }
 0x320   : > { %4448 = vrcp.f32 %v2140_v36 }
 0x321   : > { %4450 = vrcp.f32 %v2142_v60 }
 0x328   : > { %v4445_v18 = vpop.eup %4444 }
 0x329   : > { %v4447_v19 = vpop.eup %4446 }
 0x32a   : > { %v4449_v36 = vpop.eup %4448 }
 0x32b   : > { %v4451_v47 = vpop.eup %4450 }
 0x34c   : > { %v2037_v43 = vpop.f32.mrb[10].mxu0  ;;  %v2108_v61 = vpop.f32.mrb[10].mxu1 }
 0x34d   : > { %v4221_v2 = vadd.f32 %v2037_v43, %v5602_v3  ;;  %v4229_v30 = vadd.f32 %v2108_v61, %v5604_v4  ;;  %v2039_v13 = vpop.f32.mrb[11].mxu0  ;;  %v2110_v24 = vpop.f32.mrb[11].mxu1  ;;  %v2159_v43 = vmul.f32 %v4447_v19, %v5614_v37 }
 0x34e   : > { %v4222_v14 = vadd.f32 %v2039_v13, %v6598_v44  ;;  %v4230_v15 = vadd.f32 %v2110_v24, %v5608_v33  ;;  %v2160_v13 = vmul.f32 %v4451_v47, %v5617_v22  ;;  %v6601_v47 = vld [vmem:[#allocation89_spill] sm:$0xff] }
 0x34f   : > { %v3091_v51 = vmul.f32 -1.442695, %v4221_v2  ;;  %4452 = vtanh.f32 %v4229_v30 }
 0x350   : > { %v3092_v20 = vmul.f32 -1.442695, %v4222_v14  ;;  %4454 = vtanh.f32 %v4230_v15 }
 0x351   : > { %4456 = vpow2.f32 %v3091_v51 }
 0x352   : > { %4458 = vpow2.f32 %v3092_v20 }
 0x359   : > { %v4453_v49 = vpop.eup %4452 }
 0x35a   : > { %v4455_v56 = vpop.eup %4454  ;;  %v2161_v61 = vmul.f32 %v4453_v49, %v4445_v18  ;;  %v6602_v49 = vld [vmem:[#allocation90_spill] sm:$0xff] }
 0x35b   : > { %v4457_v60 = vpop.eup %4456  ;;  %v2162_v44 = vmul.f32 %v4455_v56, %v4449_v36  ;;  %v6600_v36 = vld [vmem:[#allocation88_spill] sm:$0xff]  ;;  %v6603_v56 = vld [vmem:[#allocation91_spill] sm:$0xff] }
 0x35c   : > { %v4459_v2 = vpop.eup %4458  ;;  %v2143_v30 = vadd.f32 1.0, %v4457_v60  ;;  %v5767_v24 = vadd.f32 %v2161_v61, %v2159_v43  ;;  %v6604_v43 = vld [vmem:[#allocation92_spill] sm:$0xff]  ;;  %v6605_v61 = vld [vmem:[#allocation93_spill] sm:$0xff]  ;;  %v6606_v60 = vld [vmem:[#allocation94_spill] sm:$0xff] }
 0x35d   : > { %v2144_v14 = vadd.f32 1.0, %v4459_v2  ;;  %v5769_v15 = vadd.f32 %v2162_v44, %v2160_v13  ;;  %v6599_v44 = vld [vmem:[#allocation87_spill] sm:$0xff]  ;;  %v6608_v2 = vld [vmem:[#allocation96_spill] sm:$0xff] }
 0x35e   : > { %4460 = vrcp.f32 %v2143_v30  ;;  %v6607_v13 = vld [vmem:[#allocation95_spill] sm:$0xff]  ;;  %v6609_v30 = vld [vmem:[#allocation97_spill] sm:$0xff] }
 0x35f   : > { %4462 = vtanh.f32 %v5767_v24 }
 0x360   : > { %4464 = vrcp.f32 %v2144_v14  ;;  %v6610_v14 = vld [vmem:[#allocation98_spill] sm:$0xff] }
 0x361   : > { %4466 = vtanh.f32 %v5769_v15 }
 0x368   : > { %v4461_v37 = vpop.eup %4460 }
 0x369   : > { %v4463_v51 = vpop.eup %4462 }
 0x36a   : > { %v4465_v20 = vpop.eup %4464  ;;  %v5773_v22 = vmul.f32 %v4463_v51, %v4461_v37  ;;  %v6611_v37 = vld [vmem:[#allocation99_spill] sm:$0xff]  ;;  %v6612_v51 = vld [vmem:[#allocation100_spill] sm:$0xff] }
 0x36b   : > { %v4467_v18 = vpop.eup %4466 }
 0x36c   : > { %v2168_v19 = vmul.f32 %v4467_v18, %v4465_v20  ;;  %2169 = vst [vmem:[%s5011_s18 + $0x8] sm:$0xff] %v5773_v22  ;;  %v6613_v20 = vld [vmem:[#allocation101_spill] sm:$0xff]  ;;  %v6614_v18 = vld [vmem:[#allocation102_spill] sm:$0xff] }
 0x36e   : > { %2235 = vmatprep.mubr.f32.mxu0 %v2168_v19  ;;  %2170 = vst [vmem:[%s5013_s24 + $0x10] sm:$0xff] %v2168_v19  ;;  %2306 = vmatprep.mubr.f32.mxu1 %v2168_v19 }
 0x36f   : > { %2236 = vmatmul.mubr.f32.vlgmr.msra.gmra.mrb[4].mxu0 %v5773_v22  ;;  %2307 = vmatmul.mubr.f32.vlgmr.msra.gmra.mrb[4].mxu1 %v5773_v22 }
 0x370   : > { %3822 = vmatpush1.bf16.msra.mxu0 %v6508_v55  ;;  %3886 = vmatpush1.bf16.msra.mxu1 %v5330_v21 }
 0x371   : > { %2377 = vmatprep.mubr.f32.mxu0 %v2168_v19  ;;  %2448 = vmatprep.mubr.f32.mxu1 %v2168_v19  ;;  %v6615_v19 = vld [vmem:[#allocation103_spill] sm:$0xff] }
 0x372   : > { %3824 = vmatprep.subr.bf16.mxu0 %v6509_v10  ;;  %3888 = vmatprep.subr.bf16.mxu1 %v6510_v54 }
 0x374   : > { %3826 = vmatpush1.bf16.msra.mxu0 %v6511_v29  ;;  %3890 = vmatpush1.bf16.msra.mxu1 %v6512_v53 }
 0x375   : > { %3828 = vmatprep.subr.bf16.mxu0 %v6599_v44  ;;  %3892 = vmatprep.subr.bf16.mxu1 %v6600_v36 }
 0x378   : > { %3830 = vmatpush1.bf16.msra.mxu0 %v6601_v47  ;;  %3894 = vmatpush1.bf16.msra.mxu1 %v6602_v49 }
 0x379   : > { %3832 = vmatprep.subr.bf16.mxu0 %v6603_v56  ;;  %3896 = vmatprep.subr.bf16.mxu1 %v6604_v43 }
 0x37c   : > { %3834 = vmatpush1.bf16.msra.mxu0 %v6605_v61  ;;  %3898 = vmatpush1.bf16.msra.mxu1 %v6606_v60  ;;  %v6616_v61 = vld [vmem:[#allocation104_spill] sm:$0xff]  ;;  %v6617_v60 = vld [vmem:[#allocation105_spill] sm:$0xff] }
 0x37d   : > { %3836 = vmatprep.subr.bf16.mxu0 %v6607_v13  ;;  %3900 = vmatprep.subr.bf16.mxu1 %v6608_v2  ;;  %v6618_v13 = vld [vmem:[#allocation106_spill] sm:$0xff]  ;;  %v6619_v2 = vld [vmem:[#allocation107_spill] sm:$0xff] }
 0x380   : > { %3838 = vmatpush1.bf16.msra.mxu0 %v6609_v30  ;;  %3902 = vmatpush1.bf16.msra.mxu1 %v6610_v14  ;;  %v6620_v30 = vld [vmem:[#allocation108_spill] sm:$0xff]  ;;  %v6621_v14 = vld [vmem:[#allocation109_spill] sm:$0xff] }
 0x381   : > { %3840 = vmatprep.subr.bf16.mxu0 %v6611_v37  ;;  %3904 = vmatprep.subr.bf16.mxu1 %v6612_v51  ;;  %v6622_v37 = vld [vmem:[#allocation110_spill] sm:$0xff]  ;;  %v6623_v51 = vld [vmem:[#allocation111_spill] sm:$0xff] }
 0x384   : > { %3842 = vmatpush1.bf16.msra.mxu0 %v6613_v20  ;;  %3906 = vmatpush1.bf16.msra.mxu1 %v6614_v18  ;;  %v6624_v20 = vld [vmem:[#allocation112_spill] sm:$0xff]  ;;  %v6625_v18 = vld [vmem:[#allocation113_spill] sm:$0xff] }
 0x385   : > { %3844 = vmatprep.subr.bf16.mxu0 %v6615_v19  ;;  %3908 = vmatprep.subr.bf16.mxu1 %v6616_v61  ;;  %v6626_v19 = vld [vmem:[#allocation114_spill] sm:$0xff]  ;;  %v6627_v61 = vld [vmem:[#allocation115_spill] sm:$0xff] }
 0x388   : > { %3846 = vmatpush1.bf16.msra.mxu0 %v6617_v60  ;;  %3910 = vmatpush1.bf16.msra.mxu1 %v6618_v13  ;;  %v6628_v60 = vld [vmem:[#allocation116_spill] sm:$0xff]  ;;  %v6629_v13 = vld [vmem:[#allocation117_spill] sm:$0xff] }
 0x389   : > { %3848 = vmatprep.subr.bf16.mxu0 %v6619_v2  ;;  %3912 = vmatprep.subr.bf16.mxu1 %v6620_v30  ;;  %v6630_v2 = vld [vmem:[#allocation118_spill] sm:$0xff]  ;;  %v6631_v30 = vld [vmem:[#allocation119_spill] sm:$0xff] }
 0x38c   : > { %3850 = vmatpush1.bf16.msra.mxu0 %v6621_v14  ;;  %3914 = vmatpush1.bf16.msra.mxu1 %v6622_v37  ;;  %v6632_v37 = vld [vmem:[#allocation121_spill] sm:$0xff] }
 0x38d   : > { %3852 = vmatprep.subr.bf16.mxu0 %v6623_v51  ;;  %3916 = vmatprep.subr.bf16.mxu1 %v6624_v20 }
 0x390   : > { %3854 = vmatpush1.bf16.msra.mxu0 %v6625_v18  ;;  %3918 = vmatpush1.bf16.msra.mxu1 %v6626_v19 }
 0x391   : > { %3856 = vmatprep.subr.bf16.mxu0 %v6627_v61  ;;  %3920 = vmatprep.subr.bf16.mxu1 %v6628_v60 }
 0x394   : > { %3858 = vmatpush1.bf16.msra.mxu0 %v6629_v13  ;;  %3922 = vmatpush1.bf16.msra.mxu1 %v6630_v2 }
 0x395   : > { %3860 = vmatprep.subr.bf16.mxu0 %v6631_v30  ;;  %3924 = vmatprep.subr.bf16.mxu1 %v6546_v25 }
 0x398   : > { %3862 = vmatpush1.bf16.msra.mxu0 %v6632_v37  ;;  %3926 = vmatpush1.bf16.msra.mxu1 %v6548_v39 }
 0x399   : > { %3864 = vmatprep.subr.bf16.mxu0 %v6549_v16  ;;  %3928 = vmatprep.subr.bf16.mxu1 %v6550_v11 }
 0x39c   : > { %3866 = vmatpush1.bf16.msra.mxu0 %v6551_v35  ;;  %3930 = vmatpush1.bf16.msra.mxu1 %v6552_v0 }
 0x39d   : > { %3868 = vmatprep.subr.bf16.mxu0 %v6553_v8  ;;  %3932 = vmatprep.subr.bf16.mxu1 %v6554_v38 }
 0x3a0   : > { %3870 = vmatpush1.bf16.msra.mxu0 %v6555_v17  ;;  %3934 = vmatpush1.bf16.msra.mxu1 %v6556_v52 }
 0x3a1   : > { %3872 = vmatprep.subr.bf16.mxu0 %v5480_v48  ;;  %3936 = vmatprep.subr.bf16.mxu1 %v6557_v34 }
 0x3a4   : > { %3874 = vmatpush1.bf16.msra.mxu0 %v5486_v27  ;;  %3938 = vmatpush1.bf16.msra.mxu1 %v5490_v41 }
 0x3a5   : > { %3876 = vmatprep.subr.bf16.mxu0 %v5492_v50  ;;  %3940 = vmatprep.subr.bf16.mxu1 %v5495_v26 }
 0x3a8   : > { %3878 = vmatpush1.bf16.msra.mxu0 %v5498_v40  ;;  %3942 = vmatpush1.bf16.msra.mxu1 %v5502_v62 }
 0x3a9   : > { %3880 = vmatprep.subr.bf16.mxu0 %v5504_v28  ;;  %3944 = vmatprep.subr.bf16.mxu1 %v5507_v42 }
 0x3ac   : > { %3882 = vmatpush1.bf16.msra.mxu0 %v5510_v1  ;;  %3946 = vmatpush1.bf16.msra.mxu1 %v5514_v9  ;;  %v6689_v1 = vld [vmem:[#allocation139_spill] sm:$0xff] }
 0x3ad   : > { %3948 = vmatprep.subr.bf16.mxu0 %v5079_v45  ;;  %4012 = vmatprep.subr.bf16.mxu1 %v5083_v46  ;;  %v6633_v45 = vld [vmem:[#allocation26_spill] sm:$0xff]  ;;  %v6634_v46 = vld [vmem:[#allocation27_spill] sm:$0xff] }
 0x3af   : > { %2378 = vmatmul.mubr.f32.vlgmr.msra.gmra.mrb[12].mxu0 %v5773_v22  ;;  %2449 = vmatmul.mubr.f32.vlgmr.msra.gmra.mrb[12].mxu1 %v5773_v22  ;;  %v6635_v22 = vld [vmem:[#allocation28_spill] sm:$0xff] }
 0x3b0   : > { %3950 = vmatpush1.bf16.msra.mxu0 %v5108_v57  ;;  %4014 = vmatpush1.bf16.msra.mxu1 %v5111_v58  ;;  %v6636_v57 = vld [vmem:[#allocation29_spill] sm:$0xff]  ;;  %v6637_v58 = vld [vmem:[#allocation30_spill] sm:$0xff] }
 0x3b1   : > { %3952 = vmatprep.subr.bf16.mxu0 %v5113_v59  ;;  %4016 = vmatprep.subr.bf16.mxu1 %v5115_v63  ;;  %v6638_v59 = vld [vmem:[#allocation31_spill] sm:$0xff]  ;;  %v6639_v63 = vld [vmem:[#allocation32_spill] sm:$0xff] }
 0x3b4   : > { %3954 = vmatpush1.bf16.msra.mxu0 %v5122_v5  ;;  %4018 = vmatpush1.bf16.msra.mxu1 %v5126_v6  ;;  %v6640_v5 = vld [vmem:[#allocation33_spill] sm:$0xff]  ;;  %v6641_v6 = vld [vmem:[#allocation34_spill] sm:$0xff] }
 0x3b5   : > { %3956 = vmatprep.subr.bf16.mxu0 %v5128_v7  ;;  %4020 = vmatprep.subr.bf16.mxu1 %v5131_v12  ;;  %v6642_v7 = vld [vmem:[#allocation35_spill] sm:$0xff]  ;;  %v6643_v12 = vld [vmem:[#allocation36_spill] sm:$0xff] }
 0x3b8   : > { %3958 = vmatpush1.bf16.msra.mxu0 %v6633_v45  ;;  %4022 = vmatpush1.bf16.msra.mxu1 %v6634_v46  ;;  %v6644_v45 = vld [vmem:[#allocation37_spill] sm:$0xff]  ;;  %v6645_v46 = vld [vmem:[#allocation38_spill] sm:$0xff] }
 0x3b9   : > { %3960 = vmatprep.subr.bf16.mxu0 %v6635_v22  ;;  %4024 = vmatprep.subr.bf16.mxu1 %v6636_v57  ;;  %v6646_v22 = vld [vmem:[#allocation39_spill] sm:$0xff]  ;;  %v6647_v57 = vld [vmem:[#allocation40_spill] sm:$0xff] }
 0x3bc   : > { %3962 = vmatpush1.bf16.msra.mxu0 %v6637_v58  ;;  %4026 = vmatpush1.bf16.msra.mxu1 %v6638_v59  ;;  %v6648_v58 = vld [vmem:[#allocation41_spill] sm:$0xff]  ;;  %v6649_v59 = vld [vmem:[#allocation42_spill] sm:$0xff] }
 0x3bd   : > { %3964 = vmatprep.subr.bf16.mxu0 %v6639_v63  ;;  %4028 = vmatprep.subr.bf16.mxu1 %v6640_v5  ;;  %v6650_v63 = vld [vmem:[#allocation43_spill] sm:$0xff]  ;;  %v6651_v5 = vld [vmem:[#allocation44_spill] sm:$0xff] }
 0x3c0   : > { %3966 = vmatpush1.bf16.msra.mxu0 %v6641_v6  ;;  %4030 = vmatpush1.bf16.msra.mxu1 %v6642_v7  ;;  %v6652_v6 = vld [vmem:[#allocation45_spill] sm:$0xff]  ;;  %v6653_v7 = vld [vmem:[#allocation46_spill] sm:$0xff] }
 0x3c1   : > { %3968 = vmatprep.subr.bf16.mxu0 %v6643_v12  ;;  %4032 = vmatprep.subr.bf16.mxu1 %v6644_v45  ;;  %v6654_v12 = vld [vmem:[#allocation47_spill] sm:$0xff]  ;;  %v6655_v45 = vld [vmem:[#allocation48_spill] sm:$0xff] }
 0x3c4   : > { %3970 = vmatpush1.bf16.msra.mxu0 %v6645_v46  ;;  %4034 = vmatpush1.bf16.msra.mxu1 %v6646_v22  ;;  %v6656_v46 = vld [vmem:[#allocation49_spill] sm:$0xff]  ;;  %v6657_v22 = vld [vmem:[#allocation50_spill] sm:$0xff] }
 0x3c5   : > { %3972 = vmatprep.subr.bf16.mxu0 %v6647_v57  ;;  %4036 = vmatprep.subr.bf16.mxu1 %v6648_v58  ;;  %v6658_v57 = vld [vmem:[#allocation51_spill] sm:$0xff]  ;;  %v6659_v58 = vld [vmem:[#allocation52_spill] sm:$0xff] }
 0x3c8   : > { %3974 = vmatpush1.bf16.msra.mxu0 %v6649_v59  ;;  %4038 = vmatpush1.bf16.msra.mxu1 %v6650_v63  ;;  %v6660_v59 = vld [vmem:[#allocation53_spill] sm:$0xff]  ;;  %v6661_v63 = vld [vmem:[#allocation54_spill] sm:$0xff] }
 0x3c9   : > { %3976 = vmatprep.subr.bf16.mxu0 %v6651_v5  ;;  %4040 = vmatprep.subr.bf16.mxu1 %v6652_v6  ;;  %v6662_v5 = vld [vmem:[#allocation55_spill] sm:$0xff]  ;;  %v6663_v6 = vld [vmem:[#allocation56_spill] sm:$0xff] }
 0x3cc   : > { %3978 = vmatpush1.bf16.msra.mxu0 %v6653_v7  ;;  %4042 = vmatpush1.bf16.msra.mxu1 %v6654_v12  ;;  %v6664_v7 = vld [vmem:[#allocation57_spill] sm:$0xff]  ;;  %v6665_v12 = vld [vmem:[#allocation58_spill] sm:$0xff] }
 0x3cd   : > { %3980 = vmatprep.subr.bf16.mxu0 %v6655_v45  ;;  %4044 = vmatprep.subr.bf16.mxu1 %v6656_v46  ;;  %v6666_v45 = vld [vmem:[#allocation59_spill] sm:$0xff]  ;;  %v6667_v46 = vld [vmem:[#allocation60_spill] sm:$0xff] }
 0x3d0   : > { %3982 = vmatpush1.bf16.msra.mxu0 %v6657_v22  ;;  %4046 = vmatpush1.bf16.msra.mxu1 %v6658_v57  ;;  %v6668_v22 = vld [vmem:[#allocation61_spill] sm:$0xff]  ;;  %v6669_v57 = vld [vmem:[#allocation62_spill] sm:$0xff] }
 0x3d1   : > { %3984 = vmatprep.subr.bf16.mxu0 %v6659_v58  ;;  %4048 = vmatprep.subr.bf16.mxu1 %v6660_v59  ;;  %v6670_v58 = vld [vmem:[#allocation63_spill] sm:$0xff]  ;;  %v6671_v59 = vld [vmem:[#allocation64_spill] sm:$0xff] }
 0x3d4   : > { %3986 = vmatpush1.bf16.msra.mxu0 %v6661_v63  ;;  %4050 = vmatpush1.bf16.msra.mxu1 %v6662_v5  ;;  %v6672_v63 = vld [vmem:[#allocation65_spill] sm:$0xff]  ;;  %v6673_v5 = vld [vmem:[#allocation66_spill] sm:$0xff] }
 0x3d5   : > { %3988 = vmatprep.subr.bf16.mxu0 %v6663_v6  ;;  %4052 = vmatprep.subr.bf16.mxu1 %v6664_v7  ;;  %v6674_v6 = vld [vmem:[#allocation67_spill] sm:$0xff]  ;;  %v6675_v7 = vld [vmem:[#allocation68_spill] sm:$0xff] }
 0x3d8   : > { %3990 = vmatpush1.bf16.msra.mxu0 %v6665_v12  ;;  %4054 = vmatpush1.bf16.msra.mxu1 %v6666_v45  ;;  %v6676_v12 = vld [vmem:[#allocation69_spill] sm:$0xff]  ;;  %v6677_v45 = vld [vmem:[#allocation70_spill] sm:$0xff] }
 0x3d9   : > { %3992 = vmatprep.subr.bf16.mxu0 %v6667_v46  ;;  %4056 = vmatprep.subr.bf16.mxu1 %v6668_v22  ;;  %v6678_v46 = vld [vmem:[#allocation71_spill] sm:$0xff]  ;;  %v6679_v22 = vld [vmem:[#allocation72_spill] sm:$0xff] }
 0x3dc   : > { %3994 = vmatpush1.bf16.msra.mxu0 %v6669_v57  ;;  %4058 = vmatpush1.bf16.msra.mxu1 %v6670_v58  ;;  %v6680_v57 = vld [vmem:[#allocation73_spill] sm:$0xff]  ;;  %v6681_v58 = vld [vmem:[#allocation74_spill] sm:$0xff] }
 0x3dd   : > { %3996 = vmatprep.subr.bf16.mxu0 %v6671_v59  ;;  %4060 = vmatprep.subr.bf16.mxu1 %v6672_v63  ;;  %v6682_v59 = vld [vmem:[#allocation75_spill] sm:$0xff]  ;;  %v6683_v63 = vld [vmem:[#allocation76_spill] sm:$0xff] }
 0x3e0   : > { %3998 = vmatpush1.bf16.msra.mxu0 %v6673_v5  ;;  %4062 = vmatpush1.bf16.msra.mxu1 %v6674_v6  ;;  %v6684_v5 = vld [vmem:[#allocation77_spill] sm:$0xff]  ;;  %v6685_v6 = vld [vmem:[#allocation78_spill] sm:$0xff] }
 0x3e1   : > { %4000 = vmatprep.subr.bf16.mxu0 %v6675_v7  ;;  %4064 = vmatprep.subr.bf16.mxu1 %v6676_v12  ;;  %v6686_v7 = vld [vmem:[#allocation79_spill] sm:$0xff]  ;;  %v6687_v12 = vld [vmem:[#allocation80_spill] sm:$0xff] }
 0x3e4   : > { %4002 = vmatpush1.bf16.msra.mxu0 %v6677_v45  ;;  %4066 = vmatpush1.bf16.msra.mxu1 %v6678_v46  ;;  %v6688_v45 = vld [vmem:[#allocation81_spill] sm:$0xff] }
 0x3e5   : > { %4004 = vmatprep.subr.bf16.mxu0 %v6679_v22  ;;  %4068 = vmatprep.subr.bf16.mxu1 %v6680_v57 }
 0x3e8   : > { %4006 = vmatpush1.bf16.msra.mxu0 %v6681_v58  ;;  %4070 = vmatpush1.bf16.msra.mxu1 %v6682_v59 }
 0x3e9   : > { %4008 = vmatprep.subr.bf16.mxu0 %v6683_v63  ;;  %4072 = vmatprep.subr.bf16.mxu1 %v6684_v5 }
 0x3ec   : > { %4010 = vmatpush1.bf16.msra.mxu0 %v6685_v6  ;;  %4074 = vmatpush1.bf16.msra.mxu1 %v6686_v7 }
 0x3ed   : > { %4076 = vmatprep.subr.bf16.mxu0 %v6687_v12  ;;  %4140 = vmatprep.subr.bf16.mxu1 %v6688_v45 }
 0x442   : > { %v2237_v46 = vpop.f32.mrb[4].mxu0  ;;  %v2308_v22 = vpop.f32.mrb[4].mxu1 }
 0x443   : > { %v2239_v9 = vpop.f32.mrb[5].mxu0  ;;  %v2310_v57 = vpop.f32.mrb[5].mxu1  ;;  %v4207_v58 = vadd.f32 %v2237_v46, %v6689_v1  ;;  %v4215_v59 = vadd.f32 %v2308_v22, %v6596_v32 }
 0x444   : > { %v4208_v63 = vadd.f32 %v2239_v9, %v6597_v31  ;;  %v4216_v5 = vadd.f32 %v2310_v57, %v5596_v23 }
 0x445   : > { %v3093_v42 = vmul.f32 -1.442695, %v4207_v58  ;;  %v3095_v6 = vmul.f32 -1.442695, %v4215_v59 }
 0x446   : > { %v3094_v28 = vmul.f32 -1.442695, %v4208_v63  ;;  %v3096_v7 = vmul.f32 -1.442695, %v4216_v5  ;;  %v6690_v63 = vld [vmem:[#allocation142_spill] sm:$0xff] }
 0x447   : > { %4468 = vpow2.f32 %v3093_v42 }
 0x448   : > { %4470 = vpow2.f32 %v3095_v6 }
 0x449   : > { %4472 = vpow2.f32 %v3094_v28 }
 0x44a   : > { %4474 = vpow2.f32 %v3096_v7 }
 0x451   : > { %v4469_v12 = vpop.eup %4468 }
 0x452   : > { %v4471_v45 = vpop.eup %4470  ;;  %v2481_v26 = vadd.f32 1.0, %v4469_v12 }
 0x453   : > { %v4473_v62 = vpop.eup %4472  ;;  %v2483_v46 = vadd.f32 1.0, %v4471_v45 }
 0x454   : > { %v4475_v40 = vpop.eup %4474  ;;  %v2482_v1 = vadd.f32 1.0, %v4473_v62  ;;  %4476 = vrcp.f32 %v2481_v26 }
 0x455   : > { %v2484_v22 = vadd.f32 1.0, %v4475_v40  ;;  %4478 = vrcp.f32 %v2483_v46 }
 0x456   : > { %4480 = vrcp.f32 %v2482_v1 }
 0x457   : > { %4482 = vrcp.f32 %v2484_v22 }
 0x45e   : > { %v4477_v40 = vpop.eup %4476 }
 0x45f   : > { %v4479_v26 = vpop.eup %4478 }
 0x460   : > { %v4481_v1 = vpop.eup %4480 }
 0x461   : > { %v4483_v12 = vpop.eup %4482 }
 0x482   : > { %v2379_v9 = vpop.f32.mrb[12].mxu0  ;;  %v2450_v57 = vpop.f32.mrb[12].mxu1 }
 0x483   : > { %v4223_v58 = vadd.f32 %v2379_v9, %v5602_v3  ;;  %v4231_v42 = vadd.f32 %v2450_v57, %v5604_v4  ;;  %v2381_v59 = vpop.f32.mrb[13].mxu0  ;;  %v2452_v28 = vpop.f32.mrb[13].mxu1  ;;  %v2501_v9 = vmul.f32 %v4479_v26, %v5767_v24 }
 0x484   : > { %v4224_v5 = vadd.f32 %v2381_v59, %v6690_v63  ;;  %v4232_v6 = vadd.f32 %v2452_v28, %v5608_v33  ;;  %v2502_v59 = vmul.f32 %v4483_v12, %v5769_v15  ;;  %v6705_v12 = vld [vmem:[#allocation107_spill] sm:$0xff] }
 0x485   : > { %v3097_v7 = vmul.f32 -1.442695, %v4223_v58  ;;  %4484 = vtanh.f32 %v4231_v42 }
 0x486   : > { %v3098_v62 = vmul.f32 -1.442695, %v4224_v5  ;;  %4486 = vtanh.f32 %v4232_v6 }
 0x487   : > { %4488 = vpow2.f32 %v3097_v7 }
 0x488   : > { %4490 = vpow2.f32 %v3098_v62 }
 0x48f   : > { %v4485_v45 = vpop.eup %4484 }
 0x490   : > { %v4487_v46 = vpop.eup %4486  ;;  %v2503_v57 = vmul.f32 %v4485_v45, %v4477_v40  ;;  %v6706_v45 = vld [vmem:[#allocation108_spill] sm:$0xff] }
 0x491   : > { %v4489_v22 = vpop.eup %4488  ;;  %v2504_v63 = vmul.f32 %v4487_v46, %v4481_v1  ;;  %v6704_v1 = vld [vmem:[#allocation106_spill] sm:$0xff] }
 0x492   : > { %v4491_v58 = vpop.eup %4490  ;;  %v2485_v42 = vadd.f32 1.0, %v4489_v22  ;;  %v5920_v28 = vadd.f32 %v2503_v57, %v2501_v9  ;;  %v6707_v46 = vld [vmem:[#allocation110_spill] sm:$0xff] }
 0x493   : > { %v2486_v5 = vadd.f32 1.0, %v4491_v58  ;;  %v5922_v6 = vadd.f32 %v2504_v63, %v2502_v59  ;;  %v6703_v63 = vld [vmem:[#allocation105_spill] sm:$0xff] }
 0x494   : > { %4492 = vrcp.f32 %v2485_v42  ;;  %v6716_v42 = vld [vmem:[#allocation142_spill] sm:$0xff] }
 0x495   : > { %4494 = vtanh.f32 %v5920_v28 }
 0x496   : > { %4496 = vrcp.f32 %v2486_v5 }
 0x497   : > { %4498 = vtanh.f32 %v5922_v6 }
 0x49e   : > { %v4493_v24 = vpop.eup %4492 }
 0x49f   : > { %v4495_v7 = vpop.eup %4494 }
 0x4a0   : > { %v4497_v62 = vpop.eup %4496  ;;  %v5926_v15 = vmul.f32 %v4495_v7, %v4493_v24 }
 0x4a1   : > { %v4499_v40 = vpop.eup %4498 }
 0x4a2   : > { %v2510_v26 = vmul.f32 %v4499_v40, %v4497_v62  ;;  %2511 = vst [vmem:[%s5011_s18 + $0x10] sm:$0xff] %v5926_v15 }
 0x4a4   : > { %2577 = vmatprep.mubr.f32.mxu0 %v2510_v26  ;;  %2512 = vst [vmem:[%s5013_s24 + $0x8] sm:$0xff] %v2510_v26  ;;  %2648 = vmatprep.mubr.f32.mxu1 %v2510_v26 }
 0x4a5   : > { %2578 = vmatmul.mubr.f32.vlgmr.msra.gmra.mrb[6].mxu0 %v5926_v15  ;;  %2649 = vmatmul.mubr.f32.vlgmr.msra.gmra.mrb[6].mxu1 %v5926_v15 }
 0x4a6   : > { %4078 = vmatpush1.bf16.msra.mxu0 %v6508_v55  ;;  %4142 = vmatpush1.bf16.msra.mxu1 %v5330_v21  ;;  %v6691_v21 = vld [vmem:[#allocation93_spill] sm:$0xff]  ;;  %v6692_v55 = vld [vmem:[#allocation94_spill] sm:$0xff] }
 0x4a7   : > { %2719 = vmatprep.mubr.f32.mxu0 %v2510_v26  ;;  %2790 = vmatprep.mubr.f32.mxu1 %v2510_v26 }
 0x4a8   : > { %4080 = vmatprep.subr.bf16.mxu0 %v6509_v10  ;;  %4144 = vmatprep.subr.bf16.mxu1 %v6510_v54  ;;  %v6693_v10 = vld [vmem:[#allocation95_spill] sm:$0xff]  ;;  %v6694_v54 = vld [vmem:[#allocation96_spill] sm:$0xff] }
 0x4aa   : > { %4082 = vmatpush1.bf16.msra.mxu0 %v6511_v29  ;;  %4146 = vmatpush1.bf16.msra.mxu1 %v6512_v53  ;;  %v6695_v29 = vld [vmem:[#allocation97_spill] sm:$0xff]  ;;  %v6696_v53 = vld [vmem:[#allocation98_spill] sm:$0xff] }
 0x4ab   : > { %4084 = vmatprep.subr.bf16.mxu0 %v6599_v44  ;;  %4148 = vmatprep.subr.bf16.mxu1 %v6600_v36  ;;  %v6697_v44 = vld [vmem:[#allocation99_spill] sm:$0xff]  ;;  %v6698_v36 = vld [vmem:[#allocation100_spill] sm:$0xff] }
 0x4ae   : > { %4086 = vmatpush1.bf16.msra.mxu0 %v6601_v47  ;;  %4150 = vmatpush1.bf16.msra.mxu1 %v6602_v49  ;;  %v6699_v47 = vld [vmem:[#allocation101_spill] sm:$0xff]  ;;  %v6700_v49 = vld [vmem:[#allocation102_spill] sm:$0xff] }
 0x4af   : > { %4088 = vmatprep.subr.bf16.mxu0 %v6603_v56  ;;  %4152 = vmatprep.subr.bf16.mxu1 %v6604_v43  ;;  %v6701_v56 = vld [vmem:[#allocation103_spill] sm:$0xff]  ;;  %v6702_v43 = vld [vmem:[#allocation104_spill] sm:$0xff] }
 0x4b2   : > { %4090 = vmatpush1.bf16.msra.mxu0 %v6691_v21  ;;  %4154 = vmatpush1.bf16.msra.mxu1 %v6692_v55 }
 0x4b3   : > { %4092 = vmatprep.subr.bf16.mxu0 %v6693_v10  ;;  %4156 = vmatprep.subr.bf16.mxu1 %v6694_v54 }
 0x4b6   : > { %4094 = vmatpush1.bf16.msra.mxu0 %v6695_v29  ;;  %4158 = vmatpush1.bf16.msra.mxu1 %v6696_v53 }
 0x4b7   : > { %4096 = vmatprep.subr.bf16.mxu0 %v6697_v44  ;;  %4160 = vmatprep.subr.bf16.mxu1 %v6698_v36 }
 0x4ba   : > { %4098 = vmatpush1.bf16.msra.mxu0 %v6699_v47  ;;  %4162 = vmatpush1.bf16.msra.mxu1 %v6700_v49 }
 0x4bb   : > { %4100 = vmatprep.subr.bf16.mxu0 %v6701_v56  ;;  %4164 = vmatprep.subr.bf16.mxu1 %v6702_v43 }
 0x4be   : > { %4102 = vmatpush1.bf16.msra.mxu0 %v6703_v63  ;;  %4166 = vmatpush1.bf16.msra.mxu1 %v6704_v1 }
 0x4bf   : > { %4104 = vmatprep.subr.bf16.mxu0 %v6705_v12  ;;  %4168 = vmatprep.subr.bf16.mxu1 %v6706_v45 }
 0x4c2   : > { %4106 = vmatpush1.bf16.msra.mxu0 %v6621_v14  ;;  %4170 = vmatpush1.bf16.msra.mxu1 %v6707_v46 }
 0x4c3   : > { %4108 = vmatprep.subr.bf16.mxu0 %v6623_v51  ;;  %4172 = vmatprep.subr.bf16.mxu1 %v6624_v20 }
 0x4c6   : > { %4110 = vmatpush1.bf16.msra.mxu0 %v6625_v18  ;;  %4174 = vmatpush1.bf16.msra.mxu1 %v6626_v19 }
 0x4c7   : > { %4112 = vmatprep.subr.bf16.mxu0 %v6627_v61  ;;  %4176 = vmatprep.subr.bf16.mxu1 %v6628_v60 }
 0x4ca   : > { %4114 = vmatpush1.bf16.msra.mxu0 %v6629_v13  ;;  %4178 = vmatpush1.bf16.msra.mxu1 %v6630_v2 }
 0x4cb   : > { %4116 = vmatprep.subr.bf16.mxu0 %v6631_v30  ;;  %4180 = vmatprep.subr.bf16.mxu1 %v6546_v25  ;;  %v6708_v25 = vld [vmem:[#allocation132_spill] sm:$0xff] }
 0x4ce   : > { %4118 = vmatpush1.bf16.msra.mxu0 %v6632_v37  ;;  %4182 = vmatpush1.bf16.msra.mxu1 %v6548_v39  ;;  %v6709_v39 = vld [vmem:[#allocation133_spill] sm:$0xff] }
 0x4cf   : > { %4120 = vmatprep.subr.bf16.mxu0 %v6549_v16  ;;  %4184 = vmatprep.subr.bf16.mxu1 %v6550_v11  ;;  %v6710_v16 = vld [vmem:[#allocation134_spill] sm:$0xff]  ;;  %v6711_v11 = vld [vmem:[#allocation135_spill] sm:$0xff] }
 0x4d2   : > { %4122 = vmatpush1.bf16.msra.mxu0 %v6551_v35  ;;  %4186 = vmatpush1.bf16.msra.mxu1 %v6552_v0  ;;  %v6712_v35 = vld [vmem:[#allocation136_spill] sm:$0xff]  ;;  %v6713_v0 = vld [vmem:[#allocation137_spill] sm:$0xff] }
 0x4d3   : > { %4124 = vmatprep.subr.bf16.mxu0 %v6553_v8  ;;  %4188 = vmatprep.subr.bf16.mxu1 %v6554_v38  ;;  %v6715_v8 = vld [vmem:[#allocation139_spill] sm:$0xff] }
 0x4d6   : > { %4126 = vmatpush1.bf16.msra.mxu0 %v6555_v17  ;;  %4190 = vmatpush1.bf16.msra.mxu1 %v6556_v52 }
 0x4d7   : > { %4128 = vmatprep.subr.bf16.mxu0 %v5480_v48  ;;  %4192 = vmatprep.subr.bf16.mxu1 %v6557_v34  ;;  %v6714_v48 = vld [vmem:[#allocation138_spill] sm:$0xff] }
 0x4da   : > { %4130 = vmatpush1.bf16.msra.mxu0 %v5486_v27  ;;  %4194 = vmatpush1.bf16.msra.mxu1 %v5490_v41 }
 0x4db   : > { %4132 = vmatprep.subr.bf16.mxu0 %v5492_v50  ;;  %4196 = vmatprep.subr.bf16.mxu1 %v6708_v25 }
 0x4de   : > { %4134 = vmatpush1.bf16.msra.mxu0 %v6709_v39  ;;  %4198 = vmatpush1.bf16.msra.mxu1 %v6710_v16 }
 0x4df   : > { %4136 = vmatprep.subr.bf16.mxu0 %v6711_v11  ;;  %4200 = vmatprep.subr.bf16.mxu1 %v6712_v35 }
 0x4e2   : > { %4138 = vmatpush1.bf16.msra.mxu0 %v6713_v0  ;;  %4202 = vmatpush1.bf16.msra.mxu1 %v6714_v48 }
 0x4e5   : > { %2720 = vmatmul.mubr.f32.vlgmr.msra.gmra.mrb[14].mxu0 %v5926_v15  ;;  %2791 = vmatmul.mubr.f32.vlgmr.msra.gmra.mrb[14].mxu1 %v5926_v15 }
 0x578   : > { %v2579_v27 = vpop.f32.mrb[6].mxu0  ;;  %v2650_v41 = vpop.f32.mrb[6].mxu1 }
 0x579   : > { %v2581_v50 = vpop.f32.mrb[7].mxu0  ;;  %v2652_v34 = vpop.f32.mrb[7].mxu1  ;;  %v4209_v38 = vadd.f32 %v2579_v27, %v6715_v8  ;;  %v4217_v17 = vadd.f32 %v2650_v41, %v6596_v32 }
 0x57a   : > { %v4210_v52 = vadd.f32 %v2581_v50, %v6597_v31  ;;  %v4218_v61 = vadd.f32 %v2652_v34, %v5596_v23 }
 0x57b   : > { %v3099_v60 = vmul.f32 -1.442695, %v4209_v38  ;;  %v3101_v13 = vmul.f32 -1.442695, %v4217_v17 }
 0x57c   : > { %v3100_v2 = vmul.f32 -1.442695, %v4210_v52  ;;  %v3102_v30 = vmul.f32 -1.442695, %v4218_v61 }
 0x57d   : > { %4500 = vpow2.f32 %v3099_v60 }
 0x57e   : > { %4502 = vpow2.f32 %v3101_v13 }
 0x57f   : > { %4504 = vpow2.f32 %v3100_v2 }
 0x580   : > { %4506 = vpow2.f32 %v3102_v30 }
 0x587   : > { %v4501_v14 = vpop.eup %4500 }
 0x588   : > { %v4503_v37 = vpop.eup %4502  ;;  %v2823_v18 = vadd.f32 1.0, %v4501_v14 }
 0x589   : > { %v4505_v51 = vpop.eup %4504  ;;  %v2825_v19 = vadd.f32 1.0, %v4503_v37 }
 0x58a   : > { %v4507_v20 = vpop.eup %4506  ;;  %v2824_v9 = vadd.f32 1.0, %v4505_v51  ;;  %4508 = vrcp.f32 %v2823_v18 }
 0x58b   : > { %v2826_v32 = vadd.f32 1.0, %v4507_v20  ;;  %4510 = vrcp.f32 %v2825_v19 }
 0x58c   : > { %4512 = vrcp.f32 %v2824_v9 }
 0x58d   : > { %4514 = vrcp.f32 %v2826_v32 }
 0x594   : > { %v4509_v15 = vpop.eup %4508 }
 0x595   : > { %v4511_v40 = vpop.eup %4510 }
 0x596   : > { %v4513_v26 = vpop.eup %4512 }
 0x597   : > { %v4515_v21 = vpop.eup %4514 }
 0x5b8   : > { %v2721_v31 = vpop.f32.mrb[14].mxu0  ;;  %v2792_v23 = vpop.f32.mrb[14].mxu1 }
 0x5b9   : > { %v4225_v57 = vadd.f32 %v2721_v31, %v5602_v3  ;;  %v4233_v22 = vadd.f32 %v2792_v23, %v5604_v4  ;;  %v2723_v59 = vpop.f32.mrb[15].mxu0  ;;  %v2794_v58 = vpop.f32.mrb[15].mxu1  ;;  %v2843_v4 = vmul.f32 %v4511_v40, %v5920_v28 }
 0x5ba   : > { %v4226_v5 = vadd.f32 %v2723_v59, %v6716_v42  ;;  %v4234_v24 = vadd.f32 %v2794_v58, %v5608_v33  ;;  %v2844_v33 = vmul.f32 %v4515_v21, %v5922_v6 }
 0x5bb   : > { %v3103_v7 = vmul.f32 -1.442695, %v4225_v57  ;;  %4516 = vtanh.f32 %v4233_v22 }
 0x5bc   : > { %v3104_v62 = vmul.f32 -1.442695, %v4226_v5  ;;  %4518 = vtanh.f32 %v4234_v24 }
 0x5bd   : > { %4520 = vpow2.f32 %v3103_v7 }
 0x5be   : > { %4522 = vpow2.f32 %v3104_v62 }
 0x5c5   : > { %v4517_v3 = vpop.eup %4516 }
 0x5c6   : > { %v4519_v55 = vpop.eup %4518  ;;  %v2845_v10 = vmul.f32 %v4517_v3, %v4509_v15 }
 0x5c7   : > { %v4521_v54 = vpop.eup %4520  ;;  %v2846_v29 = vmul.f32 %v4519_v55, %v4513_v26 }
 0x5c8   : > { %v4523_v53 = vpop.eup %4522  ;;  %v2827_v44 = vadd.f32 1.0, %v4521_v54  ;;  %v2847_v36 = vadd.f32 %v2845_v10, %v2843_v4 }
 0x5c9   : > { %v2828_v47 = vadd.f32 1.0, %v4523_v53  ;;  %v2848_v49 = vadd.f32 %v2846_v29, %v2844_v33 }
 0x5ca   : > { %4524 = vrcp.f32 %v2827_v44  ;;  %2857 = vst [vmem:[#allocation3] sm:$0xff] %v2847_v36 }
 0x5cb   : > { %4526 = vtanh.f32 %v2847_v36  ;;  %2858 = vst [vmem:[#allocation3 + $0x8] sm:$0xff] %v2848_v49 }
 0x5cc   : > { %4528 = vrcp.f32 %v2828_v47 }
 0x5cd   : > { %4530 = vtanh.f32 %v2848_v49 }
 0x5d4   : > { %v4525_v28 = vpop.eup %4524 }
 0x5d5   : > { %v4527_v6 = vpop.eup %4526 }
 0x5d6   : > { %v4529_v56 = vpop.eup %4528  ;;  %v2851_v43 = vmul.f32 %v4527_v6, %v4525_v28 }
 0x5d7   : > { %v4531_v63 = vpop.eup %4530 }
 0x5d8   : > { %2853 = vst [vmem:[%s5011_s18 + $0x18] sm:$0xff] %v2851_v43  ;;  %2855 = vst [vmem:[#allocation2] sm:$0xff] %v2851_v43  ;;  %v2852_v1 = vmul.f32 %v4531_v63, %v4529_v56  ;;  %s4622_s18 = scalar_lea.vmem %s4621_s17, 1024 }
 0x5d9   : > { %p4624_p7 = scmp.lt.s32.totalorder %s4622_s18, %s4616_s8 }
 0x5db   : > { %p4625_p5 = por %p4624_p7, %p4623_p13 }
 0x5dd   : > { %p4626_p8 = pnand %p4625_p5, %p4619_p10 }
 0x5df   : > { %4629 = shalt.err (!%p4626_p8)
}
 0x5e0   : > { %s4630_s9 = scalar_lea.hbm %s6012_s10, 512  ;;  %s4634_s23 = scalar_lea.hbm %s6121_s6, 1024 }
 0x5e1   : > { %p4631_p6 = scmp.ne.s32.totalorder %s6012_s10, %s4630_s9  ;;  %p4635_p2 = scmp.lt.u32.totalorder %s6012_s10, %s6121_s6 }
 0x5e2   : > { %p4636_p0 = scmp.lt.u32.totalorder %s4634_s23, %s4630_s9  ;;  %p4638_p3 = scmp.lt.u32.totalorder %s4630_s9, %s6012_s10 }
 0x5e3   : > { %p4632_p11 = pnand %p4631_p6, %p6717_p4 }
 0x5e4   : > { %p4637_p1 = por %p4636_p0, %p4635_p2 }
 0x5e5   : > { %p4633_p12 = pneg %p4632_p11 }
 0x5e6   : > { %p4639_p9 = por %p4638_p3, %p4637_p1 }
 0x5e8   : > { %p4640_p10 = pnand %p4639_p9, %p4633_p12 }
 0x5ea   : > { %4643 = shalt.err (!%p4640_p10)
}
 0x5eb   : > { %s4752_s29 = smov 128   ;;  %s4753_s8 = smov 8   ;;  %2854 = vst [vmem:[%s5013_s24] sm:$0xff] %v2852_v1  ;;  %2856 = vst [vmem:[#allocation2 + $0x8] sm:$0xff] %v2852_v1 }
 0x5ec   : > { %4311 = dma.vmem_to_hbm [thread:$0]  (%p6717_p4), %s6014_s27, 512, %s6012_s10, %s6029_s20, %s4752_s29, %s4752_s29, %s4753_s8  }
 0x5ed   : > { %s6059_s14 = scalar_lea.sflag [#allocation12], %s348_s13  ;;  %s4644_s17 = scalar_lea.vmem %s6025_s11, 512 }
 0x5ee   : > { %p4645_p13 = scmp.ne.s32.totalorder %s6025_s11, %s4644_s17  ;;  %p6718_p7 = scmp.ne.s32.totalorder %s6354_s22, 0 }
 0x5ef   : > { %s4754_s18 = smov [#allocation11]  }
 0x5f0   : > { %p4646_p5 = pnand %p4645_p13, %p6718_p7  ;;  %s4648_s9 = sshll.u32 %s4754_s18, 4  ;;  %s4649_s9 = int_to_ptr.vmem [resolvable:$false] %s4648_s9 }
 0x5f1   : > { %s4650_s26 = scalar_lea.vmem %s4649_s9, 1024  ;;  %p4651_p6 = scmp.lt.s32.totalorder %s6025_s11, %s4649_s9 }
 0x5f2   : > { %p4647_p8 = pneg %p4646_p5  ;;  %p4652_p11 = scmp.lt.s32.totalorder %s4650_s26, %s4644_s17 }
 0x5f4   : > { %p4653_p12 = por %p4652_p11, %p4651_p6 }
 0x5f6   : > { %p4654_p2 = pnand %p4653_p12, %p4647_p8 }
 0x5f8   : > { %4657 = shalt.err (!%p4654_p2)
}
 0x5f9   : > { %s4658_s15 = scalar_lea.hbm %s6023_s12, 512  ;;  %s4662_s27 = scalar_lea.hbm %s6122_s7, 1024 }
 0x5fa   : > { %p4659_p4 = scmp.ne.s32.totalorder %s6023_s12, %s4658_s15  ;;  %p4663_p3 = scmp.lt.u32.totalorder %s6023_s12, %s6122_s7 }
 0x5fb   : > { %p4664_p9 = scmp.lt.u32.totalorder %s4662_s27, %s4658_s15  ;;  %p4666_p13 = scmp.lt.u32.totalorder %s4658_s15, %s6023_s12 }
 0x5fc   : > { %p4660_p0 = pnand %p4659_p4, %p6718_p7 }
 0x5fd   : > { %p4665_p10 = por %p4664_p9, %p4663_p3 }
 0x5fe   : > { %p4661_p1 = pneg %p4660_p0 }
 0x5ff   : > { %p4667_p5 = por %p4666_p13, %p4665_p10 }
 0x601   : > { %p4668_p8 = pnand %p4667_p5, %p4661_p1 }
 0x603   : > { %4671 = shalt.err (!%p4668_p8)
}
 0x604   : > { %4312 = dma.vmem_to_hbm [thread:$0]  (%p6718_p7), %s6025_s11, 512, %s6023_s12, %s6059_s14, %s4752_s29, %s4752_s29, %s4753_s8  }
 0x605 PF: > { %s6719_s16 = sld [smem:[#allocation19_spill]]  ;;  %s6720_s23 = sld [smem:[#allocation23_spill]] }
 0x606   : > { %p4338_p6 = scmp.ge.s32.totalorder %s4742_s30, 2 }
 0x60b   : > { %s2910_s21 = sand.u32 1, %s6719_s16   ;;  %p6721_p11 = scmp.ne.s32.totalorder %s6720_s23, 0 }
 0x60c   : > { %s2911_s19 = scalar_lea.sflag [#allocation6], %s2910_s21 }
 0x60d   : > { %p4326_p12 = pnand %p4338_p6, %p6721_p11 }
 0x60f   : > { %4709 = dma.done.wait (!%p4326_p12), %s2911_s19, 512  }
 0x610   : > { %4711 = vsyncadd (!%p4326_p12), %s2911_s19, 4294966784  ;;  %s6722_s17 = sld [smem:[#allocation17_spill]]  ;;  %s6723_s22 = sld [smem:[#allocation25_spill]] }
 0x616   : > { %s2919_s18 = sand.u32 1, %s6722_s17   ;;  %p6724_p2 = scmp.ne.s32.totalorder %s6723_s22, 0 }
 0x617   : > { %s2920_s9 = scalar_lea.sflag [#allocation12], %s2919_s18 }
 0x618   : > { %p4329_p4 = pnand %p4338_p6, %p6724_p2 }
 0x61a   : > { %4713 = dma.done.wait (!%p4329_p4), %s2920_s9, 512  }
 0x61b   : > { %4715 = vsyncadd (!%p4329_p4), %s2920_s9, 4294966784  ;;  %s6725_s30 = sld [smem:[#allocation21_spill]]  ;;  %s6726_s11 = sld [smem:[#allocation18_spill]] }
 0x61c   : > { %s6727_s26 = sld [smem:[#allocation24_spill]]  ;;  %s6728_s12 = sld [smem:[#allocation20_spill]] }
 0x61d   : > { %s6729_s29 = sld [smem:[#allocation22_spill]]  ;;  %s6730_s24 = smov %s4722_s25 }
 0x61e   : > { %s6732_s27 = smov %s4734_s28 }
 0x621   : > { %p23_p7 = scmp.ge.s32.totalorder %s6725_s30, 4   ;;  %s6731_s25 = smov %s6726_s11 }
 0x622   : > { %s6733_s28 = smov %s6728_s12 }
 0x623   :  { %25 = sbr.rel (!%p23_p7) target bundleno = 9 (0x9), region = 116 }
 0x62a   :  { %2925 = vsyncpa [#allocation5], 1 }
 0x62b   :  { %2927 = vsyncpa [#allocation5 + $0x1], 1 }
 0x62c   :  { %2928 = vsyncpa [#allocation8], 1 }
 0x62d   :  { %2929 = vsyncpa [#allocation6], 1 }
 0x62e   :  { %2931 = vsyncpa [#allocation6 + $0x1], 1 }
 0x62f   :  { %2932 = vsyncpa [#allocation12], 1 }
 0x630   :  { %2934 = vsyncpa [#allocation12 + $0x1], 1 }

</bundles_post_ra>
